<compile_context>
chip_gen: v7x
topology: tpu7x:2x2x1
jax: 0.10.0
libtpu: 0.0.40
codegen_flags: <defaults>
</compile_context>

<pallas_src>
import functools

import jax
import jax.numpy as jnp
from jax.experimental import pallas as pl
from jax.experimental.pallas import tpu as pltpu


# ----------------------------- fused LSTM kernel -----------------------------

def _fused_lstm_kernel(*refs, hidden, seq_len, n_layers, num_dir, unroll):
    """All LSTM layers (+ fused FC) in one kernel.

    Gate layout along the G = 4*D*H axis is GATE-major: [i | f | g | o], each
    block D*H wide and direction-major inside ([fwd | bwd]).  The carried
    state hc/cc is (B, D*H) ordered [fwd | bwd].
    """
    H, T, L, D = hidden, seq_len, n_layers, num_dir
    DH = D * H
    G = 4 * DH

    if L > 1:
        (len_ref, gx0_ref, whh_ref, wih_ref, bias_ref, fcw_ref, fcb_ref,
         pred_ref, x_buf, gx_buf) = refs
    else:
        (len_ref, gx0_ref, whh_ref, fcw_ref, fcb_ref, pred_ref) = refs
        x_buf = gx_buf = wih_ref = bias_ref = None

    B = pred_ref.shape[0]
    f32 = jnp.float32
    bf16 = jnp.bfloat16

    lens = len_ref[...]                                     # (B, 1) int32

    # Hoisted lane-constant masks (review: no per-step broadcast rebuilds).
    if D == 2:
        col_g = jax.lax.broadcasted_iota(jnp.int32, (B, G), 1)
        fwd_g = (col_g % DH) < H            # fwd-direction columns of G axis
        col_dh = jax.lax.broadcasted_iota(jnp.int32, (B, DH), 1)
        fwd_dh = col_dh < H                 # fwd half of the carried state
    else:
        fwd_g = fwd_dh = None

    def run_layer(gx_ref, whh_l, write_next):
        """Block-diag fused (both directions) recurrence over the sequence."""
        def step(t, carry):
            hc, cc = carry                                  # (B, DH) f32
            t_rev = T - 1 - t
            # gates_x: fwd reads time t, bwd reads time T-1-t (no XLA flips).
            gx_t = gx_ref[t]
            if D == 2:
                gx_sel = jnp.where(fwd_g, gx_t, gx_ref[t_rev])
            else:
                gx_sel = gx_t
            # One fused recurrent matmul for both directions (bf16 in, f32 acc).
            gates = gx_sel + jnp.dot(hc.astype(bf16), whh_l,
                                     preferred_element_type=f32)   # (B, G)
            i = jax.nn.sigmoid(gates[:, 0 * DH:1 * DH])
            f = jax.nn.sigmoid(gates[:, 1 * DH:2 * DH])
            g = jnp.tanh(gates[:, 2 * DH:3 * DH])
            o = jax.nn.sigmoid(gates[:, 3 * DH:4 * DH])
            c_new = f * cc + i * g
            h_new = o * jnp.tanh(c_new)
            # packed-sequence semantics: freeze h/c once t_real >= length[b]
            if D == 2:
                thresh = jnp.where(fwd_dh, t, t_rev)        # (B, DH) int32
                mask = lens > thresh
            else:
                mask = jnp.broadcast_to(lens > t, (B, DH))
            hc = jnp.where(mask, h_new, hc)
            cc = jnp.where(mask, c_new, cc)
            if write_next:                  # feed next layer (stays in VMEM)
                x_buf[t, :, 0:H] = hc[:, 0:H]
                if D == 2:
                    x_buf[t_rev, :, H:DH] = hc[:, H:DH]
            return hc, cc

        zeros = jnp.zeros((B, DH), f32)
        hc, _ = jax.lax.fori_loop(0, T, step, (zeros, zeros), unroll=unroll)
        return hc

    # ----- layer 0: gates_x precomputed on the host (hoisted projection) -----
    hc = run_layer(gx0_ref, whh_ref[0], write_next=(L > 1))

    # ----- layers 1..L-1: in-kernel input projection + recurrence -----
    for l in range(1, L):
        wih_l = wih_ref[l - 1]                              # (DH, G) bf16
        bias_l = bias_ref[l - 1]                            # (1, G)  f32

        def proj(t, carry, wih_l=wih_l, bias_l=bias_l):
            gx_buf[t] = (jnp.dot(x_buf[t].astype(bf16), wih_l,
                                 preferred_element_type=f32) + bias_l)
            return carry
        jax.lax.fori_loop(0, T, proj, 0, unroll=unroll)

        hc = run_layer(gx_buf, whh_ref[l], write_next=(l < L - 1))

    # ----- fused final Linear (fc rows pre-permuted to hc = [fwd | bwd]) -----
    pred_ref[...] = (jnp.dot(hc, fcw_ref[...], preferred_element_type=f32)
                     + fcb_ref[...])


def fused_lstm(len2d, gx0, whh, wih_rest, bias_rest, fc_wt, fc_b, *, num_dir):
    """Single Pallas call running every LSTM layer and the output Linear."""
    L, DH, G = whh.shape
    H = DH // num_dir
    T, B, _ = gx0.shape
    O = fc_wt.shape[1]
    unroll = True if T <= 16 else 8        # parameterized unroll (review item)

    kernel = functools.partial(_fused_lstm_kernel, hidden=H, seq_len=T,
                               n_layers=L, num_dir=num_dir, unroll=unroll)
    vmem = pl.BlockSpec(memory_space=pltpu.MemorySpace.VMEM)

    args = [len2d, gx0, whh]
    scratch = []
    if L > 1:
        args += [wih_rest, bias_rest]
        scratch = [pltpu.VMEM((T, B, DH), jnp.float32),   # inter-layer acts
                   pltpu.VMEM((T, B, G), jnp.float32)]    # per-layer gates_x
    args += [fc_wt, fc_b]

    # Raise the scoped-VMEM limit above the v5e 16 MiB default; sized from the
    # actual resident slabs (grid-less call => no double-buffering).
    nbytes = sum(int(a.size) * a.dtype.itemsize for a in args) + B * O * 4
    if L > 1:
        nbytes += (T * B * DH + T * B * G) * 4
    vmem_limit = int(max(32 << 20, min(2 * nbytes + (4 << 20), 96 << 20)))

    return pl.pallas_call(
        kernel,
        out_shape=jax.ShapeDtypeStruct((B, O), jnp.float32),
        in_specs=[vmem] * len(args),
        out_specs=vmem,
        scratch_shapes=scratch,
        compiler_params=pltpu.CompilerParams(vmem_limit_bytes=vmem_limit),
    )(*args)


# ------------------------------ parameter setup ------------------------------

def init_params(key, vocab_size, embedding_dim, hidden_dim, output_dim,
                n_layers, bidirectional, pad_index=0):
    num_dir = 2 if bidirectional else 1
    k_lim = 1.0 / jnp.sqrt(hidden_dim)
    keys = jax.random.split(key, 2 + 4 * n_layers * num_dir + 2)
    ki = iter(keys)

    emb = jax.random.normal(next(ki), (vocab_size, embedding_dim), jnp.float32)
    emb = emb.at[pad_index].set(0.0)                      # padding_idx row = 0

    lstm_params = {}
    for layer in range(n_layers):
        in_dim = embedding_dim if layer == 0 else hidden_dim * num_dir
        for d in range(num_dir):
            lstm_params[(layer, d)] = dict(
                w_ih=jax.random.uniform(next(ki), (4 * hidden_dim, in_dim),
                                        jnp.float32, -k_lim, k_lim),
                w_hh=jax.random.uniform(next(ki), (4 * hidden_dim, hidden_dim),
                                        jnp.float32, -k_lim, k_lim),
                b_ih=jax.random.uniform(next(ki), (4 * hidden_dim,),
                                        jnp.float32, -k_lim, k_lim),
                b_hh=jax.random.uniform(next(ki), (4 * hidden_dim,),
                                        jnp.float32, -k_lim, k_lim),
            )

    fc_in = hidden_dim * num_dir
    fc_w = jax.random.uniform(next(ki), (output_dim, fc_in), jnp.float32,
                              -1.0 / jnp.sqrt(fc_in), 1.0 / jnp.sqrt(fc_in))
    fc_b = jax.random.uniform(next(ki), (output_dim,), jnp.float32,
                              -1.0 / jnp.sqrt(fc_in), 1.0 / jnp.sqrt(fc_in))
    return dict(embedding=emb, lstm=lstm_params, fc_w=fc_w, fc_b=fc_b)


def prepare_fused_params(params, *, n_layers, bidirectional, hidden_dim):
    """One-time (outside jit) weight fusion into the kernel's layouts."""
    D = 2 if bidirectional else 1
    H = hidden_dim
    DH = D * H
    G = 4 * DH

    def fuse_ih(layer):          # -> (in_dim, G), gate-major columns
        cols = []
        for gi in range(4):
            for d in range(D):
                w = params["lstm"][(layer, d)]["w_ih"]        # (4H, in)
                cols.append(w[gi * H:(gi + 1) * H, :].T)      # (in, H)
        return jnp.concatenate(cols, axis=1)

    def fuse_bias(layer):        # -> (G,)
        cols = []
        for gi in range(4):
            for d in range(D):
                p = params["lstm"][(layer, d)]
                cols.append((p["b_ih"] + p["b_hh"])[gi * H:(gi + 1) * H])
        return jnp.concatenate(cols)

    def fuse_hh(layer):          # -> (DH, G), block-diagonal over directions
        out = jnp.zeros((DH, G), jnp.float32)
        for gi in range(4):
            for d in range(D):
                w = params["lstm"][(layer, d)]["w_hh"]        # (4H, H)
                out = out.at[d * H:(d + 1) * H,
                             gi * DH + d * H: gi * DH + (d + 1) * H].set(
                                 w[gi * H:(gi + 1) * H, :].T)
        return out

    wih0 = fuse_ih(0).astype(jnp.bfloat16)                    # (E, G)
    b0 = fuse_bias(0).astype(jnp.float32)                     # (G,)
    whh = jnp.stack([fuse_hh(l) for l in range(n_layers)]).astype(jnp.bfloat16)
    if n_layers > 1:
        wih_rest = jnp.stack(
            [fuse_ih(l) for l in range(1, n_layers)]).astype(jnp.bfloat16)
        bias_rest = jnp.stack(
            [fuse_bias(l) for l in range(1, n_layers)])[:, None, :].astype(
                jnp.float32)
    else:
        wih_rest = None
        bias_rest = None

    fc_wt = jnp.asarray(params["fc_w"]).T                     # (DH, O)
    if D == 2:
        # reference: fc input = cat([hidden[-1], hidden[-2]]) = [bwd, fwd];
        # our carried state is [fwd | bwd] -> swap the weight row halves.
        fc_wt = jnp.concatenate([fc_wt[H:2 * H, :], fc_wt[0:H, :]], axis=0)
    fc_b = jnp.asarray(params["fc_b"])[None, :]

    return dict(embedding=params["embedding"], wih0=wih0, b0=b0, whh=whh,
                wih_rest=wih_rest, bias_rest=bias_rest,
                fc_wt=fc_wt.astype(jnp.float32), fc_b=fc_b.astype(jnp.float32))


# --------------------------------- forward -----------------------------------

@functools.partial(jax.jit, static_argnames=("bidirectional",))
def lstm_model_forward(fused, ids, lengths, *, bidirectional):
    num_dir = 2 if bidirectional else 1
    B0, T = ids.shape

    # pad batch to a sublane multiple; padded rows get length 0 (stay zero)
    # and are sliced off at the end.
    B = ((B0 + 7) // 8) * 8
    pad = B - B0
    ids_p = jnp.pad(ids, ((0, pad), (0, 0)))
    len2d = jnp.pad(lengths.astype(jnp.int32), (0, pad)).reshape(B, 1)

    # embedding gather (glue, plain JAX); dropout is identity (eval mode).
    emb = fused["embedding"][ids_p]                         # (B, T, E)
    x = jnp.transpose(emb, (1, 0, 2))                       # (T, B, E)

    # Hoisted layer-0 input projection: ONE wide bf16 matmul for both
    # directions (gate-major columns), f32 accumulate; no stacks, no flips.
    gx0 = (jnp.einsum("tbe,eg->tbg", x.astype(jnp.bfloat16), fused["wih0"],
                      preferred_element_type=jnp.float32)
           + fused["b0"][None, None, :]).astype(jnp.bfloat16)

    pred = fused_lstm(len2d, gx0, fused["whh"], fused["wih_rest"],
                      fused["bias_rest"], fused["fc_wt"], fused["fc_b"],
                      num_dir=num_dir)
    return pred[:B0]


# ------------------------------------ main ------------------------------------

if __name__ == "__main__":
    vocab_size, embedding_dim, hidden_dim, output_dim = 50, 32, 32, 3
    n_layers, bidirectional, dropout_rate, pad_index = 2, True, 0.0, 0
    B, T = 2, 8

    key = jax.random.PRNGKey(0)
    k_param, k_ids = jax.random.split(key)

    params = init_params(k_param, vocab_size, embedding_dim, hidden_dim,
                         output_dim, n_layers, bidirectional, pad_index)
    fused = prepare_fused_params(params, n_layers=n_layers,
                                 bidirectional=bidirectional,
                                 hidden_dim=hidden_dim)

    lengths = jnp.array([8, 5], dtype=jnp.int32)
    ids = jax.random.randint(k_ids, (B, T), 1, vocab_size, dtype=jnp.int32)
    pad_mask = jnp.arange(T)[None, :] < lengths[:, None]
    ids = jnp.where(pad_mask, ids, pad_index)               # pad tail tokens

    prediction = lstm_model_forward(fused, ids, lengths,
                                    bidirectional=bidirectional)
    prediction = jax.block_until_ready(prediction)
    assert prediction.shape == (B, output_dim)
    print("KERNEL_OK")
</pallas_src>

<mosaic_0001>
module attributes {stable_mosaic.version = 11 : i64} {
  func.func @_fused_lstm_kernel(%arg0: memref<8x1xi32, #tpu.memory_space<vmem>>, %arg1: memref<8x8x256xbf16, #tpu.memory_space<vmem>>, %arg2: memref<2x64x256xbf16, #tpu.memory_space<vmem>>, %arg3: memref<1x64x256xbf16, #tpu.memory_space<vmem>>, %arg4: memref<1x1x256xf32, #tpu.memory_space<vmem>>, %arg5: memref<64x3xf32, #tpu.memory_space<vmem>>, %arg6: memref<1x3xf32, #tpu.memory_space<vmem>>, %arg7: memref<8x3xf32, #tpu.memory_space<vmem>>, %arg8: memref<8x8x64xf32, #tpu.memory_space<vmem>>, %arg9: memref<8x8x256xf32, #tpu.memory_space<vmem>>) attributes {dimension_semantics = [], scalar_prefetch = 0 : i64, scratch_operands = 2 : i64, tpu.core_type = #tpu.core_type<tc>} {
    %c0 = arith.constant 0 : index
    %c0_0 = arith.constant 0 : index
    %0 = vector.load %arg0[%c0, %c0_0] : memref<8x1xi32, #tpu.memory_space<vmem>>, vector<8x1xi32>
    %1 = tpu.iota {dimensions = array<i32: 1>} : vector<8x256xi32>
    %c64_i32 = arith.constant 64 : i32
    %c0_i32 = arith.constant 0 : i32
    %2 = arith.cmpi eq, %c64_i32, %c0_i32 : i32
    %c1_i32 = arith.constant 1 : i32
    %3 = arith.select %2, %c1_i32, %c64_i32 : i32
    %4 = vector.broadcast %3 : i32 to vector<8x256xi32>
    %5 = arith.remsi %1, %4 : vector<8x256xi32>
    %c0_i32_1 = arith.constant 0 : i32
    %6 = vector.broadcast %c0_i32_1 : i32 to vector<8x256xi32>
    %7 = arith.cmpi ne, %5, %6 : vector<8x256xi32>
    %c0_i32_2 = arith.constant 0 : i32
    %8 = vector.broadcast %c0_i32_2 : i32 to vector<8x256xi32>
    %9 = arith.cmpi slt, %5, %8 : vector<8x256xi32>
    %c0_i32_3 = arith.constant 0 : i32
    %10 = arith.cmpi slt, %3, %c0_i32_3 : i32
    %11 = vector.broadcast %10 : i1 to vector<8x256xi1>
    %12 = vector.broadcast %11 : vector<8x256xi1> to vector<8x256xi1>
    %13 = arith.xori %9, %12 : vector<8x256xi1>
    %14 = arith.andi %13, %7 : vector<8x256xi1>
    %15 = vector.broadcast %3 : i32 to vector<8x256xi32>
    %16 = arith.addi %5, %15 : vector<8x256xi32>
    %17 = arith.select %14, %16, %5 : vector<8x256xi1>, vector<8x256xi32>
    %c32_i32 = arith.constant 32 : i32
    %18 = vector.broadcast %c32_i32 : i32 to vector<8x256xi32>
    %19 = arith.cmpi slt, %17, %18 : vector<8x256xi32>
    %20 = tpu.iota {dimensions = array<i32: 1>} : vector<8x64xi32>
    %c32_i32_4 = arith.constant 32 : i32
    %21 = vector.broadcast %c32_i32_4 : i32 to vector<8x64xi32>
    %22 = arith.cmpi slt, %20, %21 : vector<8x64xi32>
    %c0_5 = arith.constant 0 : index
    %c0_6 = arith.constant 0 : index
    %c0_7 = arith.constant 0 : index
    %23 = vector.load %arg2[%c0_5, %c0_6, %c0_7] : memref<2x64x256xbf16, #tpu.memory_space<vmem>>, vector<1x64x256xbf16>
    %24 = vector.shape_cast %23 : vector<1x64x256xbf16> to vector<64x256xbf16>
    %cst = arith.constant 0.000000e+00 : f32
    %25 = vector.broadcast %cst : f32 to vector<8x64xf32>
    %c0_i32_8 = arith.constant 0 : i32
    %c7_i32 = arith.constant 7 : i32
    %26 = arith.subi %c7_i32, %c0_i32_8 : i32
    %27 = arith.index_cast %c0_i32_8 : i32 to index
    %c0_9 = arith.constant 0 : index
    %c0_10 = arith.constant 0 : index
    %28 = vector.load %arg1[%27, %c0_9, %c0_10] : memref<8x8x256xbf16, #tpu.memory_space<vmem>>, vector<1x8x256xbf16>
    %29 = vector.shape_cast %28 : vector<1x8x256xbf16> to vector<8x256xbf16>
    %30 = arith.index_cast %26 : i32 to index
    %c0_11 = arith.constant 0 : index
    %c0_12 = arith.constant 0 : index
    %31 = vector.load %arg1[%30, %c0_11, %c0_12] : memref<8x8x256xbf16, #tpu.memory_space<vmem>>, vector<1x8x256xbf16>
    %32 = vector.shape_cast %31 : vector<1x8x256xbf16> to vector<8x256xbf16>
    %33 = arith.select %19, %29, %32 : vector<8x256xi1>, vector<8x256xbf16>
    %34 = arith.truncf %25 : vector<8x64xf32> to vector<8x64xbf16>
    %cst_13 = arith.constant dense<0.000000e+00> : vector<8x256xf32>
    %35 = tpu.matmul %34, %24, %cst_13 {dimension_numbers = #tpu.dot_dimension_numbers<[1], [0], [0], [1], [0, 0, 1, 1], [], []>} : vector<8x64xbf16>, vector<64x256xbf16>, vector<8x256xf32> -> vector<8x256xf32>
    %36 = arith.extf %33 : vector<8x256xbf16> to vector<8x256xf32>
    %37 = arith.addf %36, %35 : vector<8x256xf32>
    %38 = vector.extract_strided_slice %37 {offsets = [0, 0], sizes = [8, 64], strides = [1, 1]} : vector<8x256xf32> to vector<8x64xf32>
    %39 = arith.negf %38 : vector<8x64xf32>
    %40 = math.exp %39 : vector<8x64xf32>
    %cst_14 = arith.constant 1.000000e+00 : f32
    %41 = vector.broadcast %cst_14 : f32 to vector<8x64xf32>
    %42 = arith.addf %41, %40 : vector<8x64xf32>
    %43 = arith.divf %41, %42 : vector<8x64xf32>
    %44 = vector.extract_strided_slice %37 {offsets = [0, 64], sizes = [8, 64], strides = [1, 1]} : vector<8x256xf32> to vector<8x64xf32>
    %45 = arith.negf %44 : vector<8x64xf32>
    %46 = math.exp %45 : vector<8x64xf32>
    %cst_15 = arith.constant 1.000000e+00 : f32
    %47 = vector.broadcast %cst_15 : f32 to vector<8x64xf32>
    %48 = arith.addf %47, %46 : vector<8x64xf32>
    %49 = arith.divf %47, %48 : vector<8x64xf32>
    %50 = vector.extract_strided_slice %37 {offsets = [0, 128], sizes = [8, 64], strides = [1, 1]} : vector<8x256xf32> to vector<8x64xf32>
    %51 = math.tanh %50 : vector<8x64xf32>
    %52 = vector.extract_strided_slice %37 {offsets = [0, 192], sizes = [8, 64], strides = [1, 1]} : vector<8x256xf32> to vector<8x64xf32>
    %53 = arith.negf %52 : vector<8x64xf32>
    %54 = math.exp %53 : vector<8x64xf32>
    %cst_16 = arith.constant 1.000000e+00 : f32
    %55 = vector.broadcast %cst_16 : f32 to vector<8x64xf32>
    %56 = arith.addf %55, %54 : vector<8x64xf32>
    %57 = arith.divf %55, %56 : vector<8x64xf32>
    %58 = arith.mulf %49, %25 : vector<8x64xf32>
    %59 = arith.mulf %43, %51 : vector<8x64xf32>
    %60 = arith.addf %58, %59 : vector<8x64xf32>
    %61 = math.tanh %60 : vector<8x64xf32>
    %62 = arith.mulf %57, %61 : vector<8x64xf32>
    %63 = vector.broadcast %c0_i32_8 : i32 to vector<8x64xi32>
    %64 = vector.broadcast %26 : i32 to vector<8x64xi32>
    %65 = arith.select %22, %63, %64 : vector<8x64xi1>, vector<8x64xi32>
    %66 = vector.broadcast %0 : vector<8x1xi32> to vector<8x64xi32>
    %67 = arith.cmpi sgt, %66, %65 : vector<8x64xi32>
    %68 = arith.select %67, %62, %25 : vector<8x64xi1>, vector<8x64xf32>
    %69 = arith.select %67, %60, %25 : vector<8x64xi1>, vector<8x64xf32>
    %70 = vector.extract_strided_slice %68 {offsets = [0, 0], sizes = [8, 32], strides = [1, 1]} : vector<8x64xf32> to vector<8x32xf32>
    %71 = arith.index_cast %c0_i32_8 : i32 to index
    %c0_17 = arith.constant 0 : index
    %c0_18 = arith.constant 0 : index
    %72 = vector.load %arg8[%71, %c0_17, %c0_18] : memref<8x8x64xf32, #tpu.memory_space<vmem>>, vector<1x8x32xf32>
    %73 = vector.shape_cast %72 : vector<1x8x32xf32> to vector<8x32xf32>
    %74 = vector.shape_cast %70 : vector<8x32xf32> to vector<1x8x32xf32>
    tpu.vector_store %arg8[%71, %c0_17, %c0_18], %74 {strides = array<i32>} : memref<8x8x64xf32, #tpu.memory_space<vmem>>, vector<1x8x32xf32>,
    %75 = vector.extract_strided_slice %68 {offsets = [0, 32], sizes = [8, 32], strides = [1, 1]} : vector<8x64xf32> to vector<8x32xf32>
    %76 = arith.index_cast %26 : i32 to index
    %c0_19 = arith.constant 0 : index
    %c32 = arith.constant 32 : index
    %77 = vector.load %arg8[%76, %c0_19, %c32] : memref<8x8x64xf32, #tpu.memory_space<vmem>>, vector<1x8x32xf32>
    %78 = vector.shape_cast %77 : vector<1x8x32xf32> to vector<8x32xf32>
    %79 = vector.shape_cast %75 : vector<8x32xf32> to vector<1x8x32xf32>
    tpu.vector_store %arg8[%76, %c0_19, %c32], %79 {strides = array<i32>} : memref<8x8x64xf32, #tpu.memory_space<vmem>>, vector<1x8x32xf32>,
    %c1_i32_20 = arith.constant 1 : i32
    %c7_i32_21 = arith.constant 7 : i32
    %80 = arith.subi %c7_i32_21, %c1_i32_20 : i32
    %81 = arith.index_cast %c1_i32_20 : i32 to index
    %c0_22 = arith.constant 0 : index
    %c0_23 = arith.constant 0 : index
    %82 = vector.load %arg1[%81, %c0_22, %c0_23] : memref<8x8x256xbf16, #tpu.memory_space<vmem>>, vector<1x8x256xbf16>
    %83 = vector.shape_cast %82 : vector<1x8x256xbf16> to vector<8x256xbf16>
    %84 = arith.index_cast %80 : i32 to index
    %c0_24 = arith.constant 0 : index
    %c0_25 = arith.constant 0 : index
    %85 = vector.load %arg1[%84, %c0_24, %c0_25] : memref<8x8x256xbf16, #tpu.memory_space<vmem>>, vector<1x8x256xbf16>
    %86 = vector.shape_cast %85 : vector<1x8x256xbf16> to vector<8x256xbf16>
    %87 = arith.select %19, %83, %86 : vector<8x256xi1>, vector<8x256xbf16>
    %88 = arith.truncf %68 : vector<8x64xf32> to vector<8x64xbf16>
    %cst_26 = arith.constant dense<0.000000e+00> : vector<8x256xf32>
    %89 = tpu.matmul %88, %24, %cst_26 {dimension_numbers = #tpu.dot_dimension_numbers<[1], [0], [0], [1], [0, 0, 1, 1], [], []>} : vector<8x64xbf16>, vector<64x256xbf16>, vector<8x256xf32> -> vector<8x256xf32>
    %90 = arith.extf %87 : vector<8x256xbf16> to vector<8x256xf32>
    %91 = arith.addf %90, %89 : vector<8x256xf32>
    %92 = vector.extract_strided_slice %91 {offsets = [0, 0], sizes = [8, 64], strides = [1, 1]} : vector<8x256xf32> to vector<8x64xf32>
    %93 = arith.negf %92 : vector<8x64xf32>
    %94 = math.exp %93 : vector<8x64xf32>
    %cst_27 = arith.constant 1.000000e+00 : f32
    %95 = vector.broadcast %cst_27 : f32 to vector<8x64xf32>
    %96 = arith.addf %95, %94 : vector<8x64xf32>
    %97 = arith.divf %95, %96 : vector<8x64xf32>
    %98 = vector.extract_strided_slice %91 {offsets = [0, 64], sizes = [8, 64], strides = [1, 1]} : vector<8x256xf32> to vector<8x64xf32>
    %99 = arith.negf %98 : vector<8x64xf32>
    %100 = math.exp %99 : vector<8x64xf32>
    %cst_28 = arith.constant 1.000000e+00 : f32
    %101 = vector.broadcast %cst_28 : f32 to vector<8x64xf32>
    %102 = arith.addf %101, %100 : vector<8x64xf32>
    %103 = arith.divf %101, %102 : vector<8x64xf32>
    %104 = vector.extract_strided_slice %91 {offsets = [0, 128], sizes = [8, 64], strides = [1, 1]} : vector<8x256xf32> to vector<8x64xf32>
    %105 = math.tanh %104 : vector<8x64xf32>
    %106 = vector.extract_strided_slice %91 {offsets = [0, 192], sizes = [8, 64], strides = [1, 1]} : vector<8x256xf32> to vector<8x64xf32>
    %107 = arith.negf %106 : vector<8x64xf32>
    %108 = math.exp %107 : vector<8x64xf32>
    %cst_29 = arith.constant 1.000000e+00 : f32
    %109 = vector.broadcast %cst_29 : f32 to vector<8x64xf32>
    %110 = arith.addf %109, %108 : vector<8x64xf32>
    %111 = arith.divf %109, %110 : vector<8x64xf32>
    %112 = arith.mulf %103, %69 : vector<8x64xf32>
    %113 = arith.mulf %97, %105 : vector<8x64xf32>
    %114 = arith.addf %112, %113 : vector<8x64xf32>
    %115 = math.tanh %114 : vector<8x64xf32>
    %116 = arith.mulf %111, %115 : vector<8x64xf32>
    %117 = vector.broadcast %c1_i32_20 : i32 to vector<8x64xi32>
    %118 = vector.broadcast %80 : i32 to vector<8x64xi32>
    %119 = arith.select %22, %117, %118 : vector<8x64xi1>, vector<8x64xi32>
    %120 = vector.broadcast %0 : vector<8x1xi32> to vector<8x64xi32>
    %121 = arith.cmpi sgt, %120, %119 : vector<8x64xi32>
    %122 = arith.select %121, %116, %68 : vector<8x64xi1>, vector<8x64xf32>
    %123 = arith.select %121, %114, %69 : vector<8x64xi1>, vector<8x64xf32>
    %124 = vector.extract_strided_slice %122 {offsets = [0, 0], sizes = [8, 32], strides = [1, 1]} : vector<8x64xf32> to vector<8x32xf32>
    %125 = arith.index_cast %c1_i32_20 : i32 to index
    %c0_30 = arith.constant 0 : index
    %c0_31 = arith.constant 0 : index
    %126 = vector.load %arg8[%125, %c0_30, %c0_31] : memref<8x8x64xf32, #tpu.memory_space<vmem>>, vector<1x8x32xf32>
    %127 = vector.shape_cast %126 : vector<1x8x32xf32> to vector<8x32xf32>
    %128 = vector.shape_cast %124 : vector<8x32xf32> to vector<1x8x32xf32>
    tpu.vector_store %arg8[%125, %c0_30, %c0_31], %128 {strides = array<i32>} : memref<8x8x64xf32, #tpu.memory_space<vmem>>, vector<1x8x32xf32>,
    %129 = vector.extract_strided_slice %122 {offsets = [0, 32], sizes = [8, 32], strides = [1, 1]} : vector<8x64xf32> to vector<8x32xf32>
    %130 = arith.index_cast %80 : i32 to index
    %c0_32 = arith.constant 0 : index
    %c32_33 = arith.constant 32 : index
    %131 = vector.load %arg8[%130, %c0_32, %c32_33] : memref<8x8x64xf32, #tpu.memory_space<vmem>>, vector<1x8x32xf32>
    %132 = vector.shape_cast %131 : vector<1x8x32xf32> to vector<8x32xf32>
    %133 = vector.shape_cast %129 : vector<8x32xf32> to vector<1x8x32xf32>
    tpu.vector_store %arg8[%130, %c0_32, %c32_33], %133 {strides = array<i32>} : memref<8x8x64xf32, #tpu.memory_space<vmem>>, vector<1x8x32xf32>,
    %c2_i32 = arith.constant 2 : i32
    %c7_i32_34 = arith.constant 7 : i32
    %134 = arith.subi %c7_i32_34, %c2_i32 : i32
    %135 = arith.index_cast %c2_i32 : i32 to index
    %c0_35 = arith.constant 0 : index
    %c0_36 = arith.constant 0 : index
    %136 = vector.load %arg1[%135, %c0_35, %c0_36] : memref<8x8x256xbf16, #tpu.memory_space<vmem>>, vector<1x8x256xbf16>
    %137 = vector.shape_cast %136 : vector<1x8x256xbf16> to vector<8x256xbf16>
    %138 = arith.index_cast %134 : i32 to index
    %c0_37 = arith.constant 0 : index
    %c0_38 = arith.constant 0 : index
    %139 = vector.load %arg1[%138, %c0_37, %c0_38] : memref<8x8x256xbf16, #tpu.memory_space<vmem>>, vector<1x8x256xbf16>
    %140 = vector.shape_cast %139 : vector<1x8x256xbf16> to vector<8x256xbf16>
    %141 = arith.select %19, %137, %140 : vector<8x256xi1>, vector<8x256xbf16>
    %142 = arith.truncf %122 : vector<8x64xf32> to vector<8x64xbf16>
    %cst_39 = arith.constant dense<0.000000e+00> : vector<8x256xf32>
    %143 = tpu.matmul %142, %24, %cst_39 {dimension_numbers = #tpu.dot_dimension_numbers<[1], [0], [0], [1], [0, 0, 1, 1], [], []>} : vector<8x64xbf16>, vector<64x256xbf16>, vector<8x256xf32> -> vector<8x256xf32>
    %144 = arith.extf %141 : vector<8x256xbf16> to vector<8x256xf32>
    %145 = arith.addf %144, %143 : vector<8x256xf32>
    %146 = vector.extract_strided_slice %145 {offsets = [0, 0], sizes = [8, 64], strides = [1, 1]} : vector<8x256xf32> to vector<8x64xf32>
    %147 = arith.negf %146 : vector<8x64xf32>
    %148 = math.exp %147 : vector<8x64xf32>
    %cst_40 = arith.constant 1.000000e+00 : f32
    %149 = vector.broadcast %cst_40 : f32 to vector<8x64xf32>
    %150 = arith.addf %149, %148 : vector<8x64xf32>
    %151 = arith.divf %149, %150 : vector<8x64xf32>
    %152 = vector.extract_strided_slice %145 {offsets = [0, 64], sizes = [8, 64], strides = [1, 1]} : vector<8x256xf32> to vector<8x64xf32>
    %153 = arith.negf %152 : vector<8x64xf32>
    %154 = math.exp %153 : vector<8x64xf32>
    %cst_41 = arith.constant 1.000000e+00 : f32
    %155 = vector.broadcast %cst_41 : f32 to vector<8x64xf32>
    %156 = arith.addf %155, %154 : vector<8x64xf32>
    %157 = arith.divf %155, %156 : vector<8x64xf32>
    %158 = vector.extract_strided_slice %145 {offsets = [0, 128], sizes = [8, 64], strides = [1, 1]} : vector<8x256xf32> to vector<8x64xf32>
    %159 = math.tanh %158 : vector<8x64xf32>
    %160 = vector.extract_strided_slice %145 {offsets = [0, 192], sizes = [8, 64], strides = [1, 1]} : vector<8x256xf32> to vector<8x64xf32>
    %161 = arith.negf %160 : vector<8x64xf32>
    %162 = math.exp %161 : vector<8x64xf32>
    %cst_42 = arith.constant 1.000000e+00 : f32
    %163 = vector.broadcast %cst_42 : f32 to vector<8x64xf32>
    %164 = arith.addf %163, %162 : vector<8x64xf32>
    %165 = arith.divf %163, %164 : vector<8x64xf32>
    %166 = arith.mulf %157, %123 : vector<8x64xf32>
    %167 = arith.mulf %151, %159 : vector<8x64xf32>
    %168 = arith.addf %166, %167 : vector<8x64xf32>
    %169 = math.tanh %168 : vector<8x64xf32>
    %170 = arith.mulf %165, %169 : vector<8x64xf32>
    %171 = vector.broadcast %c2_i32 : i32 to vector<8x64xi32>
    %172 = vector.broadcast %134 : i32 to vector<8x64xi32>
    %173 = arith.select %22, %171, %172 : vector<8x64xi1>, vector<8x64xi32>
    %174 = vector.broadcast %0 : vector<8x1xi32> to vector<8x64xi32>
    %175 = arith.cmpi sgt, %174, %173 : vector<8x64xi32>
    %176 = arith.select %175, %170, %122 : vector<8x64xi1>, vector<8x64xf32>
    %177 = arith.select %175, %168, %123 : vector<8x64xi1>, vector<8x64xf32>
    %178 = vector.extract_strided_slice %176 {offsets = [0, 0], sizes = [8, 32], strides = [1, 1]} : vector<8x64xf32> to vector<8x32xf32>
    %179 = arith.index_cast %c2_i32 : i32 to index
    %c0_43 = arith.constant 0 : index
    %c0_44 = arith.constant 0 : index
    %180 = vector.load %arg8[%179, %c0_43, %c0_44] : memref<8x8x64xf32, #tpu.memory_space<vmem>>, vector<1x8x32xf32>
    %181 = vector.shape_cast %180 : vector<1x8x32xf32> to vector<8x32xf32>
    %182 = vector.shape_cast %178 : vector<8x32xf32> to vector<1x8x32xf32>
    tpu.vector_store %arg8[%179, %c0_43, %c0_44], %182 {strides = array<i32>} : memref<8x8x64xf32, #tpu.memory_space<vmem>>, vector<1x8x32xf32>,
    %183 = vector.extract_strided_slice %176 {offsets = [0, 32], sizes = [8, 32], strides = [1, 1]} : vector<8x64xf32> to vector<8x32xf32>
    %184 = arith.index_cast %134 : i32 to index
    %c0_45 = arith.constant 0 : index
    %c32_46 = arith.constant 32 : index
    %185 = vector.load %arg8[%184, %c0_45, %c32_46] : memref<8x8x64xf32, #tpu.memory_space<vmem>>, vector<1x8x32xf32>
    %186 = vector.shape_cast %185 : vector<1x8x32xf32> to vector<8x32xf32>
    %187 = vector.shape_cast %183 : vector<8x32xf32> to vector<1x8x32xf32>
    tpu.vector_store %arg8[%184, %c0_45, %c32_46], %187 {strides = array<i32>} : memref<8x8x64xf32, #tpu.memory_space<vmem>>, vector<1x8x32xf32>,
    %c3_i32 = arith.constant 3 : i32
    %c7_i32_47 = arith.constant 7 : i32
    %188 = arith.subi %c7_i32_47, %c3_i32 : i32
    %189 = arith.index_cast %c3_i32 : i32 to index
    %c0_48 = arith.constant 0 : index
    %c0_49 = arith.constant 0 : index
    %190 = vector.load %arg1[%189, %c0_48, %c0_49] : memref<8x8x256xbf16, #tpu.memory_space<vmem>>, vector<1x8x256xbf16>
    %191 = vector.shape_cast %190 : vector<1x8x256xbf16> to vector<8x256xbf16>
    %192 = arith.index_cast %188 : i32 to index
    %c0_50 = arith.constant 0 : index
    %c0_51 = arith.constant 0 : index
    %193 = vector.load %arg1[%192, %c0_50, %c0_51] : memref<8x8x256xbf16, #tpu.memory_space<vmem>>, vector<1x8x256xbf16>
    %194 = vector.shape_cast %193 : vector<1x8x256xbf16> to vector<8x256xbf16>
    %195 = arith.select %19, %191, %194 : vector<8x256xi1>, vector<8x256xbf16>
    %196 = arith.truncf %176 : vector<8x64xf32> to vector<8x64xbf16>
    %cst_52 = arith.constant dense<0.000000e+00> : vector<8x256xf32>
    %197 = tpu.matmul %196, %24, %cst_52 {dimension_numbers = #tpu.dot_dimension_numbers<[1], [0], [0], [1], [0, 0, 1, 1], [], []>} : vector<8x64xbf16>, vector<64x256xbf16>, vector<8x256xf32> -> vector<8x256xf32>
    %198 = arith.extf %195 : vector<8x256xbf16> to vector<8x256xf32>
    %199 = arith.addf %198, %197 : vector<8x256xf32>
    %200 = vector.extract_strided_slice %199 {offsets = [0, 0], sizes = [8, 64], strides = [1, 1]} : vector<8x256xf32> to vector<8x64xf32>
    %201 = arith.negf %200 : vector<8x64xf32>
    %202 = math.exp %201 : vector<8x64xf32>
    %cst_53 = arith.constant 1.000000e+00 : f32
    %203 = vector.broadcast %cst_53 : f32 to vector<8x64xf32>
    %204 = arith.addf %203, %202 : vector<8x64xf32>
    %205 = arith.divf %203, %204 : vector<8x64xf32>
    %206 = vector.extract_strided_slice %199 {offsets = [0, 64], sizes = [8, 64], strides = [1, 1]} : vector<8x256xf32> to vector<8x64xf32>
    %207 = arith.negf %206 : vector<8x64xf32>
    %208 = math.exp %207 : vector<8x64xf32>
    %cst_54 = arith.constant 1.000000e+00 : f32
    %209 = vector.broadcast %cst_54 : f32 to vector<8x64xf32>
    %210 = arith.addf %209, %208 : vector<8x64xf32>
    %211 = arith.divf %209, %210 : vector<8x64xf32>
    %212 = vector.extract_strided_slice %199 {offsets = [0, 128], sizes = [8, 64], strides = [1, 1]} : vector<8x256xf32> to vector<8x64xf32>
    %213 = math.tanh %212 : vector<8x64xf32>
    %214 = vector.extract_strided_slice %199 {offsets = [0, 192], sizes = [8, 64], strides = [1, 1]} : vector<8x256xf32> to vector<8x64xf32>
    %215 = arith.negf %214 : vector<8x64xf32>
    %216 = math.exp %215 : vector<8x64xf32>
    %cst_55 = arith.constant 1.000000e+00 : f32
    %217 = vector.broadcast %cst_55 : f32 to vector<8x64xf32>
    %218 = arith.addf %217, %216 : vector<8x64xf32>
    %219 = arith.divf %217, %218 : vector<8x64xf32>
    %220 = arith.mulf %211, %177 : vector<8x64xf32>
    %221 = arith.mulf %205, %213 : vector<8x64xf32>
    %222 = arith.addf %220, %221 : vector<8x64xf32>
    %223 = math.tanh %222 : vector<8x64xf32>
    %224 = arith.mulf %219, %223 : vector<8x64xf32>
    %225 = vector.broadcast %c3_i32 : i32 to vector<8x64xi32>
    %226 = vector.broadcast %188 : i32 to vector<8x64xi32>
    %227 = arith.select %22, %225, %226 : vector<8x64xi1>, vector<8x64xi32>
    %228 = vector.broadcast %0 : vector<8x1xi32> to vector<8x64xi32>
    %229 = arith.cmpi sgt, %228, %227 : vector<8x64xi32>
    %230 = arith.select %229, %224, %176 : vector<8x64xi1>, vector<8x64xf32>
    %231 = arith.select %229, %222, %177 : vector<8x64xi1>, vector<8x64xf32>
    %232 = vector.extract_strided_slice %230 {offsets = [0, 0], sizes = [8, 32], strides = [1, 1]} : vector<8x64xf32> to vector<8x32xf32>
    %233 = arith.index_cast %c3_i32 : i32 to index
    %c0_56 = arith.constant 0 : index
    %c0_57 = arith.constant 0 : index
    %234 = vector.load %arg8[%233, %c0_56, %c0_57] : memref<8x8x64xf32, #tpu.memory_space<vmem>>, vector<1x8x32xf32>
    %235 = vector.shape_cast %234 : vector<1x8x32xf32> to vector<8x32xf32>
    %236 = vector.shape_cast %232 : vector<8x32xf32> to vector<1x8x32xf32>
    tpu.vector_store %arg8[%233, %c0_56, %c0_57], %236 {strides = array<i32>} : memref<8x8x64xf32, #tpu.memory_space<vmem>>, vector<1x8x32xf32>,
    %237 = vector.extract_strided_slice %230 {offsets = [0, 32], sizes = [8, 32], strides = [1, 1]} : vector<8x64xf32> to vector<8x32xf32>
    %238 = arith.index_cast %188 : i32 to index
    %c0_58 = arith.constant 0 : index
    %c32_59 = arith.constant 32 : index
    %239 = vector.load %arg8[%238, %c0_58, %c32_59] : memref<8x8x64xf32, #tpu.memory_space<vmem>>, vector<1x8x32xf32>
    %240 = vector.shape_cast %239 : vector<1x8x32xf32> to vector<8x32xf32>
    %241 = vector.shape_cast %237 : vector<8x32xf32> to vector<1x8x32xf32>
    tpu.vector_store %arg8[%238, %c0_58, %c32_59], %241 {strides = array<i32>} : memref<8x8x64xf32, #tpu.memory_space<vmem>>, vector<1x8x32xf32>,
    %c4_i32 = arith.constant 4 : i32
    %c7_i32_60 = arith.constant 7 : i32
    %242 = arith.subi %c7_i32_60, %c4_i32 : i32
    %243 = arith.index_cast %c4_i32 : i32 to index
    %c0_61 = arith.constant 0 : index
    %c0_62 = arith.constant 0 : index
    %244 = vector.load %arg1[%243, %c0_61, %c0_62] : memref<8x8x256xbf16, #tpu.memory_space<vmem>>, vector<1x8x256xbf16>
    %245 = vector.shape_cast %244 : vector<1x8x256xbf16> to vector<8x256xbf16>
    %246 = arith.index_cast %242 : i32 to index
    %c0_63 = arith.constant 0 : index
    %c0_64 = arith.constant 0 : index
    %247 = vector.load %arg1[%246, %c0_63, %c0_64] : memref<8x8x256xbf16, #tpu.memory_space<vmem>>, vector<1x8x256xbf16>
    %248 = vector.shape_cast %247 : vector<1x8x256xbf16> to vector<8x256xbf16>
    %249 = arith.select %19, %245, %248 : vector<8x256xi1>, vector<8x256xbf16>
    %250 = arith.truncf %230 : vector<8x64xf32> to vector<8x64xbf16>
    %cst_65 = arith.constant dense<0.000000e+00> : vector<8x256xf32>
    %251 = tpu.matmul %250, %24, %cst_65 {dimension_numbers = #tpu.dot_dimension_numbers<[1], [0], [0], [1], [0, 0, 1, 1], [], []>} : vector<8x64xbf16>, vector<64x256xbf16>, vector<8x256xf32> -> vector<8x256xf32>
    %252 = arith.extf %249 : vector<8x256xbf16> to vector<8x256xf32>
    %253 = arith.addf %252, %251 : vector<8x256xf32>
    %254 = vector.extract_strided_slice %253 {offsets = [0, 0], sizes = [8, 64], strides = [1, 1]} : vector<8x256xf32> to vector<8x64xf32>
    %255 = arith.negf %254 : vector<8x64xf32>
    %256 = math.exp %255 : vector<8x64xf32>
    %cst_66 = arith.constant 1.000000e+00 : f32
    %257 = vector.broadcast %cst_66 : f32 to vector<8x64xf32>
    %258 = arith.addf %257, %256 : vector<8x64xf32>
    %259 = arith.divf %257, %258 : vector<8x64xf32>
    %260 = vector.extract_strided_slice %253 {offsets = [0, 64], sizes = [8, 64], strides = [1, 1]} : vector<8x256xf32> to vector<8x64xf32>
    %261 = arith.negf %260 : vector<8x64xf32>
    %262 = math.exp %261 : vector<8x64xf32>
    %cst_67 = arith.constant 1.000000e+00 : f32
    %263 = vector.broadcast %cst_67 : f32 to vector<8x64xf32>
    %264 = arith.addf %263, %262 : vector<8x64xf32>
    %265 = arith.divf %263, %264 : vector<8x64xf32>
    %266 = vector.extract_strided_slice %253 {offsets = [0, 128], sizes = [8, 64], strides = [1, 1]} : vector<8x256xf32> to vector<8x64xf32>
    %267 = math.tanh %266 : vector<8x64xf32>
    %268 = vector.extract_strided_slice %253 {offsets = [0, 192], sizes = [8, 64], strides = [1, 1]} : vector<8x256xf32> to vector<8x64xf32>
    %269 = arith.negf %268 : vector<8x64xf32>
    %270 = math.exp %269 : vector<8x64xf32>
    %cst_68 = arith.constant 1.000000e+00 : f32
    %271 = vector.broadcast %cst_68 : f32 to vector<8x64xf32>
    %272 = arith.addf %271, %270 : vector<8x64xf32>
    %273 = arith.divf %271, %272 : vector<8x64xf32>
    %274 = arith.mulf %265, %231 : vector<8x64xf32>
    %275 = arith.mulf %259, %267 : vector<8x64xf32>
    %276 = arith.addf %274, %275 : vector<8x64xf32>
    %277 = math.tanh %276 : vector<8x64xf32>
    %278 = arith.mulf %273, %277 : vector<8x64xf32>
    %279 = vector.broadcast %c4_i32 : i32 to vector<8x64xi32>
    %280 = vector.broadcast %242 : i32 to vector<8x64xi32>
    %281 = arith.select %22, %279, %280 : vector<8x64xi1>, vector<8x64xi32>
    %282 = vector.broadcast %0 : vector<8x1xi32> to vector<8x64xi32>
    %283 = arith.cmpi sgt, %282, %281 : vector<8x64xi32>
    %284 = arith.select %283, %278, %230 : vector<8x64xi1>, vector<8x64xf32>
    %285 = arith.select %283, %276, %231 : vector<8x64xi1>, vector<8x64xf32>
    %286 = vector.extract_strided_slice %284 {offsets = [0, 0], sizes = [8, 32], strides = [1, 1]} : vector<8x64xf32> to vector<8x32xf32>
    %287 = arith.index_cast %c4_i32 : i32 to index
    %c0_69 = arith.constant 0 : index
    %c0_70 = arith.constant 0 : index
    %288 = vector.load %arg8[%287, %c0_69, %c0_70] : memref<8x8x64xf32, #tpu.memory_space<vmem>>, vector<1x8x32xf32>
    %289 = vector.shape_cast %288 : vector<1x8x32xf32> to vector<8x32xf32>
    %290 = vector.shape_cast %286 : vector<8x32xf32> to vector<1x8x32xf32>
    tpu.vector_store %arg8[%287, %c0_69, %c0_70], %290 {strides = array<i32>} : memref<8x8x64xf32, #tpu.memory_space<vmem>>, vector<1x8x32xf32>,
    %291 = vector.extract_strided_slice %284 {offsets = [0, 32], sizes = [8, 32], strides = [1, 1]} : vector<8x64xf32> to vector<8x32xf32>
    %292 = arith.index_cast %242 : i32 to index
    %c0_71 = arith.constant 0 : index
    %c32_72 = arith.constant 32 : index
    %293 = vector.load %arg8[%292, %c0_71, %c32_72] : memref<8x8x64xf32, #tpu.memory_space<vmem>>, vector<1x8x32xf32>
    %294 = vector.shape_cast %293 : vector<1x8x32xf32> to vector<8x32xf32>
    %295 = vector.shape_cast %291 : vector<8x32xf32> to vector<1x8x32xf32>
    tpu.vector_store %arg8[%292, %c0_71, %c32_72], %295 {strides = array<i32>} : memref<8x8x64xf32, #tpu.memory_space<vmem>>, vector<1x8x32xf32>,
    %c5_i32 = arith.constant 5 : i32
    %c7_i32_73 = arith.constant 7 : i32
    %296 = arith.subi %c7_i32_73, %c5_i32 : i32
    %297 = arith.index_cast %c5_i32 : i32 to index
    %c0_74 = arith.constant 0 : index
    %c0_75 = arith.constant 0 : index
    %298 = vector.load %arg1[%297, %c0_74, %c0_75] : memref<8x8x256xbf16, #tpu.memory_space<vmem>>, vector<1x8x256xbf16>
    %299 = vector.shape_cast %298 : vector<1x8x256xbf16> to vector<8x256xbf16>
    %300 = arith.index_cast %296 : i32 to index
    %c0_76 = arith.constant 0 : index
    %c0_77 = arith.constant 0 : index
    %301 = vector.load %arg1[%300, %c0_76, %c0_77] : memref<8x8x256xbf16, #tpu.memory_space<vmem>>, vector<1x8x256xbf16>
    %302 = vector.shape_cast %301 : vector<1x8x256xbf16> to vector<8x256xbf16>
    %303 = arith.select %19, %299, %302 : vector<8x256xi1>, vector<8x256xbf16>
    %304 = arith.truncf %284 : vector<8x64xf32> to vector<8x64xbf16>
    %cst_78 = arith.constant dense<0.000000e+00> : vector<8x256xf32>
    %305 = tpu.matmul %304, %24, %cst_78 {dimension_numbers = #tpu.dot_dimension_numbers<[1], [0], [0], [1], [0, 0, 1, 1], [], []>} : vector<8x64xbf16>, vector<64x256xbf16>, vector<8x256xf32> -> vector<8x256xf32>
    %306 = arith.extf %303 : vector<8x256xbf16> to vector<8x256xf32>
    %307 = arith.addf %306, %305 : vector<8x256xf32>
    %308 = vector.extract_strided_slice %307 {offsets = [0, 0], sizes = [8, 64], strides = [1, 1]} : vector<8x256xf32> to vector<8x64xf32>
    %309 = arith.negf %308 : vector<8x64xf32>
    %310 = math.exp %309 : vector<8x64xf32>
    %cst_79 = arith.constant 1.000000e+00 : f32
    %311 = vector.broadcast %cst_79 : f32 to vector<8x64xf32>
    %312 = arith.addf %311, %310 : vector<8x64xf32>
    %313 = arith.divf %311, %312 : vector<8x64xf32>
    %314 = vector.extract_strided_slice %307 {offsets = [0, 64], sizes = [8, 64], strides = [1, 1]} : vector<8x256xf32> to vector<8x64xf32>
    %315 = arith.negf %314 : vector<8x64xf32>
    %316 = math.exp %315 : vector<8x64xf32>
    %cst_80 = arith.constant 1.000000e+00 : f32
    %317 = vector.broadcast %cst_80 : f32 to vector<8x64xf32>
    %318 = arith.addf %317, %316 : vector<8x64xf32>
    %319 = arith.divf %317, %318 : vector<8x64xf32>
    %320 = vector.extract_strided_slice %307 {offsets = [0, 128], sizes = [8, 64], strides = [1, 1]} : vector<8x256xf32> to vector<8x64xf32>
    %321 = math.tanh %320 : vector<8x64xf32>
    %322 = vector.extract_strided_slice %307 {offsets = [0, 192], sizes = [8, 64], strides = [1, 1]} : vector<8x256xf32> to vector<8x64xf32>
    %323 = arith.negf %322 : vector<8x64xf32>
    %324 = math.exp %323 : vector<8x64xf32>
    %cst_81 = arith.constant 1.000000e+00 : f32
    %325 = vector.broadcast %cst_81 : f32 to vector<8x64xf32>
    %326 = arith.addf %325, %324 : vector<8x64xf32>
    %327 = arith.divf %325, %326 : vector<8x64xf32>
    %328 = arith.mulf %319, %285 : vector<8x64xf32>
    %329 = arith.mulf %313, %321 : vector<8x64xf32>
    %330 = arith.addf %328, %329 : vector<8x64xf32>
    %331 = math.tanh %330 : vector<8x64xf32>
    %332 = arith.mulf %327, %331 : vector<8x64xf32>
    %333 = vector.broadcast %c5_i32 : i32 to vector<8x64xi32>
    %334 = vector.broadcast %296 : i32 to vector<8x64xi32>
    %335 = arith.select %22, %333, %334 : vector<8x64xi1>, vector<8x64xi32>
    %336 = vector.broadcast %0 : vector<8x1xi32> to vector<8x64xi32>
    %337 = arith.cmpi sgt, %336, %335 : vector<8x64xi32>
    %338 = arith.select %337, %332, %284 : vector<8x64xi1>, vector<8x64xf32>
    %339 = arith.select %337, %330, %285 : vector<8x64xi1>, vector<8x64xf32>
    %340 = vector.extract_strided_slice %338 {offsets = [0, 0], sizes = [8, 32], strides = [1, 1]} : vector<8x64xf32> to vector<8x32xf32>
    %341 = arith.index_cast %c5_i32 : i32 to index
    %c0_82 = arith.constant 0 : index
    %c0_83 = arith.constant 0 : index
    %342 = vector.load %arg8[%341, %c0_82, %c0_83] : memref<8x8x64xf32, #tpu.memory_space<vmem>>, vector<1x8x32xf32>
    %343 = vector.shape_cast %342 : vector<1x8x32xf32> to vector<8x32xf32>
    %344 = vector.shape_cast %340 : vector<8x32xf32> to vector<1x8x32xf32>
    tpu.vector_store %arg8[%341, %c0_82, %c0_83], %344 {strides = array<i32>} : memref<8x8x64xf32, #tpu.memory_space<vmem>>, vector<1x8x32xf32>,
    %345 = vector.extract_strided_slice %338 {offsets = [0, 32], sizes = [8, 32], strides = [1, 1]} : vector<8x64xf32> to vector<8x32xf32>
    %346 = arith.index_cast %296 : i32 to index
    %c0_84 = arith.constant 0 : index
    %c32_85 = arith.constant 32 : index
    %347 = vector.load %arg8[%346, %c0_84, %c32_85] : memref<8x8x64xf32, #tpu.memory_space<vmem>>, vector<1x8x32xf32>
    %348 = vector.shape_cast %347 : vector<1x8x32xf32> to vector<8x32xf32>
    %349 = vector.shape_cast %345 : vector<8x32xf32> to vector<1x8x32xf32>
    tpu.vector_store %arg8[%346, %c0_84, %c32_85], %349 {strides = array<i32>} : memref<8x8x64xf32, #tpu.memory_space<vmem>>, vector<1x8x32xf32>,
    %c6_i32 = arith.constant 6 : i32
    %c7_i32_86 = arith.constant 7 : i32
    %350 = arith.subi %c7_i32_86, %c6_i32 : i32
    %351 = arith.index_cast %c6_i32 : i32 to index
    %c0_87 = arith.constant 0 : index
    %c0_88 = arith.constant 0 : index
    %352 = vector.load %arg1[%351, %c0_87, %c0_88] : memref<8x8x256xbf16, #tpu.memory_space<vmem>>, vector<1x8x256xbf16>
    %353 = vector.shape_cast %352 : vector<1x8x256xbf16> to vector<8x256xbf16>
    %354 = arith.index_cast %350 : i32 to index
    %c0_89 = arith.constant 0 : index
    %c0_90 = arith.constant 0 : index
    %355 = vector.load %arg1[%354, %c0_89, %c0_90] : memref<8x8x256xbf16, #tpu.memory_space<vmem>>, vector<1x8x256xbf16>
    %356 = vector.shape_cast %355 : vector<1x8x256xbf16> to vector<8x256xbf16>
    %357 = arith.select %19, %353, %356 : vector<8x256xi1>, vector<8x256xbf16>
    %358 = arith.truncf %338 : vector<8x64xf32> to vector<8x64xbf16>
    %cst_91 = arith.constant dense<0.000000e+00> : vector<8x256xf32>
    %359 = tpu.matmul %358, %24, %cst_91 {dimension_numbers = #tpu.dot_dimension_numbers<[1], [0], [0], [1], [0, 0, 1, 1], [], []>} : vector<8x64xbf16>, vector<64x256xbf16>, vector<8x256xf32> -> vector<8x256xf32>
    %360 = arith.extf %357 : vector<8x256xbf16> to vector<8x256xf32>
    %361 = arith.addf %360, %359 : vector<8x256xf32>
    %362 = vector.extract_strided_slice %361 {offsets = [0, 0], sizes = [8, 64], strides = [1, 1]} : vector<8x256xf32> to vector<8x64xf32>
    %363 = arith.negf %362 : vector<8x64xf32>
    %364 = math.exp %363 : vector<8x64xf32>
    %cst_92 = arith.constant 1.000000e+00 : f32
    %365 = vector.broadcast %cst_92 : f32 to vector<8x64xf32>
    %366 = arith.addf %365, %364 : vector<8x64xf32>
    %367 = arith.divf %365, %366 : vector<8x64xf32>
    %368 = vector.extract_strided_slice %361 {offsets = [0, 64], sizes = [8, 64], strides = [1, 1]} : vector<8x256xf32> to vector<8x64xf32>
    %369 = arith.negf %368 : vector<8x64xf32>
    %370 = math.exp %369 : vector<8x64xf32>
    %cst_93 = arith.constant 1.000000e+00 : f32
    %371 = vector.broadcast %cst_93 : f32 to vector<8x64xf32>
    %372 = arith.addf %371, %370 : vector<8x64xf32>
    %373 = arith.divf %371, %372 : vector<8x64xf32>
    %374 = vector.extract_strided_slice %361 {offsets = [0, 128], sizes = [8, 64], strides = [1, 1]} : vector<8x256xf32> to vector<8x64xf32>
    %375 = math.tanh %374 : vector<8x64xf32>
    %376 = vector.extract_strided_slice %361 {offsets = [0, 192], sizes = [8, 64], strides = [1, 1]} : vector<8x256xf32> to vector<8x64xf32>
    %377 = arith.negf %376 : vector<8x64xf32>
    %378 = math.exp %377 : vector<8x64xf32>
    %cst_94 = arith.constant 1.000000e+00 : f32
    %379 = vector.broadcast %cst_94 : f32 to vector<8x64xf32>
    %380 = arith.addf %379, %378 : vector<8x64xf32>
    %381 = arith.divf %379, %380 : vector<8x64xf32>
    %382 = arith.mulf %373, %339 : vector<8x64xf32>
    %383 = arith.mulf %367, %375 : vector<8x64xf32>
    %384 = arith.addf %382, %383 : vector<8x64xf32>
    %385 = math.tanh %384 : vector<8x64xf32>
    %386 = arith.mulf %381, %385 : vector<8x64xf32>
    %387 = vector.broadcast %c6_i32 : i32 to vector<8x64xi32>
    %388 = vector.broadcast %350 : i32 to vector<8x64xi32>
    %389 = arith.select %22, %387, %388 : vector<8x64xi1>, vector<8x64xi32>
    %390 = vector.broadcast %0 : vector<8x1xi32> to vector<8x64xi32>
    %391 = arith.cmpi sgt, %390, %389 : vector<8x64xi32>
    %392 = arith.select %391, %386, %338 : vector<8x64xi1>, vector<8x64xf32>
    %393 = arith.select %391, %384, %339 : vector<8x64xi1>, vector<8x64xf32>
    %394 = vector.extract_strided_slice %392 {offsets = [0, 0], sizes = [8, 32], strides = [1, 1]} : vector<8x64xf32> to vector<8x32xf32>
    %395 = arith.index_cast %c6_i32 : i32 to index
    %c0_95 = arith.constant 0 : index
    %c0_96 = arith.constant 0 : index
    %396 = vector.load %arg8[%395, %c0_95, %c0_96] : memref<8x8x64xf32, #tpu.memory_space<vmem>>, vector<1x8x32xf32>
    %397 = vector.shape_cast %396 : vector<1x8x32xf32> to vector<8x32xf32>
    %398 = vector.shape_cast %394 : vector<8x32xf32> to vector<1x8x32xf32>
    tpu.vector_store %arg8[%395, %c0_95, %c0_96], %398 {strides = array<i32>} : memref<8x8x64xf32, #tpu.memory_space<vmem>>, vector<1x8x32xf32>,
    %399 = vector.extract_strided_slice %392 {offsets = [0, 32], sizes = [8, 32], strides = [1, 1]} : vector<8x64xf32> to vector<8x32xf32>
    %400 = arith.index_cast %350 : i32 to index
    %c0_97 = arith.constant 0 : index
    %c32_98 = arith.constant 32 : index
    %401 = vector.load %arg8[%400, %c0_97, %c32_98] : memref<8x8x64xf32, #tpu.memory_space<vmem>>, vector<1x8x32xf32>
    %402 = vector.shape_cast %401 : vector<1x8x32xf32> to vector<8x32xf32>
    %403 = vector.shape_cast %399 : vector<8x32xf32> to vector<1x8x32xf32>
    tpu.vector_store %arg8[%400, %c0_97, %c32_98], %403 {strides = array<i32>} : memref<8x8x64xf32, #tpu.memory_space<vmem>>, vector<1x8x32xf32>,
    %c7_i32_99 = arith.constant 7 : i32
    %c7_i32_100 = arith.constant 7 : i32
    %404 = arith.subi %c7_i32_100, %c7_i32_99 : i32
    %405 = arith.index_cast %c7_i32_99 : i32 to index
    %c0_101 = arith.constant 0 : index
    %c0_102 = arith.constant 0 : index
    %406 = vector.load %arg1[%405, %c0_101, %c0_102] : memref<8x8x256xbf16, #tpu.memory_space<vmem>>, vector<1x8x256xbf16>
    %407 = vector.shape_cast %406 : vector<1x8x256xbf16> to vector<8x256xbf16>
    %408 = arith.index_cast %404 : i32 to index
    %c0_103 = arith.constant 0 : index
    %c0_104 = arith.constant 0 : index
    %409 = vector.load %arg1[%408, %c0_103, %c0_104] : memref<8x8x256xbf16, #tpu.memory_space<vmem>>, vector<1x8x256xbf16>
    %410 = vector.shape_cast %409 : vector<1x8x256xbf16> to vector<8x256xbf16>
    %411 = arith.select %19, %407, %410 : vector<8x256xi1>, vector<8x256xbf16>
    %412 = arith.truncf %392 : vector<8x64xf32> to vector<8x64xbf16>
    %cst_105 = arith.constant dense<0.000000e+00> : vector<8x256xf32>
    %413 = tpu.matmul %412, %24, %cst_105 {dimension_numbers = #tpu.dot_dimension_numbers<[1], [0], [0], [1], [0, 0, 1, 1], [], []>} : vector<8x64xbf16>, vector<64x256xbf16>, vector<8x256xf32> -> vector<8x256xf32>
    %414 = arith.extf %411 : vector<8x256xbf16> to vector<8x256xf32>
    %415 = arith.addf %414, %413 : vector<8x256xf32>
    %416 = vector.extract_strided_slice %415 {offsets = [0, 0], sizes = [8, 64], strides = [1, 1]} : vector<8x256xf32> to vector<8x64xf32>
    %417 = arith.negf %416 : vector<8x64xf32>
    %418 = math.exp %417 : vector<8x64xf32>
    %cst_106 = arith.constant 1.000000e+00 : f32
    %419 = vector.broadcast %cst_106 : f32 to vector<8x64xf32>
    %420 = arith.addf %419, %418 : vector<8x64xf32>
    %421 = arith.divf %419, %420 : vector<8x64xf32>
    %422 = vector.extract_strided_slice %415 {offsets = [0, 64], sizes = [8, 64], strides = [1, 1]} : vector<8x256xf32> to vector<8x64xf32>
    %423 = arith.negf %422 : vector<8x64xf32>
    %424 = math.exp %423 : vector<8x64xf32>
    %cst_107 = arith.constant 1.000000e+00 : f32
    %425 = vector.broadcast %cst_107 : f32 to vector<8x64xf32>
    %426 = arith.addf %425, %424 : vector<8x64xf32>
    %427 = arith.divf %425, %426 : vector<8x64xf32>
    %428 = vector.extract_strided_slice %415 {offsets = [0, 128], sizes = [8, 64], strides = [1, 1]} : vector<8x256xf32> to vector<8x64xf32>
    %429 = math.tanh %428 : vector<8x64xf32>
    %430 = vector.extract_strided_slice %415 {offsets = [0, 192], sizes = [8, 64], strides = [1, 1]} : vector<8x256xf32> to vector<8x64xf32>
    %431 = arith.negf %430 : vector<8x64xf32>
    %432 = math.exp %431 : vector<8x64xf32>
    %cst_108 = arith.constant 1.000000e+00 : f32
    %433 = vector.broadcast %cst_108 : f32 to vector<8x64xf32>
    %434 = arith.addf %433, %432 : vector<8x64xf32>
    %435 = arith.divf %433, %434 : vector<8x64xf32>
    %436 = arith.mulf %427, %393 : vector<8x64xf32>
    %437 = arith.mulf %421, %429 : vector<8x64xf32>
    %438 = arith.addf %436, %437 : vector<8x64xf32>
    %439 = math.tanh %438 : vector<8x64xf32>
    %440 = arith.mulf %435, %439 : vector<8x64xf32>
    %441 = vector.broadcast %c7_i32_99 : i32 to vector<8x64xi32>
    %442 = vector.broadcast %404 : i32 to vector<8x64xi32>
    %443 = arith.select %22, %441, %442 : vector<8x64xi1>, vector<8x64xi32>
    %444 = vector.broadcast %0 : vector<8x1xi32> to vector<8x64xi32>
    %445 = arith.cmpi sgt, %444, %443 : vector<8x64xi32>
    %446 = arith.select %445, %440, %392 : vector<8x64xi1>, vector<8x64xf32>
    %447 = arith.select %445, %438, %393 : vector<8x64xi1>, vector<8x64xf32>
    %448 = vector.extract_strided_slice %446 {offsets = [0, 0], sizes = [8, 32], strides = [1, 1]} : vector<8x64xf32> to vector<8x32xf32>
    %449 = arith.index_cast %c7_i32_99 : i32 to index
    %c0_109 = arith.constant 0 : index
    %c0_110 = arith.constant 0 : index
    %450 = vector.load %arg8[%449, %c0_109, %c0_110] : memref<8x8x64xf32, #tpu.memory_space<vmem>>, vector<1x8x32xf32>
    %451 = vector.shape_cast %450 : vector<1x8x32xf32> to vector<8x32xf32>
    %452 = vector.shape_cast %448 : vector<8x32xf32> to vector<1x8x32xf32>
    tpu.vector_store %arg8[%449, %c0_109, %c0_110], %452 {strides = array<i32>} : memref<8x8x64xf32, #tpu.memory_space<vmem>>, vector<1x8x32xf32>,
    %453 = vector.extract_strided_slice %446 {offsets = [0, 32], sizes = [8, 32], strides = [1, 1]} : vector<8x64xf32> to vector<8x32xf32>
    %454 = arith.index_cast %404 : i32 to index
    %c0_111 = arith.constant 0 : index
    %c32_112 = arith.constant 32 : index
    %455 = vector.load %arg8[%454, %c0_111, %c32_112] : memref<8x8x64xf32, #tpu.memory_space<vmem>>, vector<1x8x32xf32>
    %456 = vector.shape_cast %455 : vector<1x8x32xf32> to vector<8x32xf32>
    %457 = vector.shape_cast %453 : vector<8x32xf32> to vector<1x8x32xf32>
    tpu.vector_store %arg8[%454, %c0_111, %c32_112], %457 {strides = array<i32>} : memref<8x8x64xf32, #tpu.memory_space<vmem>>, vector<1x8x32xf32>,
    %c8_i32 = arith.constant 8 : i32
    %c0_113 = arith.constant 0 : index
    %c0_114 = arith.constant 0 : index
    %c0_115 = arith.constant 0 : index
    %458 = vector.load %arg3[%c0_113, %c0_114, %c0_115] : memref<1x64x256xbf16, #tpu.memory_space<vmem>>, vector<1x64x256xbf16>
    %459 = vector.shape_cast %458 : vector<1x64x256xbf16> to vector<64x256xbf16>
    %c0_116 = arith.constant 0 : index
    %c0_117 = arith.constant 0 : index
    %c0_118 = arith.constant 0 : index
    %460 = vector.load %arg4[%c0_116, %c0_117, %c0_118] : memref<1x1x256xf32, #tpu.memory_space<vmem>>, vector<1x1x256xf32>
    %461 = vector.shape_cast %460 : vector<1x1x256xf32> to vector<1x256xf32>
    %c0_i32_119 = arith.constant 0 : i32
    %462 = arith.index_cast %c0_i32_119 : i32 to index
    %c0_120 = arith.constant 0 : index
    %c0_121 = arith.constant 0 : index
    %463 = vector.load %arg8[%462, %c0_120, %c0_121] : memref<8x8x64xf32, #tpu.memory_space<vmem>>, vector<1x8x64xf32>
    %464 = vector.shape_cast %463 : vector<1x8x64xf32> to vector<8x64xf32>
    %465 = arith.truncf %464 : vector<8x64xf32> to vector<8x64xbf16>
    %cst_122 = arith.constant dense<0.000000e+00> : vector<8x256xf32>
    %466 = tpu.matmul %465, %459, %cst_122 {dimension_numbers = #tpu.dot_dimension_numbers<[1], [0], [0], [1], [0, 0, 1, 1], [], []>} : vector<8x64xbf16>, vector<64x256xbf16>, vector<8x256xf32> -> vector<8x256xf32>
    %467 = vector.broadcast %461 : vector<1x256xf32> to vector<8x256xf32>
    %468 = arith.addf %466, %467 : vector<8x256xf32>
    %469 = arith.index_cast %c0_i32_119 : i32 to index
    %c0_123 = arith.constant 0 : index
    %c0_124 = arith.constant 0 : index
    %470 = vector.load %arg9[%469, %c0_123, %c0_124] : memref<8x8x256xf32, #tpu.memory_space<vmem>>, vector<1x8x256xf32>
    %471 = vector.shape_cast %470 : vector<1x8x256xf32> to vector<8x256xf32>
    %472 = vector.shape_cast %468 : vector<8x256xf32> to vector<1x8x256xf32>
    tpu.vector_store %arg9[%469, %c0_123, %c0_124], %472 {strides = array<i32>} : memref<8x8x256xf32, #tpu.memory_space<vmem>>, vector<1x8x256xf32>,
    %c1_i32_125 = arith.constant 1 : i32
    %473 = arith.index_cast %c1_i32_125 : i32 to index
    %c0_126 = arith.constant 0 : index
    %c0_127 = arith.constant 0 : index
    %474 = vector.load %arg8[%473, %c0_126, %c0_127] : memref<8x8x64xf32, #tpu.memory_space<vmem>>, vector<1x8x64xf32>
    %475 = vector.shape_cast %474 : vector<1x8x64xf32> to vector<8x64xf32>
    %476 = arith.truncf %475 : vector<8x64xf32> to vector<8x64xbf16>
    %cst_128 = arith.constant dense<0.000000e+00> : vector<8x256xf32>
    %477 = tpu.matmul %476, %459, %cst_128 {dimension_numbers = #tpu.dot_dimension_numbers<[1], [0], [0], [1], [0, 0, 1, 1], [], []>} : vector<8x64xbf16>, vector<64x256xbf16>, vector<8x256xf32> -> vector<8x256xf32>
    %478 = vector.broadcast %461 : vector<1x256xf32> to vector<8x256xf32>
    %479 = arith.addf %477, %478 : vector<8x256xf32>
    %480 = arith.index_cast %c1_i32_125 : i32 to index
    %c0_129 = arith.constant 0 : index
    %c0_130 = arith.constant 0 : index
    %481 = vector.load %arg9[%480, %c0_129, %c0_130] : memref<8x8x256xf32, #tpu.memory_space<vmem>>, vector<1x8x256xf32>
    %482 = vector.shape_cast %481 : vector<1x8x256xf32> to vector<8x256xf32>
    %483 = vector.shape_cast %479 : vector<8x256xf32> to vector<1x8x256xf32>
    tpu.vector_store %arg9[%480, %c0_129, %c0_130], %483 {strides = array<i32>} : memref<8x8x256xf32, #tpu.memory_space<vmem>>, vector<1x8x256xf32>,
    %c2_i32_131 = arith.constant 2 : i32
    %484 = arith.index_cast %c2_i32_131 : i32 to index
    %c0_132 = arith.constant 0 : index
    %c0_133 = arith.constant 0 : index
    %485 = vector.load %arg8[%484, %c0_132, %c0_133] : memref<8x8x64xf32, #tpu.memory_space<vmem>>, vector<1x8x64xf32>
    %486 = vector.shape_cast %485 : vector<1x8x64xf32> to vector<8x64xf32>
    %487 = arith.truncf %486 : vector<8x64xf32> to vector<8x64xbf16>
    %cst_134 = arith.constant dense<0.000000e+00> : vector<8x256xf32>
    %488 = tpu.matmul %487, %459, %cst_134 {dimension_numbers = #tpu.dot_dimension_numbers<[1], [0], [0], [1], [0, 0, 1, 1], [], []>} : vector<8x64xbf16>, vector<64x256xbf16>, vector<8x256xf32> -> vector<8x256xf32>
    %489 = vector.broadcast %461 : vector<1x256xf32> to vector<8x256xf32>
    %490 = arith.addf %488, %489 : vector<8x256xf32>
    %491 = arith.index_cast %c2_i32_131 : i32 to index
    %c0_135 = arith.constant 0 : index
    %c0_136 = arith.constant 0 : index
    %492 = vector.load %arg9[%491, %c0_135, %c0_136] : memref<8x8x256xf32, #tpu.memory_space<vmem>>, vector<1x8x256xf32>
    %493 = vector.shape_cast %492 : vector<1x8x256xf32> to vector<8x256xf32>
    %494 = vector.shape_cast %490 : vector<8x256xf32> to vector<1x8x256xf32>
    tpu.vector_store %arg9[%491, %c0_135, %c0_136], %494 {strides = array<i32>} : memref<8x8x256xf32, #tpu.memory_space<vmem>>, vector<1x8x256xf32>,
    %c3_i32_137 = arith.constant 3 : i32
    %495 = arith.index_cast %c3_i32_137 : i32 to index
    %c0_138 = arith.constant 0 : index
    %c0_139 = arith.constant 0 : index
    %496 = vector.load %arg8[%495, %c0_138, %c0_139] : memref<8x8x64xf32, #tpu.memory_space<vmem>>, vector<1x8x64xf32>
    %497 = vector.shape_cast %496 : vector<1x8x64xf32> to vector<8x64xf32>
    %498 = arith.truncf %497 : vector<8x64xf32> to vector<8x64xbf16>
    %cst_140 = arith.constant dense<0.000000e+00> : vector<8x256xf32>
    %499 = tpu.matmul %498, %459, %cst_140 {dimension_numbers = #tpu.dot_dimension_numbers<[1], [0], [0], [1], [0, 0, 1, 1], [], []>} : vector<8x64xbf16>, vector<64x256xbf16>, vector<8x256xf32> -> vector<8x256xf32>
    %500 = vector.broadcast %461 : vector<1x256xf32> to vector<8x256xf32>
    %501 = arith.addf %499, %500 : vector<8x256xf32>
    %502 = arith.index_cast %c3_i32_137 : i32 to index
    %c0_141 = arith.constant 0 : index
    %c0_142 = arith.constant 0 : index
    %503 = vector.load %arg9[%502, %c0_141, %c0_142] : memref<8x8x256xf32, #tpu.memory_space<vmem>>, vector<1x8x256xf32>
    %504 = vector.shape_cast %503 : vector<1x8x256xf32> to vector<8x256xf32>
    %505 = vector.shape_cast %501 : vector<8x256xf32> to vector<1x8x256xf32>
    tpu.vector_store %arg9[%502, %c0_141, %c0_142], %505 {strides = array<i32>} : memref<8x8x256xf32, #tpu.memory_space<vmem>>, vector<1x8x256xf32>,
    %c4_i32_143 = arith.constant 4 : i32
    %506 = arith.index_cast %c4_i32_143 : i32 to index
    %c0_144 = arith.constant 0 : index
    %c0_145 = arith.constant 0 : index
    %507 = vector.load %arg8[%506, %c0_144, %c0_145] : memref<8x8x64xf32, #tpu.memory_space<vmem>>, vector<1x8x64xf32>
    %508 = vector.shape_cast %507 : vector<1x8x64xf32> to vector<8x64xf32>
    %509 = arith.truncf %508 : vector<8x64xf32> to vector<8x64xbf16>
    %cst_146 = arith.constant dense<0.000000e+00> : vector<8x256xf32>
    %510 = tpu.matmul %509, %459, %cst_146 {dimension_numbers = #tpu.dot_dimension_numbers<[1], [0], [0], [1], [0, 0, 1, 1], [], []>} : vector<8x64xbf16>, vector<64x256xbf16>, vector<8x256xf32> -> vector<8x256xf32>
    %511 = vector.broadcast %461 : vector<1x256xf32> to vector<8x256xf32>
    %512 = arith.addf %510, %511 : vector<8x256xf32>
    %513 = arith.index_cast %c4_i32_143 : i32 to index
    %c0_147 = arith.constant 0 : index
    %c0_148 = arith.constant 0 : index
    %514 = vector.load %arg9[%513, %c0_147, %c0_148] : memref<8x8x256xf32, #tpu.memory_space<vmem>>, vector<1x8x256xf32>
    %515 = vector.shape_cast %514 : vector<1x8x256xf32> to vector<8x256xf32>
    %516 = vector.shape_cast %512 : vector<8x256xf32> to vector<1x8x256xf32>
    tpu.vector_store %arg9[%513, %c0_147, %c0_148], %516 {strides = array<i32>} : memref<8x8x256xf32, #tpu.memory_space<vmem>>, vector<1x8x256xf32>,
    %c5_i32_149 = arith.constant 5 : i32
    %517 = arith.index_cast %c5_i32_149 : i32 to index
    %c0_150 = arith.constant 0 : index
    %c0_151 = arith.constant 0 : index
    %518 = vector.load %arg8[%517, %c0_150, %c0_151] : memref<8x8x64xf32, #tpu.memory_space<vmem>>, vector<1x8x64xf32>
    %519 = vector.shape_cast %518 : vector<1x8x64xf32> to vector<8x64xf32>
    %520 = arith.truncf %519 : vector<8x64xf32> to vector<8x64xbf16>
    %cst_152 = arith.constant dense<0.000000e+00> : vector<8x256xf32>
    %521 = tpu.matmul %520, %459, %cst_152 {dimension_numbers = #tpu.dot_dimension_numbers<[1], [0], [0], [1], [0, 0, 1, 1], [], []>} : vector<8x64xbf16>, vector<64x256xbf16>, vector<8x256xf32> -> vector<8x256xf32>
    %522 = vector.broadcast %461 : vector<1x256xf32> to vector<8x256xf32>
    %523 = arith.addf %521, %522 : vector<8x256xf32>
    %524 = arith.index_cast %c5_i32_149 : i32 to index
    %c0_153 = arith.constant 0 : index
    %c0_154 = arith.constant 0 : index
    %525 = vector.load %arg9[%524, %c0_153, %c0_154] : memref<8x8x256xf32, #tpu.memory_space<vmem>>, vector<1x8x256xf32>
    %526 = vector.shape_cast %525 : vector<1x8x256xf32> to vector<8x256xf32>
    %527 = vector.shape_cast %523 : vector<8x256xf32> to vector<1x8x256xf32>
    tpu.vector_store %arg9[%524, %c0_153, %c0_154], %527 {strides = array<i32>} : memref<8x8x256xf32, #tpu.memory_space<vmem>>, vector<1x8x256xf32>,
    %c6_i32_155 = arith.constant 6 : i32
    %528 = arith.index_cast %c6_i32_155 : i32 to index
    %c0_156 = arith.constant 0 : index
    %c0_157 = arith.constant 0 : index
    %529 = vector.load %arg8[%528, %c0_156, %c0_157] : memref<8x8x64xf32, #tpu.memory_space<vmem>>, vector<1x8x64xf32>
    %530 = vector.shape_cast %529 : vector<1x8x64xf32> to vector<8x64xf32>
    %531 = arith.truncf %530 : vector<8x64xf32> to vector<8x64xbf16>
    %cst_158 = arith.constant dense<0.000000e+00> : vector<8x256xf32>
    %532 = tpu.matmul %531, %459, %cst_158 {dimension_numbers = #tpu.dot_dimension_numbers<[1], [0], [0], [1], [0, 0, 1, 1], [], []>} : vector<8x64xbf16>, vector<64x256xbf16>, vector<8x256xf32> -> vector<8x256xf32>
    %533 = vector.broadcast %461 : vector<1x256xf32> to vector<8x256xf32>
    %534 = arith.addf %532, %533 : vector<8x256xf32>
    %535 = arith.index_cast %c6_i32_155 : i32 to index
    %c0_159 = arith.constant 0 : index
    %c0_160 = arith.constant 0 : index
    %536 = vector.load %arg9[%535, %c0_159, %c0_160] : memref<8x8x256xf32, #tpu.memory_space<vmem>>, vector<1x8x256xf32>
    %537 = vector.shape_cast %536 : vector<1x8x256xf32> to vector<8x256xf32>
    %538 = vector.shape_cast %534 : vector<8x256xf32> to vector<1x8x256xf32>
    tpu.vector_store %arg9[%535, %c0_159, %c0_160], %538 {strides = array<i32>} : memref<8x8x256xf32, #tpu.memory_space<vmem>>, vector<1x8x256xf32>,
    %c7_i32_161 = arith.constant 7 : i32
    %539 = arith.index_cast %c7_i32_161 : i32 to index
    %c0_162 = arith.constant 0 : index
    %c0_163 = arith.constant 0 : index
    %540 = vector.load %arg8[%539, %c0_162, %c0_163] : memref<8x8x64xf32, #tpu.memory_space<vmem>>, vector<1x8x64xf32>
    %541 = vector.shape_cast %540 : vector<1x8x64xf32> to vector<8x64xf32>
    %542 = arith.truncf %541 : vector<8x64xf32> to vector<8x64xbf16>
    %cst_164 = arith.constant dense<0.000000e+00> : vector<8x256xf32>
    %543 = tpu.matmul %542, %459, %cst_164 {dimension_numbers = #tpu.dot_dimension_numbers<[1], [0], [0], [1], [0, 0, 1, 1], [], []>} : vector<8x64xbf16>, vector<64x256xbf16>, vector<8x256xf32> -> vector<8x256xf32>
    %544 = vector.broadcast %461 : vector<1x256xf32> to vector<8x256xf32>
    %545 = arith.addf %543, %544 : vector<8x256xf32>
    %546 = arith.index_cast %c7_i32_161 : i32 to index
    %c0_165 = arith.constant 0 : index
    %c0_166 = arith.constant 0 : index
    %547 = vector.load %arg9[%546, %c0_165, %c0_166] : memref<8x8x256xf32, #tpu.memory_space<vmem>>, vector<1x8x256xf32>
    %548 = vector.shape_cast %547 : vector<1x8x256xf32> to vector<8x256xf32>
    %549 = vector.shape_cast %545 : vector<8x256xf32> to vector<1x8x256xf32>
    tpu.vector_store %arg9[%546, %c0_165, %c0_166], %549 {strides = array<i32>} : memref<8x8x256xf32, #tpu.memory_space<vmem>>, vector<1x8x256xf32>,
    %c8_i32_167 = arith.constant 8 : i32
    %c1 = arith.constant 1 : index
    %c0_168 = arith.constant 0 : index
    %c0_169 = arith.constant 0 : index
    %550 = vector.load %arg2[%c1, %c0_168, %c0_169] : memref<2x64x256xbf16, #tpu.memory_space<vmem>>, vector<1x64x256xbf16>
    %551 = vector.shape_cast %550 : vector<1x64x256xbf16> to vector<64x256xbf16>
    %cst_170 = arith.constant 0.000000e+00 : f32
    %552 = vector.broadcast %cst_170 : f32 to vector<8x64xf32>
    %c0_i32_171 = arith.constant 0 : i32
    %c7_i32_172 = arith.constant 7 : i32
    %553 = arith.subi %c7_i32_172, %c0_i32_171 : i32
    %554 = arith.index_cast %c0_i32_171 : i32 to index
    %c0_173 = arith.constant 0 : index
    %c0_174 = arith.constant 0 : index
    %555 = vector.load %arg9[%554, %c0_173, %c0_174] : memref<8x8x256xf32, #tpu.memory_space<vmem>>, vector<1x8x256xf32>
    %556 = vector.shape_cast %555 : vector<1x8x256xf32> to vector<8x256xf32>
    %557 = arith.index_cast %553 : i32 to index
    %c0_175 = arith.constant 0 : index
    %c0_176 = arith.constant 0 : index
    %558 = vector.load %arg9[%557, %c0_175, %c0_176] : memref<8x8x256xf32, #tpu.memory_space<vmem>>, vector<1x8x256xf32>
    %559 = vector.shape_cast %558 : vector<1x8x256xf32> to vector<8x256xf32>
    %560 = arith.select %19, %556, %559 : vector<8x256xi1>, vector<8x256xf32>
    %561 = arith.truncf %552 : vector<8x64xf32> to vector<8x64xbf16>
    %cst_177 = arith.constant dense<0.000000e+00> : vector<8x256xf32>
    %562 = tpu.matmul %561, %551, %cst_177 {dimension_numbers = #tpu.dot_dimension_numbers<[1], [0], [0], [1], [0, 0, 1, 1], [], []>} : vector<8x64xbf16>, vector<64x256xbf16>, vector<8x256xf32> -> vector<8x256xf32>
    %563 = arith.addf %560, %562 : vector<8x256xf32>
    %564 = vector.extract_strided_slice %563 {offsets = [0, 0], sizes = [8, 64], strides = [1, 1]} : vector<8x256xf32> to vector<8x64xf32>
    %565 = arith.negf %564 : vector<8x64xf32>
    %566 = math.exp %565 : vector<8x64xf32>
    %cst_178 = arith.constant 1.000000e+00 : f32
    %567 = vector.broadcast %cst_178 : f32 to vector<8x64xf32>
    %568 = arith.addf %567, %566 : vector<8x64xf32>
    %569 = arith.divf %567, %568 : vector<8x64xf32>
    %570 = vector.extract_strided_slice %563 {offsets = [0, 64], sizes = [8, 64], strides = [1, 1]} : vector<8x256xf32> to vector<8x64xf32>
    %571 = arith.negf %570 : vector<8x64xf32>
    %572 = math.exp %571 : vector<8x64xf32>
    %cst_179 = arith.constant 1.000000e+00 : f32
    %573 = vector.broadcast %cst_179 : f32 to vector<8x64xf32>
    %574 = arith.addf %573, %572 : vector<8x64xf32>
    %575 = arith.divf %573, %574 : vector<8x64xf32>
    %576 = vector.extract_strided_slice %563 {offsets = [0, 128], sizes = [8, 64], strides = [1, 1]} : vector<8x256xf32> to vector<8x64xf32>
    %577 = math.tanh %576 : vector<8x64xf32>
    %578 = vector.extract_strided_slice %563 {offsets = [0, 192], sizes = [8, 64], strides = [1, 1]} : vector<8x256xf32> to vector<8x64xf32>
    %579 = arith.negf %578 : vector<8x64xf32>
    %580 = math.exp %579 : vector<8x64xf32>
    %cst_180 = arith.constant 1.000000e+00 : f32
    %581 = vector.broadcast %cst_180 : f32 to vector<8x64xf32>
    %582 = arith.addf %581, %580 : vector<8x64xf32>
    %583 = arith.divf %581, %582 : vector<8x64xf32>
    %584 = arith.mulf %575, %552 : vector<8x64xf32>
    %585 = arith.mulf %569, %577 : vector<8x64xf32>
    %586 = arith.addf %584, %585 : vector<8x64xf32>
    %587 = math.tanh %586 : vector<8x64xf32>
    %588 = arith.mulf %583, %587 : vector<8x64xf32>
    %589 = vector.broadcast %c0_i32_171 : i32 to vector<8x64xi32>
    %590 = vector.broadcast %553 : i32 to vector<8x64xi32>
    %591 = arith.select %22, %589, %590 : vector<8x64xi1>, vector<8x64xi32>
    %592 = vector.broadcast %0 : vector<8x1xi32> to vector<8x64xi32>
    %593 = arith.cmpi sgt, %592, %591 : vector<8x64xi32>
    %594 = arith.select %593, %588, %552 : vector<8x64xi1>, vector<8x64xf32>
    %595 = arith.select %593, %586, %552 : vector<8x64xi1>, vector<8x64xf32>
    %c1_i32_181 = arith.constant 1 : i32
    %c7_i32_182 = arith.constant 7 : i32
    %596 = arith.subi %c7_i32_182, %c1_i32_181 : i32
    %597 = arith.index_cast %c1_i32_181 : i32 to index
    %c0_183 = arith.constant 0 : index
    %c0_184 = arith.constant 0 : index
    %598 = vector.load %arg9[%597, %c0_183, %c0_184] : memref<8x8x256xf32, #tpu.memory_space<vmem>>, vector<1x8x256xf32>
    %599 = vector.shape_cast %598 : vector<1x8x256xf32> to vector<8x256xf32>
    %600 = arith.index_cast %596 : i32 to index
    %c0_185 = arith.constant 0 : index
    %c0_186 = arith.constant 0 : index
    %601 = vector.load %arg9[%600, %c0_185, %c0_186] : memref<8x8x256xf32, #tpu.memory_space<vmem>>, vector<1x8x256xf32>
    %602 = vector.shape_cast %601 : vector<1x8x256xf32> to vector<8x256xf32>
    %603 = arith.select %19, %599, %602 : vector<8x256xi1>, vector<8x256xf32>
    %604 = arith.truncf %594 : vector<8x64xf32> to vector<8x64xbf16>
    %cst_187 = arith.constant dense<0.000000e+00> : vector<8x256xf32>
    %605 = tpu.matmul %604, %551, %cst_187 {dimension_numbers = #tpu.dot_dimension_numbers<[1], [0], [0], [1], [0, 0, 1, 1], [], []>} : vector<8x64xbf16>, vector<64x256xbf16>, vector<8x256xf32> -> vector<8x256xf32>
    %606 = arith.addf %603, %605 : vector<8x256xf32>
    %607 = vector.extract_strided_slice %606 {offsets = [0, 0], sizes = [8, 64], strides = [1, 1]} : vector<8x256xf32> to vector<8x64xf32>
    %608 = arith.negf %607 : vector<8x64xf32>
    %609 = math.exp %608 : vector<8x64xf32>
    %cst_188 = arith.constant 1.000000e+00 : f32
    %610 = vector.broadcast %cst_188 : f32 to vector<8x64xf32>
    %611 = arith.addf %610, %609 : vector<8x64xf32>
    %612 = arith.divf %610, %611 : vector<8x64xf32>
    %613 = vector.extract_strided_slice %606 {offsets = [0, 64], sizes = [8, 64], strides = [1, 1]} : vector<8x256xf32> to vector<8x64xf32>
    %614 = arith.negf %613 : vector<8x64xf32>
    %615 = math.exp %614 : vector<8x64xf32>
    %cst_189 = arith.constant 1.000000e+00 : f32
    %616 = vector.broadcast %cst_189 : f32 to vector<8x64xf32>
    %617 = arith.addf %616, %615 : vector<8x64xf32>
    %618 = arith.divf %616, %617 : vector<8x64xf32>
    %619 = vector.extract_strided_slice %606 {offsets = [0, 128], sizes = [8, 64], strides = [1, 1]} : vector<8x256xf32> to vector<8x64xf32>
    %620 = math.tanh %619 : vector<8x64xf32>
    %621 = vector.extract_strided_slice %606 {offsets = [0, 192], sizes = [8, 64], strides = [1, 1]} : vector<8x256xf32> to vector<8x64xf32>
    %622 = arith.negf %621 : vector<8x64xf32>
    %623 = math.exp %622 : vector<8x64xf32>
    %cst_190 = arith.constant 1.000000e+00 : f32
    %624 = vector.broadcast %cst_190 : f32 to vector<8x64xf32>
    %625 = arith.addf %624, %623 : vector<8x64xf32>
    %626 = arith.divf %624, %625 : vector<8x64xf32>
    %627 = arith.mulf %618, %595 : vector<8x64xf32>
    %628 = arith.mulf %612, %620 : vector<8x64xf32>
    %629 = arith.addf %627, %628 : vector<8x64xf32>
    %630 = math.tanh %629 : vector<8x64xf32>
    %631 = arith.mulf %626, %630 : vector<8x64xf32>
    %632 = vector.broadcast %c1_i32_181 : i32 to vector<8x64xi32>
    %633 = vector.broadcast %596 : i32 to vector<8x64xi32>
    %634 = arith.select %22, %632, %633 : vector<8x64xi1>, vector<8x64xi32>
    %635 = vector.broadcast %0 : vector<8x1xi32> to vector<8x64xi32>
    %636 = arith.cmpi sgt, %635, %634 : vector<8x64xi32>
    %637 = arith.select %636, %631, %594 : vector<8x64xi1>, vector<8x64xf32>
    %638 = arith.select %636, %629, %595 : vector<8x64xi1>, vector<8x64xf32>
    %c2_i32_191 = arith.constant 2 : i32
    %c7_i32_192 = arith.constant 7 : i32
    %639 = arith.subi %c7_i32_192, %c2_i32_191 : i32
    %640 = arith.index_cast %c2_i32_191 : i32 to index
    %c0_193 = arith.constant 0 : index
    %c0_194 = arith.constant 0 : index
    %641 = vector.load %arg9[%640, %c0_193, %c0_194] : memref<8x8x256xf32, #tpu.memory_space<vmem>>, vector<1x8x256xf32>
    %642 = vector.shape_cast %641 : vector<1x8x256xf32> to vector<8x256xf32>
    %643 = arith.index_cast %639 : i32 to index
    %c0_195 = arith.constant 0 : index
    %c0_196 = arith.constant 0 : index
    %644 = vector.load %arg9[%643, %c0_195, %c0_196] : memref<8x8x256xf32, #tpu.memory_space<vmem>>, vector<1x8x256xf32>
    %645 = vector.shape_cast %644 : vector<1x8x256xf32> to vector<8x256xf32>
    %646 = arith.select %19, %642, %645 : vector<8x256xi1>, vector<8x256xf32>
    %647 = arith.truncf %637 : vector<8x64xf32> to vector<8x64xbf16>
    %cst_197 = arith.constant dense<0.000000e+00> : vector<8x256xf32>
    %648 = tpu.matmul %647, %551, %cst_197 {dimension_numbers = #tpu.dot_dimension_numbers<[1], [0], [0], [1], [0, 0, 1, 1], [], []>} : vector<8x64xbf16>, vector<64x256xbf16>, vector<8x256xf32> -> vector<8x256xf32>
    %649 = arith.addf %646, %648 : vector<8x256xf32>
    %650 = vector.extract_strided_slice %649 {offsets = [0, 0], sizes = [8, 64], strides = [1, 1]} : vector<8x256xf32> to vector<8x64xf32>
    %651 = arith.negf %650 : vector<8x64xf32>
    %652 = math.exp %651 : vector<8x64xf32>
    %cst_198 = arith.constant 1.000000e+00 : f32
    %653 = vector.broadcast %cst_198 : f32 to vector<8x64xf32>
    %654 = arith.addf %653, %652 : vector<8x64xf32>
    %655 = arith.divf %653, %654 : vector<8x64xf32>
    %656 = vector.extract_strided_slice %649 {offsets = [0, 64], sizes = [8, 64], strides = [1, 1]} : vector<8x256xf32> to vector<8x64xf32>
    %657 = arith.negf %656 : vector<8x64xf32>
    %658 = math.exp %657 : vector<8x64xf32>
    %cst_199 = arith.constant 1.000000e+00 : f32
    %659 = vector.broadcast %cst_199 : f32 to vector<8x64xf32>
    %660 = arith.addf %659, %658 : vector<8x64xf32>
    %661 = arith.divf %659, %660 : vector<8x64xf32>
    %662 = vector.extract_strided_slice %649 {offsets = [0, 128], sizes = [8, 64], strides = [1, 1]} : vector<8x256xf32> to vector<8x64xf32>
    %663 = math.tanh %662 : vector<8x64xf32>
    %664 = vector.extract_strided_slice %649 {offsets = [0, 192], sizes = [8, 64], strides = [1, 1]} : vector<8x256xf32> to vector<8x64xf32>
    %665 = arith.negf %664 : vector<8x64xf32>
    %666 = math.exp %665 : vector<8x64xf32>
    %cst_200 = arith.constant 1.000000e+00 : f32
    %667 = vector.broadcast %cst_200 : f32 to vector<8x64xf32>
    %668 = arith.addf %667, %666 : vector<8x64xf32>
    %669 = arith.divf %667, %668 : vector<8x64xf32>
    %670 = arith.mulf %661, %638 : vector<8x64xf32>
    %671 = arith.mulf %655, %663 : vector<8x64xf32>
    %672 = arith.addf %670, %671 : vector<8x64xf32>
    %673 = math.tanh %672 : vector<8x64xf32>
    %674 = arith.mulf %669, %673 : vector<8x64xf32>
    %675 = vector.broadcast %c2_i32_191 : i32 to vector<8x64xi32>
    %676 = vector.broadcast %639 : i32 to vector<8x64xi32>
    %677 = arith.select %22, %675, %676 : vector<8x64xi1>, vector<8x64xi32>
    %678 = vector.broadcast %0 : vector<8x1xi32> to vector<8x64xi32>
    %679 = arith.cmpi sgt, %678, %677 : vector<8x64xi32>
    %680 = arith.select %679, %674, %637 : vector<8x64xi1>, vector<8x64xf32>
    %681 = arith.select %679, %672, %638 : vector<8x64xi1>, vector<8x64xf32>
    %c3_i32_201 = arith.constant 3 : i32
    %c7_i32_202 = arith.constant 7 : i32
    %682 = arith.subi %c7_i32_202, %c3_i32_201 : i32
    %683 = arith.index_cast %c3_i32_201 : i32 to index
    %c0_203 = arith.constant 0 : index
    %c0_204 = arith.constant 0 : index
    %684 = vector.load %arg9[%683, %c0_203, %c0_204] : memref<8x8x256xf32, #tpu.memory_space<vmem>>, vector<1x8x256xf32>
    %685 = vector.shape_cast %684 : vector<1x8x256xf32> to vector<8x256xf32>
    %686 = arith.index_cast %682 : i32 to index
    %c0_205 = arith.constant 0 : index
    %c0_206 = arith.constant 0 : index
    %687 = vector.load %arg9[%686, %c0_205, %c0_206] : memref<8x8x256xf32, #tpu.memory_space<vmem>>, vector<1x8x256xf32>
    %688 = vector.shape_cast %687 : vector<1x8x256xf32> to vector<8x256xf32>
    %689 = arith.select %19, %685, %688 : vector<8x256xi1>, vector<8x256xf32>
    %690 = arith.truncf %680 : vector<8x64xf32> to vector<8x64xbf16>
    %cst_207 = arith.constant dense<0.000000e+00> : vector<8x256xf32>
    %691 = tpu.matmul %690, %551, %cst_207 {dimension_numbers = #tpu.dot_dimension_numbers<[1], [0], [0], [1], [0, 0, 1, 1], [], []>} : vector<8x64xbf16>, vector<64x256xbf16>, vector<8x256xf32> -> vector<8x256xf32>
    %692 = arith.addf %689, %691 : vector<8x256xf32>
    %693 = vector.extract_strided_slice %692 {offsets = [0, 0], sizes = [8, 64], strides = [1, 1]} : vector<8x256xf32> to vector<8x64xf32>
    %694 = arith.negf %693 : vector<8x64xf32>
    %695 = math.exp %694 : vector<8x64xf32>
    %cst_208 = arith.constant 1.000000e+00 : f32
    %696 = vector.broadcast %cst_208 : f32 to vector<8x64xf32>
    %697 = arith.addf %696, %695 : vector<8x64xf32>
    %698 = arith.divf %696, %697 : vector<8x64xf32>
    %699 = vector.extract_strided_slice %692 {offsets = [0, 64], sizes = [8, 64], strides = [1, 1]} : vector<8x256xf32> to vector<8x64xf32>
    %700 = arith.negf %699 : vector<8x64xf32>
    %701 = math.exp %700 : vector<8x64xf32>
    %cst_209 = arith.constant 1.000000e+00 : f32
    %702 = vector.broadcast %cst_209 : f32 to vector<8x64xf32>
    %703 = arith.addf %702, %701 : vector<8x64xf32>
    %704 = arith.divf %702, %703 : vector<8x64xf32>
    %705 = vector.extract_strided_slice %692 {offsets = [0, 128], sizes = [8, 64], strides = [1, 1]} : vector<8x256xf32> to vector<8x64xf32>
    %706 = math.tanh %705 : vector<8x64xf32>
    %707 = vector.extract_strided_slice %692 {offsets = [0, 192], sizes = [8, 64], strides = [1, 1]} : vector<8x256xf32> to vector<8x64xf32>
    %708 = arith.negf %707 : vector<8x64xf32>
    %709 = math.exp %708 : vector<8x64xf32>
    %cst_210 = arith.constant 1.000000e+00 : f32
    %710 = vector.broadcast %cst_210 : f32 to vector<8x64xf32>
    %711 = arith.addf %710, %709 : vector<8x64xf32>
    %712 = arith.divf %710, %711 : vector<8x64xf32>
    %713 = arith.mulf %704, %681 : vector<8x64xf32>
    %714 = arith.mulf %698, %706 : vector<8x64xf32>
    %715 = arith.addf %713, %714 : vector<8x64xf32>
    %716 = math.tanh %715 : vector<8x64xf32>
    %717 = arith.mulf %712, %716 : vector<8x64xf32>
    %718 = vector.broadcast %c3_i32_201 : i32 to vector<8x64xi32>
    %719 = vector.broadcast %682 : i32 to vector<8x64xi32>
    %720 = arith.select %22, %718, %719 : vector<8x64xi1>, vector<8x64xi32>
    %721 = vector.broadcast %0 : vector<8x1xi32> to vector<8x64xi32>
    %722 = arith.cmpi sgt, %721, %720 : vector<8x64xi32>
    %723 = arith.select %722, %717, %680 : vector<8x64xi1>, vector<8x64xf32>
    %724 = arith.select %722, %715, %681 : vector<8x64xi1>, vector<8x64xf32>
    %c4_i32_211 = arith.constant 4 : i32
    %c7_i32_212 = arith.constant 7 : i32
    %725 = arith.subi %c7_i32_212, %c4_i32_211 : i32
    %726 = arith.index_cast %c4_i32_211 : i32 to index
    %c0_213 = arith.constant 0 : index
    %c0_214 = arith.constant 0 : index
    %727 = vector.load %arg9[%726, %c0_213, %c0_214] : memref<8x8x256xf32, #tpu.memory_space<vmem>>, vector<1x8x256xf32>
    %728 = vector.shape_cast %727 : vector<1x8x256xf32> to vector<8x256xf32>
    %729 = arith.index_cast %725 : i32 to index
    %c0_215 = arith.constant 0 : index
    %c0_216 = arith.constant 0 : index
    %730 = vector.load %arg9[%729, %c0_215, %c0_216] : memref<8x8x256xf32, #tpu.memory_space<vmem>>, vector<1x8x256xf32>
    %731 = vector.shape_cast %730 : vector<1x8x256xf32> to vector<8x256xf32>
    %732 = arith.select %19, %728, %731 : vector<8x256xi1>, vector<8x256xf32>
    %733 = arith.truncf %723 : vector<8x64xf32> to vector<8x64xbf16>
    %cst_217 = arith.constant dense<0.000000e+00> : vector<8x256xf32>
    %734 = tpu.matmul %733, %551, %cst_217 {dimension_numbers = #tpu.dot_dimension_numbers<[1], [0], [0], [1], [0, 0, 1, 1], [], []>} : vector<8x64xbf16>, vector<64x256xbf16>, vector<8x256xf32> -> vector<8x256xf32>
    %735 = arith.addf %732, %734 : vector<8x256xf32>
    %736 = vector.extract_strided_slice %735 {offsets = [0, 0], sizes = [8, 64], strides = [1, 1]} : vector<8x256xf32> to vector<8x64xf32>
    %737 = arith.negf %736 : vector<8x64xf32>
    %738 = math.exp %737 : vector<8x64xf32>
    %cst_218 = arith.constant 1.000000e+00 : f32
    %739 = vector.broadcast %cst_218 : f32 to vector<8x64xf32>
    %740 = arith.addf %739, %738 : vector<8x64xf32>
    %741 = arith.divf %739, %740 : vector<8x64xf32>
    %742 = vector.extract_strided_slice %735 {offsets = [0, 64], sizes = [8, 64], strides = [1, 1]} : vector<8x256xf32> to vector<8x64xf32>
    %743 = arith.negf %742 : vector<8x64xf32>
    %744 = math.exp %743 : vector<8x64xf32>
    %cst_219 = arith.constant 1.000000e+00 : f32
    %745 = vector.broadcast %cst_219 : f32 to vector<8x64xf32>
    %746 = arith.addf %745, %744 : vector<8x64xf32>
    %747 = arith.divf %745, %746 : vector<8x64xf32>
    %748 = vector.extract_strided_slice %735 {offsets = [0, 128], sizes = [8, 64], strides = [1, 1]} : vector<8x256xf32> to vector<8x64xf32>
    %749 = math.tanh %748 : vector<8x64xf32>
    %750 = vector.extract_strided_slice %735 {offsets = [0, 192], sizes = [8, 64], strides = [1, 1]} : vector<8x256xf32> to vector<8x64xf32>
    %751 = arith.negf %750 : vector<8x64xf32>
    %752 = math.exp %751 : vector<8x64xf32>
    %cst_220 = arith.constant 1.000000e+00 : f32
    %753 = vector.broadcast %cst_220 : f32 to vector<8x64xf32>
    %754 = arith.addf %753, %752 : vector<8x64xf32>
    %755 = arith.divf %753, %754 : vector<8x64xf32>
    %756 = arith.mulf %747, %724 : vector<8x64xf32>
    %757 = arith.mulf %741, %749 : vector<8x64xf32>
    %758 = arith.addf %756, %757 : vector<8x64xf32>
    %759 = math.tanh %758 : vector<8x64xf32>
    %760 = arith.mulf %755, %759 : vector<8x64xf32>
    %761 = vector.broadcast %c4_i32_211 : i32 to vector<8x64xi32>
    %762 = vector.broadcast %725 : i32 to vector<8x64xi32>
    %763 = arith.select %22, %761, %762 : vector<8x64xi1>, vector<8x64xi32>
    %764 = vector.broadcast %0 : vector<8x1xi32> to vector<8x64xi32>
    %765 = arith.cmpi sgt, %764, %763 : vector<8x64xi32>
    %766 = arith.select %765, %760, %723 : vector<8x64xi1>, vector<8x64xf32>
    %767 = arith.select %765, %758, %724 : vector<8x64xi1>, vector<8x64xf32>
    %c5_i32_221 = arith.constant 5 : i32
    %c7_i32_222 = arith.constant 7 : i32
    %768 = arith.subi %c7_i32_222, %c5_i32_221 : i32
    %769 = arith.index_cast %c5_i32_221 : i32 to index
    %c0_223 = arith.constant 0 : index
    %c0_224 = arith.constant 0 : index
    %770 = vector.load %arg9[%769, %c0_223, %c0_224] : memref<8x8x256xf32, #tpu.memory_space<vmem>>, vector<1x8x256xf32>
    %771 = vector.shape_cast %770 : vector<1x8x256xf32> to vector<8x256xf32>
    %772 = arith.index_cast %768 : i32 to index
    %c0_225 = arith.constant 0 : index
    %c0_226 = arith.constant 0 : index
    %773 = vector.load %arg9[%772, %c0_225, %c0_226] : memref<8x8x256xf32, #tpu.memory_space<vmem>>, vector<1x8x256xf32>
    %774 = vector.shape_cast %773 : vector<1x8x256xf32> to vector<8x256xf32>
    %775 = arith.select %19, %771, %774 : vector<8x256xi1>, vector<8x256xf32>
    %776 = arith.truncf %766 : vector<8x64xf32> to vector<8x64xbf16>
    %cst_227 = arith.constant dense<0.000000e+00> : vector<8x256xf32>
    %777 = tpu.matmul %776, %551, %cst_227 {dimension_numbers = #tpu.dot_dimension_numbers<[1], [0], [0], [1], [0, 0, 1, 1], [], []>} : vector<8x64xbf16>, vector<64x256xbf16>, vector<8x256xf32> -> vector<8x256xf32>
    %778 = arith.addf %775, %777 : vector<8x256xf32>
    %779 = vector.extract_strided_slice %778 {offsets = [0, 0], sizes = [8, 64], strides = [1, 1]} : vector<8x256xf32> to vector<8x64xf32>
    %780 = arith.negf %779 : vector<8x64xf32>
    %781 = math.exp %780 : vector<8x64xf32>
    %cst_228 = arith.constant 1.000000e+00 : f32
    %782 = vector.broadcast %cst_228 : f32 to vector<8x64xf32>
    %783 = arith.addf %782, %781 : vector<8x64xf32>
    %784 = arith.divf %782, %783 : vector<8x64xf32>
    %785 = vector.extract_strided_slice %778 {offsets = [0, 64], sizes = [8, 64], strides = [1, 1]} : vector<8x256xf32> to vector<8x64xf32>
    %786 = arith.negf %785 : vector<8x64xf32>
    %787 = math.exp %786 : vector<8x64xf32>
    %cst_229 = arith.constant 1.000000e+00 : f32
    %788 = vector.broadcast %cst_229 : f32 to vector<8x64xf32>
    %789 = arith.addf %788, %787 : vector<8x64xf32>
    %790 = arith.divf %788, %789 : vector<8x64xf32>
    %791 = vector.extract_strided_slice %778 {offsets = [0, 128], sizes = [8, 64], strides = [1, 1]} : vector<8x256xf32> to vector<8x64xf32>
    %792 = math.tanh %791 : vector<8x64xf32>
    %793 = vector.extract_strided_slice %778 {offsets = [0, 192], sizes = [8, 64], strides = [1, 1]} : vector<8x256xf32> to vector<8x64xf32>
    %794 = arith.negf %793 : vector<8x64xf32>
    %795 = math.exp %794 : vector<8x64xf32>
    %cst_230 = arith.constant 1.000000e+00 : f32
    %796 = vector.broadcast %cst_230 : f32 to vector<8x64xf32>
    %797 = arith.addf %796, %795 : vector<8x64xf32>
    %798 = arith.divf %796, %797 : vector<8x64xf32>
    %799 = arith.mulf %790, %767 : vector<8x64xf32>
    %800 = arith.mulf %784, %792 : vector<8x64xf32>
    %801 = arith.addf %799, %800 : vector<8x64xf32>
    %802 = math.tanh %801 : vector<8x64xf32>
    %803 = arith.mulf %798, %802 : vector<8x64xf32>
    %804 = vector.broadcast %c5_i32_221 : i32 to vector<8x64xi32>
    %805 = vector.broadcast %768 : i32 to vector<8x64xi32>
    %806 = arith.select %22, %804, %805 : vector<8x64xi1>, vector<8x64xi32>
    %807 = vector.broadcast %0 : vector<8x1xi32> to vector<8x64xi32>
    %808 = arith.cmpi sgt, %807, %806 : vector<8x64xi32>
    %809 = arith.select %808, %803, %766 : vector<8x64xi1>, vector<8x64xf32>
    %810 = arith.select %808, %801, %767 : vector<8x64xi1>, vector<8x64xf32>
    %c6_i32_231 = arith.constant 6 : i32
    %c7_i32_232 = arith.constant 7 : i32
    %811 = arith.subi %c7_i32_232, %c6_i32_231 : i32
    %812 = arith.index_cast %c6_i32_231 : i32 to index
    %c0_233 = arith.constant 0 : index
    %c0_234 = arith.constant 0 : index
    %813 = vector.load %arg9[%812, %c0_233, %c0_234] : memref<8x8x256xf32, #tpu.memory_space<vmem>>, vector<1x8x256xf32>
    %814 = vector.shape_cast %813 : vector<1x8x256xf32> to vector<8x256xf32>
    %815 = arith.index_cast %811 : i32 to index
    %c0_235 = arith.constant 0 : index
    %c0_236 = arith.constant 0 : index
    %816 = vector.load %arg9[%815, %c0_235, %c0_236] : memref<8x8x256xf32, #tpu.memory_space<vmem>>, vector<1x8x256xf32>
    %817 = vector.shape_cast %816 : vector<1x8x256xf32> to vector<8x256xf32>
    %818 = arith.select %19, %814, %817 : vector<8x256xi1>, vector<8x256xf32>
    %819 = arith.truncf %809 : vector<8x64xf32> to vector<8x64xbf16>
    %cst_237 = arith.constant dense<0.000000e+00> : vector<8x256xf32>
    %820 = tpu.matmul %819, %551, %cst_237 {dimension_numbers = #tpu.dot_dimension_numbers<[1], [0], [0], [1], [0, 0, 1, 1], [], []>} : vector<8x64xbf16>, vector<64x256xbf16>, vector<8x256xf32> -> vector<8x256xf32>
    %821 = arith.addf %818, %820 : vector<8x256xf32>
    %822 = vector.extract_strided_slice %821 {offsets = [0, 0], sizes = [8, 64], strides = [1, 1]} : vector<8x256xf32> to vector<8x64xf32>
    %823 = arith.negf %822 : vector<8x64xf32>
    %824 = math.exp %823 : vector<8x64xf32>
    %cst_238 = arith.constant 1.000000e+00 : f32
    %825 = vector.broadcast %cst_238 : f32 to vector<8x64xf32>
    %826 = arith.addf %825, %824 : vector<8x64xf32>
    %827 = arith.divf %825, %826 : vector<8x64xf32>
    %828 = vector.extract_strided_slice %821 {offsets = [0, 64], sizes = [8, 64], strides = [1, 1]} : vector<8x256xf32> to vector<8x64xf32>
    %829 = arith.negf %828 : vector<8x64xf32>
    %830 = math.exp %829 : vector<8x64xf32>
    %cst_239 = arith.constant 1.000000e+00 : f32
    %831 = vector.broadcast %cst_239 : f32 to vector<8x64xf32>
    %832 = arith.addf %831, %830 : vector<8x64xf32>
    %833 = arith.divf %831, %832 : vector<8x64xf32>
    %834 = vector.extract_strided_slice %821 {offsets = [0, 128], sizes = [8, 64], strides = [1, 1]} : vector<8x256xf32> to vector<8x64xf32>
    %835 = math.tanh %834 : vector<8x64xf32>
    %836 = vector.extract_strided_slice %821 {offsets = [0, 192], sizes = [8, 64], strides = [1, 1]} : vector<8x256xf32> to vector<8x64xf32>
    %837 = arith.negf %836 : vector<8x64xf32>
    %838 = math.exp %837 : vector<8x64xf32>
    %cst_240 = arith.constant 1.000000e+00 : f32
    %839 = vector.broadcast %cst_240 : f32 to vector<8x64xf32>
    %840 = arith.addf %839, %838 : vector<8x64xf32>
    %841 = arith.divf %839, %840 : vector<8x64xf32>
    %842 = arith.mulf %833, %810 : vector<8x64xf32>
    %843 = arith.mulf %827, %835 : vector<8x64xf32>
    %844 = arith.addf %842, %843 : vector<8x64xf32>
    %845 = math.tanh %844 : vector<8x64xf32>
    %846 = arith.mulf %841, %845 : vector<8x64xf32>
    %847 = vector.broadcast %c6_i32_231 : i32 to vector<8x64xi32>
    %848 = vector.broadcast %811 : i32 to vector<8x64xi32>
    %849 = arith.select %22, %847, %848 : vector<8x64xi1>, vector<8x64xi32>
    %850 = vector.broadcast %0 : vector<8x1xi32> to vector<8x64xi32>
    %851 = arith.cmpi sgt, %850, %849 : vector<8x64xi32>
    %852 = arith.select %851, %846, %809 : vector<8x64xi1>, vector<8x64xf32>
    %853 = arith.select %851, %844, %810 : vector<8x64xi1>, vector<8x64xf32>
    %c7_i32_241 = arith.constant 7 : i32
    %c7_i32_242 = arith.constant 7 : i32
    %854 = arith.subi %c7_i32_242, %c7_i32_241 : i32
    %855 = arith.index_cast %c7_i32_241 : i32 to index
    %c0_243 = arith.constant 0 : index
    %c0_244 = arith.constant 0 : index
    %856 = vector.load %arg9[%855, %c0_243, %c0_244] : memref<8x8x256xf32, #tpu.memory_space<vmem>>, vector<1x8x256xf32>
    %857 = vector.shape_cast %856 : vector<1x8x256xf32> to vector<8x256xf32>
    %858 = arith.index_cast %854 : i32 to index
    %c0_245 = arith.constant 0 : index
    %c0_246 = arith.constant 0 : index
    %859 = vector.load %arg9[%858, %c0_245, %c0_246] : memref<8x8x256xf32, #tpu.memory_space<vmem>>, vector<1x8x256xf32>
    %860 = vector.shape_cast %859 : vector<1x8x256xf32> to vector<8x256xf32>
    %861 = arith.select %19, %857, %860 : vector<8x256xi1>, vector<8x256xf32>
    %862 = arith.truncf %852 : vector<8x64xf32> to vector<8x64xbf16>
    %cst_247 = arith.constant dense<0.000000e+00> : vector<8x256xf32>
    %863 = tpu.matmul %862, %551, %cst_247 {dimension_numbers = #tpu.dot_dimension_numbers<[1], [0], [0], [1], [0, 0, 1, 1], [], []>} : vector<8x64xbf16>, vector<64x256xbf16>, vector<8x256xf32> -> vector<8x256xf32>
    %864 = arith.addf %861, %863 : vector<8x256xf32>
    %865 = vector.extract_strided_slice %864 {offsets = [0, 0], sizes = [8, 64], strides = [1, 1]} : vector<8x256xf32> to vector<8x64xf32>
    %866 = arith.negf %865 : vector<8x64xf32>
    %867 = math.exp %866 : vector<8x64xf32>
    %cst_248 = arith.constant 1.000000e+00 : f32
    %868 = vector.broadcast %cst_248 : f32 to vector<8x64xf32>
    %869 = arith.addf %868, %867 : vector<8x64xf32>
    %870 = arith.divf %868, %869 : vector<8x64xf32>
    %871 = vector.extract_strided_slice %864 {offsets = [0, 64], sizes = [8, 64], strides = [1, 1]} : vector<8x256xf32> to vector<8x64xf32>
    %872 = arith.negf %871 : vector<8x64xf32>
    %873 = math.exp %872 : vector<8x64xf32>
    %cst_249 = arith.constant 1.000000e+00 : f32
    %874 = vector.broadcast %cst_249 : f32 to vector<8x64xf32>
    %875 = arith.addf %874, %873 : vector<8x64xf32>
    %876 = arith.divf %874, %875 : vector<8x64xf32>
    %877 = vector.extract_strided_slice %864 {offsets = [0, 128], sizes = [8, 64], strides = [1, 1]} : vector<8x256xf32> to vector<8x64xf32>
    %878 = math.tanh %877 : vector<8x64xf32>
    %879 = vector.extract_strided_slice %864 {offsets = [0, 192], sizes = [8, 64], strides = [1, 1]} : vector<8x256xf32> to vector<8x64xf32>
    %880 = arith.negf %879 : vector<8x64xf32>
    %881 = math.exp %880 : vector<8x64xf32>
    %cst_250 = arith.constant 1.000000e+00 : f32
    %882 = vector.broadcast %cst_250 : f32 to vector<8x64xf32>
    %883 = arith.addf %882, %881 : vector<8x64xf32>
    %884 = arith.divf %882, %883 : vector<8x64xf32>
    %885 = arith.mulf %876, %853 : vector<8x64xf32>
    %886 = arith.mulf %870, %878 : vector<8x64xf32>
    %887 = arith.addf %885, %886 : vector<8x64xf32>
    %888 = math.tanh %887 : vector<8x64xf32>
    %889 = arith.mulf %884, %888 : vector<8x64xf32>
    %890 = vector.broadcast %c7_i32_241 : i32 to vector<8x64xi32>
    %891 = vector.broadcast %854 : i32 to vector<8x64xi32>
    %892 = arith.select %22, %890, %891 : vector<8x64xi1>, vector<8x64xi32>
    %893 = vector.broadcast %0 : vector<8x1xi32> to vector<8x64xi32>
    %894 = arith.cmpi sgt, %893, %892 : vector<8x64xi32>
    %895 = arith.select %894, %889, %852 : vector<8x64xi1>, vector<8x64xf32>
    %896 = arith.select %894, %887, %853 : vector<8x64xi1>, vector<8x64xf32>
    %c8_i32_251 = arith.constant 8 : i32
    %c0_252 = arith.constant 0 : index
    %c0_253 = arith.constant 0 : index
    %897 = vector.load %arg5[%c0_252, %c0_253] : memref<64x3xf32, #tpu.memory_space<vmem>>, vector<64x3xf32>
    %cst_254 = arith.constant dense<0.000000e+00> : vector<8x3xf32>
    %898 = tpu.matmul %895, %897, %cst_254 {dimension_numbers = #tpu.dot_dimension_numbers<[1], [0], [0], [1], [0, 0, 1, 1], [], []>} : vector<8x64xf32>, vector<64x3xf32>, vector<8x3xf32> -> vector<8x3xf32>
    %c0_255 = arith.constant 0 : index
    %c0_256 = arith.constant 0 : index
    %899 = vector.load %arg6[%c0_255, %c0_256] : memref<1x3xf32, #tpu.memory_space<vmem>>, vector<1x3xf32>
    %900 = vector.broadcast %899 : vector<1x3xf32> to vector<8x3xf32>
    %901 = arith.addf %898, %900 : vector<8x3xf32>
    %c0_257 = arith.constant 0 : index
    %c0_258 = arith.constant 0 : index
    %902 = vector.load %arg7[%c0_257, %c0_258] : memref<8x3xf32, #tpu.memory_space<vmem>>, vector<8x3xf32>
    tpu.vector_store %arg7[%c0_257, %c0_258], %901 {strides = array<i32>} : memref<8x3xf32, #tpu.memory_space<vmem>>, vector<8x3xf32>,
    return
  }
}

</mosaic_0001>

<bundles_post_ra>
// kernel: lstm_model_forward.1
= control target key start
LH: loop header
LB: loop body
LE: loop exit
PB: predicated region body
PF: predicated region fallthrough
CT: control target
= control target key end

     0   :  { %v2513_v1 = vmov 0   ;;  %v28_v9 = vlaneseq  ;;  %s2514_s21 = smov 64   ;;  %v2515_v45 = vmov 7   ;;  %vm197_vm5 = vcmask 261120   ;;  %s3459_s2 = inlined_call_operand.vmem [shape: bf16[2,64,256], index: 2, kind: input, shape index: {}]   ;;  %s3460_s1 = inlined_call_operand.vmem [shape: bf16[8,8,256], index: 1, kind: input, shape index: {}]   ;;  %s3461_s0 = inlined_call_operand.vmem [shape: s32[8,1], index: 0, kind: input, shape index: {}]   ;;  %s3462_s3 = inlined_call_operand.vmem [shape: bf16[1,64,256], index: 3, kind: input, shape index: {}]   ;;  %s3463_s4 = inlined_call_operand.vmem [shape: f32[1,1,256], index: 4, kind: input, shape index: {}]   ;;  %s3464_s5 = inlined_call_operand.vmem [shape: f32[64,3], index: 5, kind: input, shape index: {}]   ;;  %s3465_s6 = inlined_call_operand.vmem [shape: f32[1,3], index: 6, kind: input, shape index: {}]   ;;  %s3466_s7 = inlined_call_operand.vmem [shape: f32[8,3], index: 7, kind: output, shape index: {}]  }
   0x1   :  { %v2568_v0 = vld [vmem:[%s3459_s2 + $0x4] ss:$8 sps:$4 sm:$0xff]   ;;  %147 = vmatprep.mubr.bf16.mxu0 %v2513_v1  ;;  %2284 = vset.pattern.permute.xlu0 %v2513_v1  ;;  %v2575_v2 = vld [vmem:[%s3459_s2] ss:$8 sps:$4 sm:$0xff]   ;;  %v2582_v3 = vld [vmem:[%s3459_s2 + $0x14] ss:$8 sps:$4 sm:$0xff]  }
   0x2   :  { %243 = vmatprep.mubr.bf16.mxu1 %v2513_v1  ;;  %115 = vmatprep.subr.bf16.mxu0 %v2568_v0  ;;  %v2589_v4 = vld [vmem:[%s3459_s2 + $0x10] ss:$8 sps:$4 sm:$0xff]   ;;  %v2596_v5 = vld [vmem:[%s3459_s2 + $0x24] ss:$8 sps:$4 sm:$0xff]   ;;  %v2602_v6 = vld [vmem:[%s3459_s2 + $0x20] ss:$8 sps:$4 sm:$0xff]  }
   0x3   :  { %211 = vmatprep.subr.bf16.mxu1 %v2568_v0  ;;  %116 = vmatpush1.bf16.msra.mxu0 %v2575_v2  ;;  %v2610_v7 = vld [vmem:[%s3459_s2 + $0x34] ss:$8 sps:$4 sm:$0xff]   ;;  %v2617_v8 = vld [vmem:[%s3459_s2 + $0x30] ss:$8 sps:$4 sm:$0xff]   ;;  %v2637_v10 = vand.u32 127, %v28_v9  ;;  %v2652_v16 = vld [vmem:[%s3460_s1] sm:$0xff] }
   0x4   :  { %212 = vmatpush1.bf16.msra.mxu1 %v2575_v2  ;;  %117 = vmatprep.subr.bf16.mxu0 %v2582_v3  ;;  %v2657_v17 = vld [vmem:[%s3460_s1 + $0x38] sm:$0xff]  ;;  %v27_v34 = vld [vmem:[%s3461_s0] sm:$0xff]  ;;  %vm200_vm6 = vcmask 523520   ;;  %vm111_vm7 = vcmask 523264   ;;  %v2708_v52 = vld [vmem:[%s3460_s1 + $0x8] sm:$0xff]  ;;  %vm2523_vm15 = vmmov 0  }
   0x5   :  { %213 = vmatprep.subr.bf16.mxu1 %v2582_v3  ;;  %v30_v11 = vadd.s32 128, %v2637_v10  ;;  %v35_v12 = vand.u32 63, %v2637_v10  ;;  %vm57_vm3 = vcmp.lt.s32.totalorder %v2637_v10, 32  ;;  %v2713_v53 = vld [vmem:[%s3460_s1 + $0x30] sm:$0xff]  ;;  %v3047_v10 = vld [vmem:[%s3459_s2 + $0x40] ss:$8 sps:$4 sm:$0xff]  }
   0x6   :  { %v2682_v46 = vsel %vm57_vm3, 0, %v2515_v45  ;;  %v2036_v15 = vld [vmem:[%s3464_s5] sm:$0xff] }
   0x7   :  { %118 = vmatpush1.bf16.msra.mxu0 %v2589_v4  ;;  %v42_v13 = vand.u32 63, %v30_v11  ;;  %vm2641_vm0 = vcmp.lt.s32.totalorder %v35_v12, 32 }
   0x8   :  { %214 = vmatpush1.bf16.msra.mxu1 %v2589_v4  ;;  %119 = vmatprep.subr.bf16.mxu0 %v2596_v5 }
   0x9   :  { %215 = vmatprep.subr.bf16.mxu1 %v2596_v5  ;;  %vm2645_vm1 = vcmp.lt.s32.totalorder %v42_v13, 32 }
   0xa   :  { %vm2663_vm2 = vmpackc.low %vm2645_vm1, %vm2641_vm0 }
   0xb   :  { %120 = vmatpush1.bf16.msra.mxu0 %v2602_v6  ;;  %v70_v19 = vsel %vm2663_vm2, %v2652_v16, %v2657_v17  ;;  %v206_v54 = vsel %vm2663_vm2, %v2708_v52, %v2713_v53 }
   0xc   :  { %216 = vmatpush1.bf16.msra.mxu1 %v2602_v6  ;;  %121 = vmatprep.subr.bf16.mxu0 %v2610_v7  ;;  %v156_v20 = vunpack.c.l.bf16 %v70_v19  ;;  %v157_v27 = vunpack.c.h.bf16 %v70_v19  ;;  %v252_v55 = vunpack.c.l.bf16 %v206_v54  ;;  %v253_v62 = vunpack.c.h.bf16 %v206_v54 }
   0xd   :  { %217 = vmatprep.subr.bf16.mxu1 %v2610_v7 }
   0xf   :  { %122 = vmatpush1.bf16.msra.mxu0 %v2617_v8 }
  0x10   :  { %218 = vmatpush1.bf16.msra.mxu1 %v2617_v8  ;;  %307 = vmatprep.subr.bf16.mxu0 %v2568_v0 }
  0x11   :  { %403 = vmatprep.subr.bf16.mxu1 %v2568_v0 }
  0x12   :  { %148 = vmatmul.mubr.bf16.vlgmr.msra.gmra.mrb[0].mxu0 %v2513_v1 }
  0x13   :  { %308 = vmatpush1.bf16.msra.mxu0 %v2575_v2  ;;  %339 = vmatprep.mubr.bf16.mxu0 %v2513_v1 }
  0x14   :  { %309 = vmatprep.subr.bf16.mxu0 %v2582_v3 }
  0x17   :  { %310 = vmatpush1.bf16.msra.mxu0 %v2589_v4 }
  0x18   :  { %311 = vmatprep.subr.bf16.mxu0 %v2596_v5 }
  0x1b   :  { %312 = vmatpush1.bf16.msra.mxu0 %v2602_v6 }
  0x1c   :  { %313 = vmatprep.subr.bf16.mxu0 %v2610_v7 }
  0x1f   :  { %314 = vmatpush1.bf16.msra.mxu0 %v2617_v8 }
  0x20   :  { %497 = vmatprep.subr.bf16.mxu0 %v2568_v0 }
  0xe5   :  { %v149_v21 = vpop.f32.mrb[0].mxu0 }
  0xe6   :  { %v158_v22 = vadd.f32 %v156_v20, %v149_v21  ;;  %v151_v23 = vpop.f32.mrb[1].mxu0 }
  0xe7   :  { %v153_v24 = vpop.f32.mrb[2].mxu0  ;;  %v159_v28 = vadd.f32 %v157_v27, %v151_v23 }
  0xe8   :  { %v2139_v25 = vmul.f32 -1.442695, %v158_v22  ;;  %v154_v26 = vpop.f32.mrb[3].mxu0 }
  0xe9   :  { %v2140_v35 = vmul.f32 -1.442695, %v159_v28 }
  0xea   :  { %2321 = vpow2.f32 %v2139_v25 }
  0xeb   :  { %2323 = vtanh.f32 %v159_v28 }
  0xf4   :  { %v2322_v29 = vpop.eup %2321 }
  0xf5   :  { %v163_v30 = vadd.f32 1.0, %v2322_v29  ;;  %v2324_v31 = vpop.eup %2323 }
  0xf7   :  { %2325 = vrcp.f32 %v163_v30 }
  0xf8   :  { %2327 = vpow2.f32 %v2140_v35 }
 0x101   :  { %v2326_v32 = vpop.eup %2325 }
 0x102   :  { %v174_v33 = vmul.f32 %v2326_v32, %v2324_v31  ;;  %v2328_v36 = vpop.eup %2327  ;;  %v173_v38 = vmul.f32 0.0, %v2326_v32  ;;  %v2516_v31 = vmov 6  }
 0x103   :  { %v170_v37 = vadd.f32 1.0, %v2328_v36  ;;  %v2724_v32 = vsel %vm57_vm3, 1, %v2516_v31 }
 0x104   :  { %176 = vrot.lane.b32.xlu0 %v174_v33, %s2514_s21 }
 0x105   :  { %2329 = vrcp.f32 %v170_v37 }
 0x108   :  { %184 = vperm.xlu0 %2284, %v27_v34  }
 0x10f   :  { %v2330_v41 = vpop.eup %2329 }
 0x176   :  { %v177_v39 = vpop.permute.xlu0 %176 }
 0x177   :  { %v179_v40 = vadd.f32 %v177_v39, %v173_v38  ;;  %v2750_v38 = vld [vmem:[%s3460_s1 + $0x10] sm:$0xff]  ;;  %v2755_v39 = vld [vmem:[%s3460_s1 + $0x28] sm:$0xff] }
 0x179   :  { %2331 = vtanh.f32 %v179_v40 }
 0x183   :  { %v2332_v42 = vpop.eup %2331 }
 0x184   :  { %v181_v43 = vmul.f32 %v2332_v42, %v2330_v41 }
 0x186   :  { %188 = vrot.lane.b32.xlu1 %v181_v43, %s2514_s21 }
 0x187   :  { %v2678_v44 = vpop.permute.xlu0 %184 }
 0x188   :  { %vm186_vm4 = vcmp.gt.s32.totalorder %v2678_v44, %v2682_v46  ;;  %vm283_vm8 = vcmp.gt.s32.totalorder %v2678_v44, %v2724_v32 }
 0x18a   :  { %193 = vrot.lane.b32.xlu1 %v179_v40, %s2514_s21  ;;  %v302_v40 = vsel %vm2663_vm2, %v2750_v38, %v2755_v39 }
 0x18b   :  { %v348_v41 = vunpack.c.l.bf16 %v302_v40 }
 0x1f8   :  { %v189_v47 = vpop.permute.xlu1 %188 }
 0x1f9   :  { %v191_v48 = vsel %vm186_vm4, %v189_v47, 0.0 }
 0x1fa   :  { %198 = vst.msk [vmem:[#allocation2] sm:$0xff] %vm197_vm5, %v191_v48  ;;  %v207_v49 = vpack.c.bf16 %v191_v48, %v191_v48 }
 0x1fb   :  { %201 = vst.msk [vmem:[#allocation2 + $0x38] sm:$0xff] %vm200_vm6, %v191_v48 }
 0x1fc   :  { %v194_v50 = vpop.permute.xlu1 %193  ;;  %2143 = vmatmul.mubr.msk.bf16.vlgmr.msra.gmra.mrb[0].mxu1 %vm111_vm7, %v207_v49 }
 0x1fd   :  { %v196_v51 = vsel %vm186_vm4, %v194_v50, 0.0  ;;  %404 = vmatpush1.bf16.msra.mxu1 %v2575_v2  ;;  %435 = vmatprep.mubr.bf16.mxu1 %v2513_v1  ;;  %v349_v50 = vunpack.c.h.bf16 %v302_v40 }
 0x1fe   :  { %270 = vrot.lane.b32.xlu1 %v196_v51, %s2514_s21  ;;  %405 = vmatprep.subr.bf16.mxu1 %v2582_v3 }
 0x201   :  { %406 = vmatpush1.bf16.msra.mxu1 %v2589_v4 }
 0x202   :  { %407 = vmatprep.subr.bf16.mxu1 %v2596_v5 }
 0x205   :  { %408 = vmatpush1.bf16.msra.mxu1 %v2602_v6 }
 0x206   :  { %409 = vmatprep.subr.bf16.mxu1 %v2610_v7 }
 0x209   :  { %410 = vmatpush1.bf16.msra.mxu1 %v2617_v8 }
 0x20a   :  { %589 = vmatprep.subr.bf16.mxu1 %v2568_v0 }
 0x270   :  { %v271_v23 = vpop.permute.xlu1 %270 }
 0x2cf   :  { %v245_v56 = vpop.f32.mrb[0].mxu1 }
 0x2d0   :  { %v254_v57 = vadd.f32 %v252_v55, %v245_v56  ;;  %v247_v58 = vpop.f32.mrb[1].mxu1 }
 0x2d1   :  { %v249_v59 = vpop.f32.mrb[2].mxu1  ;;  %v255_v63 = vadd.f32 %v253_v62, %v247_v58 }
 0x2d2   :  { %v2144_v60 = vmul.f32 -1.442695, %v254_v57  ;;  %v250_v61 = vpop.f32.mrb[3].mxu1 }
 0x2d3   :  { %v2145_v21 = vmul.f32 -1.442695, %v255_v63 }
 0x2d4   :  { %2333 = vpow2.f32 %v2144_v60 }
 0x2d5   :  { %2335 = vtanh.f32 %v255_v63 }
 0x2de   :  { %v2334_v11 = vpop.eup %2333 }
 0x2df   :  { %v259_v12 = vadd.f32 1.0, %v2334_v11  ;;  %v2336_v13 = vpop.eup %2335 }
 0x2e1   :  { %2337 = vrcp.f32 %v259_v12 }
 0x2e2   :  { %2339 = vpow2.f32 %v2145_v21  ;;  %v2517_v21 = vmov 5  }
 0x2eb   :  { %v2338_v19 = vpop.eup %2337 }
 0x2ec   :  { %v274_v20 = vmul.f32 %v2338_v19, %v2336_v13  ;;  %v2340_v22 = vpop.eup %2339  ;;  %v273_v25 = vmul.f32 %v2338_v19, %v271_v23 }
 0x2ed   :  { %v266_v24 = vadd.f32 1.0, %v2340_v22  ;;  %v2766_v22 = vsel %vm57_vm3, 2, %v2517_v21 }
 0x2ee   :  { %276 = vrot.lane.b32.xlu0 %v274_v20, %s2514_s21  ;;  %vm379_vm9 = vcmp.gt.s32.totalorder %v2678_v44, %v2766_v22 }
 0x2ef   :  { %2341 = vrcp.f32 %v266_v24 }
 0x2f9   :  { %v2342_v28 = vpop.eup %2341 }
 0x360   :  { %v277_v26 = vpop.permute.xlu0 %276 }
 0x361   :  { %v279_v27 = vadd.f32 %v277_v26, %v273_v25 }
 0x363   :  { %2343 = vtanh.f32 %v279_v27  ;;  %290 = vrot.lane.b32.xlu0 %v279_v27, %s2514_s21 }
 0x36d   :  { %v2344_v29 = vpop.eup %2343 }
 0x36e   :  { %v281_v30 = vmul.f32 %v2344_v29, %v2342_v28  ;;  %v2151_v28 = vld [vmem:[%s3460_s1 + $0x18] sm:$0xff]  ;;  %v2152_v29 = vld [vmem:[%s3460_s1 + $0x20] sm:$0xff] }
 0x370   :  { %285 = vrot.lane.b32.xlu1 %v281_v30, %s2514_s21  ;;  %v398_v30 = vsel %vm2663_vm2, %v2151_v28, %v2152_v29 }
 0x371   :  { %v444_v31 = vunpack.c.l.bf16 %v398_v30 }
 0x3d5   :  { %v291_v33 = vpop.permute.xlu0 %290 }
 0x3d6   :  { %v293_v34 = vsel %vm283_vm8, %v291_v33, %v196_v51 }
 0x3d7   :  { %366 = vrot.lane.b32.xlu1 %v293_v34, %s2514_s21 }
 0x3e2   :  { %v286_v35 = vpop.permute.xlu1 %285 }
 0x3e3   :  { %v288_v36 = vsel %vm283_vm8, %v286_v35, %v191_v48 }
 0x3e4   :  { %295 = vst.msk [vmem:[#allocation2 + $0x8] sm:$0xff] %vm197_vm5, %v288_v36  ;;  %v303_v37 = vpack.c.bf16 %v288_v36, %v288_v36 }
 0x3e5   :  { %297 = vst.msk [vmem:[#allocation2 + $0x30] sm:$0xff] %vm200_vm6, %v288_v36 }
 0x3e6   :  { %2148 = vmatmul.mubr.msk.bf16.vlgmr.msra.gmra.mrb[4].mxu0 %vm111_vm7, %v303_v37 }
 0x3e7   :  { %498 = vmatpush1.bf16.msra.mxu0 %v2575_v2  ;;  %529 = vmatprep.mubr.bf16.mxu0 %v2513_v1 }
 0x3e8   :  { %499 = vmatprep.subr.bf16.mxu0 %v2582_v3 }
 0x3eb   :  { %500 = vmatpush1.bf16.msra.mxu0 %v2589_v4 }
 0x3ec   :  { %501 = vmatprep.subr.bf16.mxu0 %v2596_v5 }
 0x3ef   :  { %502 = vmatpush1.bf16.msra.mxu0 %v2602_v6 }
 0x3f0   :  { %503 = vmatprep.subr.bf16.mxu0 %v2610_v7 }
 0x3f3   :  { %504 = vmatpush1.bf16.msra.mxu0 %v2617_v8 }
 0x3f4   :  { %681 = vmatprep.subr.bf16.mxu0 %v2568_v0 }
 0x449   :  { %v367_v61 = vpop.permute.xlu1 %366 }
 0x4b9   :  { %v341_v42 = vpop.f32.mrb[4].mxu0 }
 0x4ba   :  { %v350_v43 = vadd.f32 %v348_v41, %v341_v42  ;;  %v343_v45 = vpop.f32.mrb[5].mxu0 }
 0x4bb   :  { %v345_v47 = vpop.f32.mrb[6].mxu0  ;;  %v351_v51 = vadd.f32 %v349_v50, %v343_v45 }
 0x4bc   :  { %v2149_v48 = vmul.f32 -1.442695, %v350_v43  ;;  %v346_v49 = vpop.f32.mrb[7].mxu0 }
 0x4bd   :  { %v2150_v59 = vmul.f32 -1.442695, %v351_v51 }
 0x4be   :  { %2345 = vpow2.f32 %v2149_v48 }
 0x4bf   :  { %2347 = vtanh.f32 %v351_v51 }
 0x4c8   :  { %v2346_v54 = vpop.eup %2345 }
 0x4c9   :  { %v355_v55 = vadd.f32 1.0, %v2346_v54  ;;  %v2348_v56 = vpop.eup %2347 }
 0x4cb   :  { %2349 = vrcp.f32 %v355_v55 }
 0x4cc   :  { %2351 = vpow2.f32 %v2150_v59 }
 0x4d5   :  { %v2350_v57 = vpop.eup %2349 }
 0x4d6   :  { %v370_v58 = vmul.f32 %v2350_v57, %v2348_v56  ;;  %v2352_v60 = vpop.eup %2351  ;;  %v369_v63 = vmul.f32 %v2350_v57, %v367_v61  ;;  %v2518_v61 = vmov 4  }
 0x4d7   :  { %v362_v62 = vadd.f32 1.0, %v2352_v60 }
 0x4d8   :  { %372 = vrot.lane.b32.xlu0 %v370_v58, %s2514_s21 }
 0x4d9   :  { %2353 = vrcp.f32 %v362_v62  ;;  %v2802_v62 = vsel %vm57_vm3, 3, %v2518_v61 }
 0x4da   :  { %vm475_vm10 = vcmp.gt.s32.totalorder %v2678_v44, %v2802_v62 }
 0x4e3   :  { %v2354_v13 = vpop.eup %2353 }
 0x54a   :  { %v373_v11 = vpop.permute.xlu0 %372 }
 0x54b   :  { %v375_v12 = vadd.f32 %v373_v11, %v369_v63 }
 0x54d   :  { %2355 = vtanh.f32 %v375_v12  ;;  %386 = vrot.lane.b32.xlu0 %v375_v12, %s2514_s21 }
 0x557   :  { %v2356_v19 = vpop.eup %2355 }
 0x558   :  { %v377_v20 = vmul.f32 %v2356_v19, %v2354_v13 }
 0x55a   :  { %381 = vrot.lane.b32.xlu1 %v377_v20, %s2514_s21  ;;  %v492_v20 = vsel %vm2663_vm2, %v2152_v29, %v2151_v28 }
 0x55b   :  { %v538_v21 = vunpack.c.l.bf16 %v492_v20 }
 0x5bf   :  { %v387_v23 = vpop.permute.xlu0 %386 }
 0x5c0   :  { %v389_v24 = vsel %vm379_vm9, %v387_v23, %v293_v34 }
 0x5c1   :  { %462 = vrot.lane.b32.xlu1 %v389_v24, %s2514_s21 }
 0x5cc   :  { %v382_v25 = vpop.permute.xlu1 %381 }
 0x5cd   :  { %v384_v26 = vsel %vm379_vm9, %v382_v25, %v288_v36 }
 0x5ce   :  { %391 = vst.msk [vmem:[#allocation2 + $0x10] sm:$0xff] %vm197_vm5, %v384_v26  ;;  %v399_v27 = vpack.c.bf16 %v384_v26, %v384_v26 }
 0x5cf   :  { %393 = vst.msk [vmem:[#allocation2 + $0x28] sm:$0xff] %vm200_vm6, %v384_v26 }
 0x5d0   :  { %2153 = vmatmul.mubr.msk.bf16.vlgmr.msra.gmra.mrb[4].mxu1 %vm111_vm7, %v399_v27 }
 0x5d1   :  { %590 = vmatpush1.bf16.msra.mxu1 %v2575_v2  ;;  %621 = vmatprep.mubr.bf16.mxu1 %v2513_v1 }
 0x5d2   :  { %591 = vmatprep.subr.bf16.mxu1 %v2582_v3 }
 0x5d5   :  { %592 = vmatpush1.bf16.msra.mxu1 %v2589_v4 }
 0x5d6   :  { %593 = vmatprep.subr.bf16.mxu1 %v2596_v5 }
 0x5d9   :  { %594 = vmatpush1.bf16.msra.mxu1 %v2602_v6 }
 0x5da   :  { %595 = vmatprep.subr.bf16.mxu1 %v2610_v7 }
 0x5dd   :  { %596 = vmatpush1.bf16.msra.mxu1 %v2617_v8 }
 0x5de   :  { %773 = vmatprep.subr.bf16.mxu1 %v2568_v0  ;;  %v445_v0 = vunpack.c.h.bf16 %v398_v30 }
 0x633   :  { %v463_v51 = vpop.permute.xlu1 %462 }
 0x6a3   :  { %v437_v33 = vpop.f32.mrb[4].mxu1 }
 0x6a4   :  { %v446_v34 = vadd.f32 %v444_v31, %v437_v33  ;;  %v439_v35 = vpop.f32.mrb[5].mxu1  ;;  %v539_v31 = vunpack.c.h.bf16 %v492_v20 }
 0x6a5   :  { %v441_v36 = vpop.f32.mrb[6].mxu1  ;;  %v447_v41 = vadd.f32 %v445_v0, %v439_v35 }
 0x6a6   :  { %v2154_v37 = vmul.f32 -1.442695, %v446_v34  ;;  %v442_v40 = vpop.f32.mrb[7].mxu1 }
 0x6a7   :  { %v2155_v49 = vmul.f32 -1.442695, %v447_v41 }
 0x6a8   :  { %2357 = vpow2.f32 %v2154_v37 }
 0x6a9   :  { %2359 = vtanh.f32 %v447_v41 }
 0x6b2   :  { %v2358_v42 = vpop.eup %2357 }
 0x6b3   :  { %v451_v43 = vadd.f32 1.0, %v2358_v42  ;;  %v2360_v45 = vpop.eup %2359 }
 0x6b5   :  { %2361 = vrcp.f32 %v451_v43 }
 0x6b6   :  { %2363 = vpow2.f32 %v2155_v49 }
 0x6bf   :  { %v2362_v47 = vpop.eup %2361 }
 0x6c0   :  { %v466_v48 = vmul.f32 %v2362_v47, %v2360_v45  ;;  %v2364_v50 = vpop.eup %2363  ;;  %v465_v55 = vmul.f32 %v2362_v47, %v463_v51 }
 0x6c1   :  { %v458_v54 = vadd.f32 1.0, %v2364_v50  ;;  %v2519_v50 = vmov 3  }
 0x6c2   :  { %468 = vrot.lane.b32.xlu0 %v466_v48, %s2514_s21  ;;  %v2831_v51 = vsel %vm57_vm3, 4, %v2519_v50 }
 0x6c3   :  { %2365 = vrcp.f32 %v458_v54  ;;  %vm569_vm11 = vcmp.gt.s32.totalorder %v2678_v44, %v2831_v51 }
 0x6cd   :  { %v2366_v58 = vpop.eup %2365 }
 0x734   :  { %v469_v56 = vpop.permute.xlu0 %468 }
 0x735   :  { %v471_v57 = vadd.f32 %v469_v56, %v465_v55 }
 0x737   :  { %2367 = vtanh.f32 %v471_v57  ;;  %482 = vrot.lane.b32.xlu0 %v471_v57, %s2514_s21 }
 0x741   :  { %v2368_v59 = vpop.eup %2367 }
 0x742   :  { %v473_v60 = vmul.f32 %v2368_v59, %v2366_v58  ;;  %v584_v59 = vsel %vm2663_vm2, %v2755_v39, %v2750_v38 }
 0x744   :  { %477 = vrot.lane.b32.xlu1 %v473_v60, %s2514_s21 }
 0x7a9   :  { %v483_v63 = vpop.permute.xlu0 %482 }
 0x7aa   :  { %v485_v11 = vsel %vm475_vm10, %v483_v63, %v389_v24 }
 0x7ab   :  { %556 = vrot.lane.b32.xlu1 %v485_v11, %s2514_s21 }
 0x7b6   :  { %v478_v12 = vpop.permute.xlu1 %477 }
 0x7b7   :  { %v480_v13 = vsel %vm475_vm10, %v478_v12, %v384_v26 }
 0x7b8   :  { %487 = vst.msk [vmem:[#allocation2 + $0x18] sm:$0xff] %vm197_vm5, %v480_v13  ;;  %v493_v19 = vpack.c.bf16 %v480_v13, %v480_v13 }
 0x7b9   :  { %489 = vst.msk [vmem:[#allocation2 + $0x20] sm:$0xff] %vm200_vm6, %v480_v13 }
 0x7ba   :  { %2158 = vmatmul.mubr.msk.bf16.vlgmr.msra.gmra.mrb[8].mxu0 %vm111_vm7, %v493_v19 }
 0x7bb   :  { %682 = vmatpush1.bf16.msra.mxu0 %v2575_v2  ;;  %713 = vmatprep.mubr.bf16.mxu0 %v2513_v1 }
 0x7bc   :  { %683 = vmatprep.subr.bf16.mxu0 %v2582_v3 }
 0x7bf   :  { %684 = vmatpush1.bf16.msra.mxu0 %v2589_v4 }
 0x7c0   :  { %685 = vmatprep.subr.bf16.mxu0 %v2596_v5 }
 0x7c3   :  { %686 = vmatpush1.bf16.msra.mxu0 %v2602_v6 }
 0x7c4   :  { %687 = vmatprep.subr.bf16.mxu0 %v2610_v7 }
 0x7c7   :  { %688 = vmatpush1.bf16.msra.mxu0 %v2617_v8 }
 0x81d   :  { %v557_v0 = vpop.permute.xlu1 %556 }
 0x88d   :  { %v531_v23 = vpop.f32.mrb[8].mxu0 }
 0x88e   :  { %v540_v24 = vadd.f32 %v538_v21, %v531_v23  ;;  %v533_v25 = vpop.f32.mrb[9].mxu0 }
 0x88f   :  { %v535_v26 = vpop.f32.mrb[10].mxu0  ;;  %v541_v33 = vadd.f32 %v539_v31, %v533_v25  ;;  %v2520_v31 = vmov 2  }
 0x890   :  { %v2159_v27 = vmul.f32 -1.442695, %v540_v24  ;;  %v536_v30 = vpop.f32.mrb[11].mxu0 }
 0x891   :  { %v2160_v28 = vmul.f32 -1.442695, %v541_v33 }
 0x892   :  { %2369 = vpow2.f32 %v2159_v27 }
 0x893   :  { %2371 = vtanh.f32 %v541_v33  ;;  %v2862_v33 = vsel %vm57_vm3, 5, %v2520_v31 }
 0x894   :  { %vm661_vm12 = vcmp.gt.s32.totalorder %v2678_v44, %v2862_v33 }
 0x89c   :  { %v2370_v34 = vpop.eup %2369 }
 0x89d   :  { %v545_v35 = vadd.f32 1.0, %v2370_v34  ;;  %v2372_v36 = vpop.eup %2371 }
 0x89f   :  { %2373 = vrcp.f32 %v545_v35 }
 0x8a0   :  { %2375 = vpow2.f32 %v2160_v28  ;;  %v676_v28 = vsel %vm2663_vm2, %v2713_v53, %v2708_v52 }
 0x8a9   :  { %v2374_v37 = vpop.eup %2373 }
 0x8aa   :  { %v560_v40 = vmul.f32 %v2374_v37, %v2372_v36  ;;  %v2376_v29 = vpop.eup %2375  ;;  %v559_v42 = vmul.f32 %v2374_v37, %v557_v0 }
 0x8ab   :  { %v552_v41 = vadd.f32 1.0, %v2376_v29  ;;  %v722_v29 = vunpack.c.l.bf16 %v676_v28 }
 0x8ac   :  { %562 = vrot.lane.b32.xlu0 %v560_v40, %s2514_s21 }
 0x8ad   :  { %2377 = vrcp.f32 %v552_v41 }
 0x8b7   :  { %v2378_v47 = vpop.eup %2377 }
 0x91e   :  { %v563_v43 = vpop.permute.xlu0 %562 }
 0x91f   :  { %v565_v45 = vadd.f32 %v563_v43, %v559_v42 }
 0x921   :  { %2379 = vtanh.f32 %v565_v45  ;;  %576 = vrot.lane.b32.xlu0 %v565_v45, %s2514_s21 }
 0x92b   :  { %v2380_v48 = vpop.eup %2379 }
 0x92c   :  { %v567_v49 = vmul.f32 %v2380_v48, %v2378_v47  ;;  %v723_v48 = vunpack.c.h.bf16 %v676_v28 }
 0x92e   :  { %571 = vrot.lane.b32.xlu1 %v567_v49, %s2514_s21 }
 0x993   :  { %v577_v54 = vpop.permute.xlu0 %576 }
 0x994   :  { %v579_v55 = vsel %vm569_vm11, %v577_v54, %v485_v11 }
 0x995   :  { %648 = vrot.lane.b32.xlu1 %v579_v55, %s2514_s21 }
 0x9a0   :  { %v572_v56 = vpop.permute.xlu1 %571 }
 0x9a1   :  { %v574_v57 = vsel %vm569_vm11, %v572_v56, %v480_v13 }
 0x9a2   :  { %580 = vst.msk [vmem:[#allocation2 + $0x20] sm:$0xff] %vm197_vm5, %v574_v57  ;;  %v585_v58 = vpack.c.bf16 %v574_v57, %v574_v57 }
 0x9a3   :  { %581 = vst.msk [vmem:[#allocation2 + $0x18] sm:$0xff] %vm200_vm6, %v574_v57 }
 0x9a4   :  { %2163 = vmatmul.mubr.msk.bf16.vlgmr.msra.gmra.mrb[8].mxu1 %vm111_vm7, %v585_v58 }
 0x9a5   :  { %774 = vmatpush1.bf16.msra.mxu1 %v2575_v2  ;;  %805 = vmatprep.mubr.bf16.mxu1 %v2513_v1  ;;  %v630_v2 = vunpack.c.l.bf16 %v584_v59 }
 0x9a6   :  { %775 = vmatprep.subr.bf16.mxu1 %v2582_v3 }
 0x9a9   :  { %776 = vmatpush1.bf16.msra.mxu1 %v2589_v4 }
 0x9aa   :  { %777 = vmatprep.subr.bf16.mxu1 %v2596_v5  ;;  %v631_v5 = vunpack.c.h.bf16 %v584_v59 }
 0x9ad   :  { %778 = vmatpush1.bf16.msra.mxu1 %v2602_v6 }
 0x9ae   :  { %779 = vmatprep.subr.bf16.mxu1 %v2610_v7 }
 0x9b1   :  { %780 = vmatpush1.bf16.msra.mxu1 %v2617_v8 }
 0xa07   :  { %v649_v20 = vpop.permute.xlu1 %648 }
 0xa77   :  { %v623_v60 = vpop.f32.mrb[8].mxu1 }
 0xa78   :  { %v632_v61 = vadd.f32 %v630_v2, %v623_v60  ;;  %v625_v63 = vpop.f32.mrb[9].mxu1 }
 0xa79   :  { %v627_v3 = vpop.f32.mrb[10].mxu1  ;;  %v633_v12 = vadd.f32 %v631_v5, %v625_v63  ;;  %v2895_v63 = vld [vmem:[%s3462_s3 + $0x4] ss:$8 sps:$4 sm:$0xff]  }
 0xa7a   :  { %v2164_v11 = vmul.f32 -1.442695, %v632_v61  ;;  %v628_v4 = vpop.f32.mrb[11].mxu1  ;;  %v2900_v3 = vld [vmem:[%s3462_s3] ss:$8 sps:$4 sm:$0xff]   ;;  %966 = vmatprep.subr.bf16.mxu1 %v2895_v63  ;;  %918 = vmatprep.subr.bf16.mxu0 %v2895_v63 }
 0xa7b   :  { %v2165_v38 = vmul.f32 -1.442695, %v633_v12  ;;  %v2913_v4 = vld [vmem:[%s3462_s3 + $0x10] ss:$8 sps:$4 sm:$0xff]   ;;  %v2920_v5 = vld [vmem:[%s3462_s3 + $0x24] ss:$8 sps:$4 sm:$0xff]  }
 0xa7c   :  { %2381 = vpow2.f32 %v2164_v11  ;;  %v2908_v11 = vld [vmem:[%s3462_s3 + $0x14] ss:$8 sps:$4 sm:$0xff]  }
 0xa7d   :  { %2383 = vtanh.f32 %v633_v12 }
 0xa86   :  { %v2382_v6 = vpop.eup %2381 }
 0xa87   :  { %v637_v13 = vadd.f32 1.0, %v2382_v6  ;;  %v2384_v7 = vpop.eup %2383  ;;  %v2925_v6 = vld [vmem:[%s3462_s3 + $0x20] ss:$8 sps:$4 sm:$0xff]  }
 0xa89   :  { %2385 = vrcp.f32 %v637_v13 }
 0xa8a   :  { %2387 = vpow2.f32 %v2165_v38  ;;  %v2521_v38 = vmov 1  }
 0xa93   :  { %v2386_v8 = vpop.eup %2385 }
 0xa94   :  { %v652_v19 = vmul.f32 %v2386_v8, %v2384_v7  ;;  %v2388_v39 = vpop.eup %2387  ;;  %v651_v23 = vmul.f32 %v2386_v8, %v649_v20  ;;  %v2932_v8 = vld [vmem:[%s3462_s3 + $0x34] ss:$8 sps:$4 sm:$0xff]  }
 0xa95   :  { %v644_v21 = vadd.f32 1.0, %v2388_v39  ;;  %v2945_v39 = vsel %vm57_vm3, 6, %v2521_v38 }
 0xa96   :  { %654 = vrot.lane.b32.xlu0 %v652_v19, %s2514_s21  ;;  %v2938_v19 = vld [vmem:[%s3462_s3 + $0x30] ss:$8 sps:$4 sm:$0xff]   ;;  %vm753_vm13 = vcmp.gt.s32.totalorder %v2678_v44, %v2945_v39 }
 0xa97   :  { %2389 = vrcp.f32 %v644_v21 }
 0xaa1   :  { %v2390_v26 = vpop.eup %2389 }
 0xb08   :  { %v655_v24 = vpop.permute.xlu0 %654 }
 0xb09   :  { %v657_v25 = vadd.f32 %v655_v24, %v651_v23 }
 0xb0b   :  { %2391 = vtanh.f32 %v657_v25  ;;  %668 = vrot.lane.b32.xlu0 %v657_v25, %s2514_s21 }
 0xb15   :  { %v2392_v27 = vpop.eup %2391 }
 0xb16   :  { %v659_v30 = vmul.f32 %v2392_v27, %v2390_v26 }
 0xb18   :  { %663 = vrot.lane.b32.xlu1 %v659_v30, %s2514_s21  ;;  %v1059_v30 = vld [vmem:[#allocation2 + $0x18] sm:$0xff] }
 0xb19   :  { %v1060_v31 = vpack.c.bf16 %v1059_v30, %v1059_v30  ;;  %v3032_v30 = vsel %vm57_vm3, 7, %v2513_v1 }
 0xb1a   :  { %vm845_vm14 = vcmp.gt.s32.totalorder %v2678_v44, %v3032_v30 }
 0xb7d   :  { %v669_v34 = vpop.permute.xlu0 %668 }
 0xb7e   :  { %v2869_v35 = vsel %vm661_vm12, %v669_v34, %v579_v55 }
 0xb7f   :  { %740 = vrot.lane.b32.xlu1 %v2869_v35, %s2514_s21 }
 0xb8a   :  { %v664_v36 = vpop.permute.xlu1 %663 }
 0xb8b   :  { %v2876_v37 = vsel %vm661_vm12, %v664_v36, %v574_v57  ;;  %v768_v36 = vsel %vm2663_vm2, %v2657_v17, %v2652_v16 }
 0xb8c   :  { %672 = vst.msk [vmem:[#allocation2 + $0x28] sm:$0xff] %vm197_vm5, %v2876_v37  ;;  %v677_v40 = vpack.c.bf16 %v2876_v37, %v2876_v37 }
 0xb8d   :  { %673 = vst.msk [vmem:[#allocation2 + $0x10] sm:$0xff] %vm200_vm6, %v2876_v37 }
 0xb8e   :  { %2168 = vmatmul.mubr.msk.bf16.vlgmr.msra.gmra.mrb[12].mxu0 %vm111_vm7, %v677_v40 }
 0xb8f   :  { %950 = vmatprep.mubr.bf16.mxu0 %v2513_v1  ;;  %919 = vmatpush1.bf16.msra.mxu0 %v2900_v3 }
 0xb90   :  { %920 = vmatprep.subr.bf16.mxu0 %v2908_v11 }
 0xb93   :  { %921 = vmatpush1.bf16.msra.mxu0 %v2913_v4  ;;  %v1157_v34 = vld [vmem:[#allocation2 + $0x28] sm:$0xff] }
 0xb94   :  { %922 = vmatprep.subr.bf16.mxu0 %v2920_v5 }
 0xb97   :  { %923 = vmatpush1.bf16.msra.mxu0 %v2925_v6 }
 0xb98   :  { %924 = vmatprep.subr.bf16.mxu0 %v2932_v8 }
 0xb9b   :  { %925 = vmatpush1.bf16.msra.mxu0 %v2938_v19 }
 0xb9c   :  { %1015 = vmatprep.subr.bf16.mxu0 %v2895_v63 }
 0xbf1   :  { %v741_v58 = vpop.permute.xlu1 %740 }
 0xc61   :  { %v715_v0 = vpop.f32.mrb[12].mxu0 }
 0xc62   :  { %v724_v41 = vadd.f32 %v722_v29, %v715_v0  ;;  %v717_v42 = vpop.f32.mrb[13].mxu0 }
 0xc63   :  { %v719_v43 = vpop.f32.mrb[14].mxu0  ;;  %v725_v49 = vadd.f32 %v723_v48, %v717_v42 }
 0xc64   :  { %v2169_v45 = vmul.f32 -1.442695, %v724_v41  ;;  %v720_v47 = vpop.f32.mrb[15].mxu0  ;;  %v815_v43 = vunpack.c.h.bf16 %v768_v36 }
 0xc65   :  { %v2170_v52 = vmul.f32 -1.442695, %v725_v49 }
 0xc66   :  { %2393 = vpow2.f32 %v2169_v45 }
 0xc67   :  { %2395 = vtanh.f32 %v725_v49 }
 0xc70   :  { %v2394_v50 = vpop.eup %2393 }
 0xc71   :  { %v729_v54 = vadd.f32 1.0, %v2394_v50  ;;  %v2396_v55 = vpop.eup %2395 }
 0xc73   :  { %2397 = vrcp.f32 %v729_v54 }
 0xc74   :  { %2399 = vpow2.f32 %v2170_v52 }
 0xc7d   :  { %v2398_v56 = vpop.eup %2397 }
 0xc7e   :  { %v744_v57 = vmul.f32 %v2398_v56, %v2396_v55  ;;  %v2400_v53 = vpop.eup %2399  ;;  %v743_v2 = vmul.f32 %v2398_v56, %v741_v58 }
 0xc7f   :  { %v736_v59 = vadd.f32 1.0, %v2400_v53 }
 0xc80   :  { %746 = vrot.lane.b32.xlu0 %v744_v57, %s2514_s21 }
 0xc81   :  { %2401 = vrcp.f32 %v736_v59 }
 0xc8b   :  { %v2402_v12 = vpop.eup %2401 }
 0xcf2   :  { %v747_v60 = vpop.permute.xlu0 %746 }
 0xcf3   :  { %v749_v61 = vadd.f32 %v747_v60, %v743_v2 }
 0xcf5   :  { %2403 = vtanh.f32 %v749_v61  ;;  %760 = vrot.lane.b32.xlu0 %v749_v61, %s2514_s21 }
 0xcff   :  { %v2404_v13 = vpop.eup %2403 }
 0xd00   :  { %v751_v7 = vmul.f32 %v2404_v13, %v2402_v12 }
 0xd02   :  { %755 = vrot.lane.b32.xlu1 %v751_v7, %s2514_s21 }
 0xd67   :  { %v761_v20 = vpop.permute.xlu0 %760 }
 0xd68   :  { %v763_v21 = vsel %vm753_vm13, %v761_v20, %v2869_v35  ;;  %v1158_v35 = vpack.c.bf16 %v1157_v34, %v1157_v34 }
 0xd69   :  { %832 = vrot.lane.b32.xlu1 %v763_v21, %s2514_s21 }
 0xd74   :  { %v756_v23 = vpop.permute.xlu1 %755 }
 0xd75   :  { %v2958_v24 = vsel %vm753_vm13, %v756_v23, %v2876_v37  ;;  %v814_v37 = vunpack.c.l.bf16 %v768_v36 }
 0xd76   :  { %764 = vst.msk [vmem:[#allocation2 + $0x30] sm:$0xff] %vm197_vm5, %v2958_v24  ;;  %v769_v25 = vpack.c.bf16 %v2958_v24, %v2958_v24 }
 0xd77   :  { %765 = vst.msk [vmem:[#allocation2 + $0x8] sm:$0xff] %vm200_vm6, %v2958_v24 }
 0xd78   :  { %2172 = vmatmul.mubr.msk.bf16.vlgmr.msra.gmra.mrb[12].mxu1 %vm111_vm7, %v769_v25 }
 0xd79   :  { %967 = vmatpush1.bf16.msra.mxu1 %v2900_v3  ;;  %998 = vmatprep.mubr.bf16.mxu1 %v2513_v1 }
 0xd7a   :  { %968 = vmatprep.subr.bf16.mxu1 %v2908_v11 }
 0xd7d   :  { %969 = vmatpush1.bf16.msra.mxu1 %v2913_v4 }
 0xd7e   :  { %970 = vmatprep.subr.bf16.mxu1 %v2920_v5  ;;  %v961_v26 = vld [vmem:[#allocation2 + $0x8] sm:$0xff] }
 0xd7f   :  { %v962_v27 = vpack.c.bf16 %v961_v26, %v961_v26 }
 0xd81   :  { %971 = vmatpush1.bf16.msra.mxu1 %v2925_v6 }
 0xd82   :  { %972 = vmatprep.subr.bf16.mxu1 %v2932_v8 }
 0xd85   :  { %973 = vmatpush1.bf16.msra.mxu1 %v2938_v19 }
 0xd86   :  { %1064 = vmatprep.subr.bf16.mxu1 %v2895_v63 }
 0xd88   :  { %2184 = vmatmul.mubr.msk.bf16.vlgmr.msra.gmra.mrb[16].mxu1 %vm111_vm7, %v962_v27  ;;  %v3026_v27 = vld [vmem:[%s3459_s2 + $0x44] ss:$8 sps:$4 sm:$0xff]  }
 0xd89   :  { %1065 = vmatpush1.bf16.msra.mxu1 %v2900_v3  ;;  %1096 = vmatprep.mubr.bf16.mxu1 %v2513_v1 }
 0xd8a   :  { %1066 = vmatprep.subr.bf16.mxu1 %v2908_v11 }
 0xd8d   :  { %1067 = vmatpush1.bf16.msra.mxu1 %v2913_v4 }
 0xd8e   :  { %1068 = vmatprep.subr.bf16.mxu1 %v2920_v5 }
 0xd91   :  { %1069 = vmatpush1.bf16.msra.mxu1 %v2925_v6 }
 0xd92   :  { %1070 = vmatprep.subr.bf16.mxu1 %v2932_v8 }
 0xd95   :  { %1071 = vmatpush1.bf16.msra.mxu1 %v2938_v19 }
 0xd96   :  { %1162 = vmatprep.subr.bf16.mxu1 %v2895_v63 }
 0xd98   :  { %2186 = vmatmul.mubr.msk.bf16.vlgmr.msra.gmra.mrb[20].mxu1 %vm111_vm7, %v1060_v31 }
 0xd99   :  { %1163 = vmatpush1.bf16.msra.mxu1 %v2900_v3  ;;  %1194 = vmatprep.mubr.bf16.mxu1 %v2513_v1 }
 0xd9a   :  { %1164 = vmatprep.subr.bf16.mxu1 %v2908_v11 }
 0xd9d   :  { %1165 = vmatpush1.bf16.msra.mxu1 %v2913_v4 }
 0xd9e   :  { %1166 = vmatprep.subr.bf16.mxu1 %v2920_v5 }
 0xda1   :  { %1167 = vmatpush1.bf16.msra.mxu1 %v2925_v6 }
 0xda2   :  { %1168 = vmatprep.subr.bf16.mxu1 %v2932_v8 }
 0xda5   :  { %1169 = vmatpush1.bf16.msra.mxu1 %v2938_v19 }
 0xda6   :  { %1260 = vmatprep.subr.bf16.mxu1 %v2895_v63 }
 0xda8   :  { %2188 = vmatmul.mubr.msk.bf16.vlgmr.msra.gmra.mrb[24].mxu1 %vm111_vm7, %v1158_v35 }
 0xda9   :  { %1261 = vmatpush1.bf16.msra.mxu1 %v2900_v3  ;;  %1292 = vmatprep.mubr.bf16.mxu1 %v2513_v1 }
 0xdaa   :  { %1262 = vmatprep.subr.bf16.mxu1 %v2908_v11 }
 0xdad   :  { %1263 = vmatpush1.bf16.msra.mxu1 %v2913_v4 }
 0xdae   :  { %1264 = vmatprep.subr.bf16.mxu1 %v2920_v5 }
 0xdb1   :  { %1265 = vmatpush1.bf16.msra.mxu1 %v2925_v6 }
 0xdb2   :  { %1266 = vmatprep.subr.bf16.mxu1 %v2932_v8 }
 0xdb5   :  { %1267 = vmatpush1.bf16.msra.mxu1 %v2938_v19 }
 0xdb6   :  { %1444 = vmatprep.subr.bf16.mxu1 %v3026_v27 }
 0xddb   :  { %v833_v13 = vpop.permute.xlu1 %832 }
 0xe4b   :  { %v807_v40 = vpop.f32.mrb[12].mxu1 }
 0xe4c   :  { %v816_v28 = vadd.f32 %v814_v37, %v807_v40  ;;  %v809_v29 = vpop.f32.mrb[13].mxu1 }
 0xe4d   :  { %v811_v0 = vpop.f32.mrb[14].mxu1  ;;  %v817_v45 = vadd.f32 %v815_v43, %v809_v29  ;;  %v3069_v29 = vld [vmem:[%s3459_s2 + $0x64] ss:$8 sps:$4 sm:$0xff]   ;;  %v3091_v43 = vld [vmem:[%s3459_s2 + $0x70] ss:$8 sps:$4 sm:$0xff]  }
 0xe4e   :  { %v2173_v41 = vmul.f32 -1.442695, %v816_v28  ;;  %v812_v42 = vpop.f32.mrb[15].mxu1  ;;  %v3063_v28 = vld [vmem:[%s3459_s2 + $0x50] ss:$8 sps:$4 sm:$0xff]  }
 0xe4f   :  { %v2174_v61 = vmul.f32 -1.442695, %v817_v45  ;;  %v3077_v0 = vld [vmem:[%s3459_s2 + $0x60] ss:$8 sps:$4 sm:$0xff]   ;;  %v1010_v42 = vld [vmem:[#allocation2 + $0x10] sm:$0xff] }
 0xe50   :  { %2405 = vpow2.f32 %v2173_v41  ;;  %v3083_v41 = vld [vmem:[%s3459_s2 + $0x74] ss:$8 sps:$4 sm:$0xff]  }
 0xe51   :  { %2407 = vtanh.f32 %v817_v45  ;;  %v1011_v45 = vpack.c.bf16 %v1010_v42, %v1010_v42 }
 0xe5a   :  { %v2406_v47 = vpop.eup %2405 }
 0xe5b   :  { %v821_v48 = vadd.f32 1.0, %v2406_v47  ;;  %v3009_v49 = vpop.f32.mrb[16].mxu1  ;;  %v2408_v17 = vpop.eup %2407  ;;  %v1108_v47 = vld [vmem:[#allocation2 + $0x20] sm:$0xff] }
 0xe5c   :  { %v3011_v50 = vpop.f32.mrb[17].mxu1 }
 0xe5d   :  { %2409 = vrcp.f32 %v821_v48  ;;  %v1004_v18 = vpop.f32.mrb[18].mxu1  ;;  %v1109_v48 = vpack.c.bf16 %v1108_v47, %v1108_v47 }
 0xe5e   :  { %v1005_v16 = vpop.f32.mrb[19].mxu1  ;;  %2411 = vpow2.f32 %v2174_v61  ;;  %v1206_v18 = vld [vmem:[#allocation2 + $0x30] sm:$0xff] }
 0xe67   :  { %v2410_v54 = vpop.eup %2409 }
 0xe68   :  { %v836_v55 = vmul.f32 %v2410_v54, %v2408_v17  ;;  %v2412_v12 = vpop.eup %2411  ;;  %v835_v38 = vmul.f32 %v2410_v54, %v833_v13 }
 0xe69   :  { %v828_v7 = vadd.f32 1.0, %v2412_v12 }
 0xe6a   :  { %838 = vrot.lane.b32.xlu0 %v836_v55, %s2514_s21 }
 0xe6b   :  { %v3014_v56 = vpop.f32.mrb[20].mxu1  ;;  %2413 = vrcp.f32 %v828_v7 }
 0xe6c   :  { %v3016_v57 = vpop.f32.mrb[21].mxu1 }
 0xe6d   :  { %v1102_v52 = vpop.f32.mrb[22].mxu1 }
 0xe6e   :  { %v1103_v53 = vpop.f32.mrb[23].mxu1 }
 0xe75   :  { %v2414_v23 = vpop.eup %2413 }
 0xe7b   :  { %v3018_v58 = vpop.f32.mrb[24].mxu1 }
 0xe7c   :  { %v3020_v59 = vpop.f32.mrb[25].mxu1 }
 0xe7d   :  { %v1200_v2 = vpop.f32.mrb[26].mxu1 }
 0xe7e   :  { %v1201_v60 = vpop.f32.mrb[27].mxu1 }
 0xedc   :  { %v839_v20 = vpop.permute.xlu0 %838 }
 0xedd   :  { %v841_v21 = vadd.f32 %v839_v20, %v835_v38 }
 0xedf   :  { %2415 = vtanh.f32 %v841_v21 }
 0xee9   :  { %v2416_v25 = vpop.eup %2415 }
 0xeea   :  { %v843_v26 = vmul.f32 %v2416_v25, %v2414_v23 }
 0xeec   :  { %847 = vrot.lane.b32.xlu1 %v843_v26, %s2514_s21 }
 0xf5e   :  { %v848_v31 = vpop.permute.xlu1 %847 }
 0xf5f   :  { %v850_v34 = vsel %vm845_vm14, %v848_v31, %v2958_v24  ;;  %v3054_v24 = vld [vmem:[%s3459_s2 + $0x54] ss:$8 sps:$4 sm:$0xff]  }
 0xf60   :  { %851 = vst.msk [vmem:[#allocation2 + $0x38] sm:$0xff] %vm197_vm5, %v850_v34 }
 0xf61   :  { %852 = vst.msk [vmem:[#allocation2] sm:$0xff] %vm200_vm6, %v850_v34 }
 0xf67   :  { %v1255_v36 = vld [vmem:[#allocation2 + $0x38] sm:$0xff] }
 0xf68   :  { %v862_v35 = vld [vmem:[#allocation2] sm:$0xff]  ;;  %v1256_v40 = vpack.c.bf16 %v1255_v36, %v1255_v36 }
 0xf69   :  { %v863_v37 = vpack.c.bf16 %v862_v35, %v862_v35 }
 0xf6a   :  { %2190 = vmatmul.mubr.msk.bf16.vlgmr.msra.gmra.mrb[28].mxu1 %vm111_vm7, %v1256_v40 }
 0xf6b   :  { %2183 = vmatmul.mubr.msk.bf16.vlgmr.msra.gmra.mrb[16].mxu0 %vm111_vm7, %v863_v37  ;;  %1445 = vmatpush1.bf16.msra.mxu1 %v3047_v10 }
 0xf6c   :  { %1016 = vmatpush1.bf16.msra.mxu0 %v2900_v3  ;;  %1047 = vmatprep.mubr.bf16.mxu0 %v2513_v1 }
 0xf6d   :  { %1017 = vmatprep.subr.bf16.mxu0 %v2908_v11  ;;  %1446 = vmatprep.subr.bf16.mxu1 %v3054_v24 }
 0xf6e   :  { %1476 = vmatprep.mubr.bf16.mxu1 %v2513_v1 }
 0xf6f   :  { %1447 = vmatpush1.bf16.msra.mxu1 %v3063_v28 }
 0xf70   :  { %1018 = vmatpush1.bf16.msra.mxu0 %v2913_v4  ;;  %1448 = vmatprep.subr.bf16.mxu1 %v3069_v29 }
 0xf71   :  { %1019 = vmatprep.subr.bf16.mxu0 %v2920_v5 }
 0xf73   :  { %1449 = vmatpush1.bf16.msra.mxu1 %v3077_v0 }
 0xf74   :  { %1020 = vmatpush1.bf16.msra.mxu0 %v2925_v6  ;;  %1450 = vmatprep.subr.bf16.mxu1 %v3083_v41 }
 0xf75   :  { %1021 = vmatprep.subr.bf16.mxu0 %v2932_v8 }
 0xf77   :  { %1451 = vmatpush1.bf16.msra.mxu1 %v3091_v43 }
 0xf78   :  { %1022 = vmatpush1.bf16.msra.mxu0 %v2938_v19  ;;  %1622 = vmatprep.subr.bf16.mxu1 %v3026_v27 }
 0xf79   :  { %1113 = vmatprep.subr.bf16.mxu0 %v2895_v63 }
 0xf7b   :  { %2185 = vmatmul.mubr.msk.bf16.vlgmr.msra.gmra.mrb[20].mxu0 %vm111_vm7, %v1011_v45 }
 0xf7c   :  { %1114 = vmatpush1.bf16.msra.mxu0 %v2900_v3  ;;  %1145 = vmatprep.mubr.bf16.mxu0 %v2513_v1 }
 0xf7d   :  { %1115 = vmatprep.subr.bf16.mxu0 %v2908_v11 }
 0xf80   :  { %1116 = vmatpush1.bf16.msra.mxu0 %v2913_v4 }
 0xf81   :  { %1117 = vmatprep.subr.bf16.mxu0 %v2920_v5 }
 0xf84   :  { %1118 = vmatpush1.bf16.msra.mxu0 %v2925_v6 }
 0xf85   :  { %1119 = vmatprep.subr.bf16.mxu0 %v2932_v8 }
 0xf88   :  { %1120 = vmatpush1.bf16.msra.mxu0 %v2938_v19 }
 0xf89   :  { %1211 = vmatprep.subr.bf16.mxu0 %v2895_v63  ;;  %v1207_v63 = vpack.c.bf16 %v1206_v18, %v1206_v18 }
 0xf8b   :  { %2187 = vmatmul.mubr.msk.bf16.vlgmr.msra.gmra.mrb[24].mxu0 %vm111_vm7, %v1109_v48 }
 0xf8c   :  { %1212 = vmatpush1.bf16.msra.mxu0 %v2900_v3  ;;  %1243 = vmatprep.mubr.bf16.mxu0 %v2513_v1  ;;  %v866_v3 = vshrl.u32 %v28_v9, 7 }
 0xf8d   :  { %1213 = vmatprep.subr.bf16.mxu0 %v2908_v11 }
 0xf8e   :  { %v867_v11 = vsub.s32 0, %v866_v3 }
 0xf90   :  { %1214 = vmatpush1.bf16.msra.mxu0 %v2913_v4  ;;  %v861_v4 = vld [vmem:[%s3463_s4] sm:$0x3] }
 0xf91   :  { %1215 = vmatprep.subr.bf16.mxu0 %v2920_v5  ;;  %v871_v5 = vsub.s32 1, %v866_v3 }
 0xf94   :  { %1216 = vmatpush1.bf16.msra.mxu0 %v2925_v6  ;;  %v868_v6 = vrot.slane %v861_v4, %v867_v11 }
 0xf95   :  { %1217 = vmatprep.subr.bf16.mxu0 %v2932_v8  ;;  %v872_v8 = vrot.slane %v861_v4, %v871_v5 }
 0xf96   :  { %v3166_v23 = vadd.f32 %v3018_v58, %v868_v6  ;;  %v3192_v45 = vadd.f32 %v3014_v56, %v868_v6 }
 0xf97   :  { %v3171_v31 = vadd.f32 %v3020_v59, %v872_v8  ;;  %v3197_v18 = vadd.f32 %v3016_v57, %v872_v8 }
 0xf98   :  { %1218 = vmatpush1.bf16.msra.mxu0 %v2938_v19 }
 0xf99   :  { %1359 = vmatprep.subr.bf16.mxu0 %v3026_v27 }
 0xf9b   :  { %2189 = vmatmul.mubr.msk.bf16.vlgmr.msra.gmra.mrb[28].mxu0 %vm111_vm7, %v1207_v63 }
 0xf9c   :  { %1360 = vmatpush1.bf16.msra.mxu0 %v3047_v10  ;;  %1391 = vmatprep.mubr.bf16.mxu0 %v2513_v1 }
 0xf9d   :  { %1361 = vmatprep.subr.bf16.mxu0 %v3054_v24 }
 0xfa0   :  { %1362 = vmatpush1.bf16.msra.mxu0 %v3063_v28 }
 0xfa1   :  { %1363 = vmatprep.subr.bf16.mxu0 %v3069_v29 }
 0xfa4   :  { %1364 = vmatpush1.bf16.msra.mxu0 %v3077_v0 }
 0xfa5   :  { %1365 = vmatprep.subr.bf16.mxu0 %v3083_v41 }
 0xfa8   :  { %1366 = vmatpush1.bf16.msra.mxu0 %v3091_v43 }
 0xfa9   :  { %1533 = vmatprep.subr.bf16.mxu0 %v3026_v27 }
 0xfab   :  { %1392 = vmatmul.mubr.bf16.vlgmr.msra.gmra.mrb[32].mxu0 %v2513_v1 }
 0xfac   :  { %1534 = vmatpush1.bf16.msra.mxu0 %v3047_v10  ;;  %1565 = vmatprep.mubr.bf16.mxu0 %v2513_v1 }
 0xfad   :  { %1535 = vmatprep.subr.bf16.mxu0 %v3054_v24 }
 0xfb0   :  { %1536 = vmatpush1.bf16.msra.mxu0 %v3063_v28 }
 0xfb1   :  { %1537 = vmatprep.subr.bf16.mxu0 %v3069_v29 }
 0xfb4   :  { %1538 = vmatpush1.bf16.msra.mxu0 %v3077_v0 }
 0xfb5   :  { %1539 = vmatprep.subr.bf16.mxu0 %v3083_v41 }
 0xfb8   :  { %1540 = vmatpush1.bf16.msra.mxu0 %v3091_v43 }
 0xfb9   :  { %1707 = vmatprep.subr.bf16.mxu0 %v3026_v27 }
0x103d   :  { %v1294_v16 = vpop.f32.mrb[28].mxu1 }
0x103e   :  { %v952_v19 = vpop.f32.mrb[16].mxu0  ;;  %v3143_v54 = vadd.f32 %v1294_v16, %v868_v6  ;;  %v1296_v52 = vpop.f32.mrb[29].mxu1  ;;  %v3218_v16 = vadd.f32 %v3009_v49, %v868_v6 }
0x103f   :  { %v3141_v17 = vadd.f32 %v952_v19, %v868_v6  ;;  %v954_v55 = vpop.f32.mrb[17].mxu0  ;;  %v3147_v2 = vadd.f32 %v1296_v52, %v872_v8  ;;  %v1298_v60 = vpop.f32.mrb[30].mxu1 }
0x1040   :  { %v3145_v53 = vadd.f32 %v954_v55, %v872_v8  ;;  %v956_v9 = vpop.f32.mrb[18].mxu0  ;;  %v1299_v12 = vpop.f32.mrb[31].mxu1 }
0x1041   :  { %v957_v61 = vpop.f32.mrb[19].mxu0  ;;  %v1317_v13 = vsel %vm2641_vm0, %v3141_v17, %v3143_v54  ;;  %v3223_v9 = vadd.f32 %v3011_v50, %v872_v8 }
0x1042   :  { %v1318_v38 = vsel %vm2645_vm1, %v3145_v53, %v3147_v2 }
0x104e   :  { %v1049_v21 = vpop.f32.mrb[20].mxu0 }
0x104f   :  { %v3168_v25 = vadd.f32 %v1049_v21, %v868_v6  ;;  %v1051_v26 = vpop.f32.mrb[21].mxu0 }
0x1050   :  { %v3173_v34 = vadd.f32 %v1051_v26, %v872_v8  ;;  %v1053_v35 = vpop.f32.mrb[22].mxu0 }
0x1051   :  { %v1054_v36 = vpop.f32.mrb[23].mxu0  ;;  %v1527_v37 = vsel %vm2641_vm0, %v3168_v25, %v3166_v23  ;;  %v1786_v58 = vsel %vm2641_vm0, %v3166_v23, %v3168_v25 }
0x1052   :  { %v1528_v59 = vsel %vm2645_vm1, %v3173_v34, %v3171_v31  ;;  %v1787_v40 = vsel %vm2645_vm1, %v3171_v31, %v3173_v34 }
0x105e   :  { %v1147_v42 = vpop.f32.mrb[24].mxu0 }
0x105f   :  { %v3194_v47 = vadd.f32 %v1147_v42, %v868_v6  ;;  %v1149_v48 = vpop.f32.mrb[25].mxu0 }
0x1060   :  { %v3199_v63 = vadd.f32 %v1149_v48, %v872_v8  ;;  %v1151_v3 = vpop.f32.mrb[26].mxu0 }
0x1061   :  { %v1152_v11 = vpop.f32.mrb[27].mxu0  ;;  %v1616_v4 = vsel %vm2641_vm0, %v3192_v45, %v3194_v47  ;;  %v1701_v56 = vsel %vm2641_vm0, %v3194_v47, %v3192_v45 }
0x1062   :  { %v1617_v57 = vsel %vm2645_vm1, %v3197_v18, %v3199_v63  ;;  %v1702_v5 = vsel %vm2645_vm1, %v3199_v63, %v3197_v18 }
0x106e   :  { %v1245_v19 = vpop.f32.mrb[28].mxu0 }
0x106f   :  { %v3220_v55 = vadd.f32 %v1245_v19, %v868_v6  ;;  %v1247_v52 = vpop.f32.mrb[29].mxu0 }
0x1070   :  { %v3225_v60 = vadd.f32 %v1247_v52, %v872_v8  ;;  %v1249_v61 = vpop.f32.mrb[30].mxu0 }
0x1071   :  { %v1250_v12 = vpop.f32.mrb[31].mxu0  ;;  %v1438_v21 = vsel %vm2641_vm0, %v3218_v16, %v3220_v55  ;;  %v1871_v49 = vsel %vm2641_vm0, %v3220_v55, %v3218_v16 }
0x1072   :  { %v1439_v50 = vsel %vm2645_vm1, %v3223_v9, %v3225_v60 }
0x107e   :  { %v1393_v8 = vpop.f32.mrb[32].mxu0 }
0x107f   :  { %v1400_v26 = vadd.f32 %v1393_v8, %v1317_v13  ;;  %v1395_v35 = vpop.f32.mrb[33].mxu0 }
0x1080   :  { %v1401_v36 = vadd.f32 %v1395_v35, %v1318_v38  ;;  %v1397_v42 = vpop.f32.mrb[34].mxu0 }
0x1081   :  { %v2207_v48 = vmul.f32 -1.442695, %v1400_v26  ;;  %v1398_v3 = vpop.f32.mrb[35].mxu0 }
0x1082   :  { %v2208_v20 = vmul.f32 -1.442695, %v1401_v36 }
0x1083   :  { %2417 = vpow2.f32 %v2207_v48 }
0x1084   :  { %2419 = vtanh.f32 %v1401_v36 }
0x108d   :  { %v2418_v11 = vpop.eup %2417 }
0x108e   :  { %v1405_v19 = vadd.f32 1.0, %v2418_v11  ;;  %v2420_v52 = vpop.eup %2419 }
0x1090   :  { %2421 = vrcp.f32 %v1405_v19 }
0x1091   :  { %2423 = vpow2.f32 %v2208_v20 }
0x109a   :  { %v2422_v61 = vpop.eup %2421 }
0x109b   :  { %v1416_v12 = vmul.f32 %v2422_v61, %v2420_v52  ;;  %v2424_v7 = vpop.eup %2423  ;;  %v1415_v13 = vmul.f32 0.0, %v2422_v61 }
0x109c   :  { %v1412_v6 = vadd.f32 1.0, %v2424_v7 }
0x109d   :  { %1418 = vrot.lane.b32.xlu0 %v1416_v12, %s2514_s21 }
0x109e   :  { %2425 = vrcp.f32 %v1412_v6 }
0x10a8   :  { %v2426_v26 = vpop.eup %2425 }
0x110f   :  { %v1419_v8 = vpop.permute.xlu0 %1418 }
0x1110   :  { %v1421_v38 = vadd.f32 %v1419_v8, %v1415_v13 }
0x1112   :  { %2427 = vtanh.f32 %v1421_v38  ;;  %1430 = vrot.lane.b32.xlu0 %v1421_v38, %s2514_s21 }
0x111c   :  { %v2428_v35 = vpop.eup %2427 }
0x111d   :  { %v1423_v42 = vmul.f32 %v2428_v35, %v2426_v26 }
0x111f   :  { %1425 = vrot.lane.b32.xlu1 %v1423_v42, %s2514_s21 }
0x1184   :  { %v1431_v48 = vpop.permute.xlu0 %1430 }
0x1185   :  { %v1433_v36 = vsel %vm186_vm4, %v1431_v48, 0.0 }
0x1186   :  { %1501 = vrot.lane.b32.xlu1 %v1433_v36, %s2514_s21 }
0x1191   :  { %v1426_v7 = vpop.permute.xlu1 %1425 }
0x1192   :  { %v1428_v20 = vsel %vm186_vm4, %v1426_v7, 0.0 }
0x1193   :  { %v1440_v6 = vpack.c.bf16 %v1428_v20, %v1428_v20 }
0x1195   :  { %2209 = vmatmul.mubr.msk.bf16.vlgmr.msra.gmra.mrb[32].mxu1 %vm111_vm7, %v1440_v6 }
0x1196   :  { %1623 = vmatpush1.bf16.msra.mxu1 %v3047_v10  ;;  %1654 = vmatprep.mubr.bf16.mxu1 %v2513_v1 }
0x1197   :  { %1624 = vmatprep.subr.bf16.mxu1 %v3054_v24 }
0x119a   :  { %1625 = vmatpush1.bf16.msra.mxu1 %v3063_v28 }
0x119b   :  { %1626 = vmatprep.subr.bf16.mxu1 %v3069_v29 }
0x119e   :  { %1627 = vmatpush1.bf16.msra.mxu1 %v3077_v0 }
0x119f   :  { %1628 = vmatprep.subr.bf16.mxu1 %v3083_v41 }
0x11a2   :  { %1629 = vmatpush1.bf16.msra.mxu1 %v3091_v43 }
0x11a3   :  { %1792 = vmatprep.subr.bf16.mxu1 %v3026_v27 }
0x11f8   :  { %v1502_v7 = vpop.permute.xlu1 %1501 }
0x1268   :  { %v1478_v46 = vpop.f32.mrb[32].mxu1 }
0x1269   :  { %v1485_v3 = vadd.f32 %v1478_v46, %v1438_v21  ;;  %v1480_v11 = vpop.f32.mrb[33].mxu1 }
0x126a   :  { %v1486_v19 = vadd.f32 %v1480_v11, %v1439_v50  ;;  %v1482_v52 = vpop.f32.mrb[34].mxu1 }
0x126b   :  { %v2210_v61 = vmul.f32 -1.442695, %v1485_v3  ;;  %v1483_v12 = vpop.f32.mrb[35].mxu1 }
0x126c   :  { %v2211_v42 = vmul.f32 -1.442695, %v1486_v19 }
0x126d   :  { %2429 = vpow2.f32 %v2210_v61 }
0x126e   :  { %2431 = vtanh.f32 %v1486_v19 }
0x1277   :  { %v2430_v13 = vpop.eup %2429 }
0x1278   :  { %v1490_v8 = vadd.f32 1.0, %v2430_v13  ;;  %v2432_v38 = vpop.eup %2431 }
0x127a   :  { %2433 = vrcp.f32 %v1490_v8 }
0x127b   :  { %2435 = vpow2.f32 %v2211_v42 }
0x1284   :  { %v2434_v26 = vpop.eup %2433 }
0x1285   :  { %v1505_v35 = vmul.f32 %v2434_v26, %v2432_v38  ;;  %v2436_v48 = vpop.eup %2435  ;;  %v1504_v6 = vmul.f32 %v2434_v26, %v1502_v7 }
0x1286   :  { %v1497_v21 = vadd.f32 1.0, %v2436_v48 }
0x1287   :  { %1507 = vrot.lane.b32.xlu0 %v1505_v35, %s2514_s21 }
0x1288   :  { %2437 = vrcp.f32 %v1497_v21 }
0x1292   :  { %v2438_v3 = vpop.eup %2437 }
0x12f9   :  { %v1508_v50 = vpop.permute.xlu0 %1507 }
0x12fa   :  { %v1510_v46 = vadd.f32 %v1508_v50, %v1504_v6 }
0x12fc   :  { %2439 = vtanh.f32 %v1510_v46  ;;  %1519 = vrot.lane.b32.xlu0 %v1510_v46, %s2514_s21 }
0x1306   :  { %v2440_v11 = vpop.eup %2439 }
0x1307   :  { %v1512_v52 = vmul.f32 %v2440_v11, %v2438_v3 }
0x1309   :  { %1514 = vrot.lane.b32.xlu1 %v1512_v52, %s2514_s21 }
0x136e   :  { %v1520_v61 = vpop.permute.xlu0 %1519 }
0x136f   :  { %v1522_v19 = vsel %vm283_vm8, %v1520_v61, %v1433_v36 }
0x1370   :  { %1590 = vrot.lane.b32.xlu1 %v1522_v19, %s2514_s21 }
0x137b   :  { %v1515_v12 = vpop.permute.xlu1 %1514 }
0x137c   :  { %v1517_v13 = vsel %vm283_vm8, %v1515_v12, %v1428_v20 }
0x137d   :  { %v1529_v8 = vpack.c.bf16 %v1517_v13, %v1517_v13 }
0x137f   :  { %2212 = vmatmul.mubr.msk.bf16.vlgmr.msra.gmra.mrb[36].mxu0 %vm111_vm7, %v1529_v8 }
0x1380   :  { %1708 = vmatpush1.bf16.msra.mxu0 %v3047_v10  ;;  %1739 = vmatprep.mubr.bf16.mxu0 %v2513_v1 }
0x1381   :  { %1709 = vmatprep.subr.bf16.mxu0 %v3054_v24 }
0x1384   :  { %1710 = vmatpush1.bf16.msra.mxu0 %v3063_v28 }
0x1385   :  { %1711 = vmatprep.subr.bf16.mxu0 %v3069_v29 }
0x1388   :  { %1712 = vmatpush1.bf16.msra.mxu0 %v3077_v0 }
0x1389   :  { %1713 = vmatprep.subr.bf16.mxu0 %v3083_v41 }
0x138c   :  { %1714 = vmatpush1.bf16.msra.mxu0 %v3091_v43 }
0x138d   :  { %1877 = vmatprep.subr.bf16.mxu0 %v3026_v27 }
0x13e2   :  { %v1591_v3 = vpop.permute.xlu1 %1590 }
0x1452   :  { %v1567_v32 = vpop.f32.mrb[36].mxu0 }
0x1453   :  { %v1574_v36 = vadd.f32 %v1567_v32, %v1527_v37  ;;  %v1569_v20 = vpop.f32.mrb[37].mxu0 }
0x1454   :  { %v1575_v38 = vadd.f32 %v1569_v20, %v1528_v59  ;;  %v1571_v26 = vpop.f32.mrb[38].mxu0 }
0x1455   :  { %v2213_v35 = vmul.f32 -1.442695, %v1574_v36  ;;  %v1572_v42 = vpop.f32.mrb[39].mxu0 }
0x1456   :  { %v2214_v37 = vmul.f32 -1.442695, %v1575_v38 }
0x1457   :  { %2441 = vpow2.f32 %v2213_v35 }
0x1458   :  { %2443 = vtanh.f32 %v1575_v38 }
0x1461   :  { %v2442_v48 = vpop.eup %2441 }
0x1462   :  { %v1579_v7 = vadd.f32 1.0, %v2442_v48  ;;  %v2444_v21 = vpop.eup %2443 }
0x1464   :  { %2445 = vrcp.f32 %v1579_v7 }
0x1465   :  { %2447 = vpow2.f32 %v2214_v37 }
0x146e   :  { %v2446_v6 = vpop.eup %2445 }
0x146f   :  { %v1594_v50 = vmul.f32 %v2446_v6, %v2444_v21  ;;  %v2448_v46 = vpop.eup %2447  ;;  %v1593_v52 = vmul.f32 %v2446_v6, %v1591_v3 }
0x1470   :  { %v1586_v11 = vadd.f32 1.0, %v2448_v46 }
0x1471   :  { %1596 = vrot.lane.b32.xlu0 %v1594_v50, %s2514_s21 }
0x1472   :  { %2449 = vrcp.f32 %v1586_v11 }
0x147c   :  { %v2450_v12 = vpop.eup %2449 }
0x14e3   :  { %v1597_v59 = vpop.permute.xlu0 %1596 }
0x14e4   :  { %v1599_v61 = vadd.f32 %v1597_v59, %v1593_v52 }
0x14e6   :  { %2451 = vtanh.f32 %v1599_v61  ;;  %1608 = vrot.lane.b32.xlu0 %v1599_v61, %s2514_s21 }
0x14f0   :  { %v2452_v8 = vpop.eup %2451 }
0x14f1   :  { %v1601_v32 = vmul.f32 %v2452_v8, %v2450_v12 }
0x14f3   :  { %1603 = vrot.lane.b32.xlu1 %v1601_v32, %s2514_s21 }
0x1558   :  { %v1609_v36 = vpop.permute.xlu0 %1608 }
0x1559   :  { %v1611_v20 = vsel %vm379_vm9, %v1609_v36, %v1522_v19 }
0x155a   :  { %1679 = vrot.lane.b32.xlu1 %v1611_v20, %s2514_s21 }
0x1565   :  { %v1604_v38 = vpop.permute.xlu1 %1603 }
0x1566   :  { %v1606_v26 = vsel %vm379_vm9, %v1604_v38, %v1517_v13 }
0x1567   :  { %v1618_v35 = vpack.c.bf16 %v1606_v26, %v1606_v26 }
0x1569   :  { %2215 = vmatmul.mubr.msk.bf16.vlgmr.msra.gmra.mrb[36].mxu1 %vm111_vm7, %v1618_v35 }
0x156a   :  { %1793 = vmatpush1.bf16.msra.mxu1 %v3047_v10  ;;  %1824 = vmatprep.mubr.bf16.mxu1 %v2513_v1 }
0x156b   :  { %1794 = vmatprep.subr.bf16.mxu1 %v3054_v24 }
0x156e   :  { %1795 = vmatpush1.bf16.msra.mxu1 %v3063_v28 }
0x156f   :  { %1796 = vmatprep.subr.bf16.mxu1 %v3069_v29 }
0x1572   :  { %1797 = vmatpush1.bf16.msra.mxu1 %v3077_v0 }
0x1573   :  { %1798 = vmatprep.subr.bf16.mxu1 %v3083_v41 }
0x1576   :  { %1799 = vmatpush1.bf16.msra.mxu1 %v3091_v43 }
0x1577   :  { %1962 = vmatprep.subr.bf16.mxu1 %v3026_v27 }
0x15cc   :  { %v1680_v11 = vpop.permute.xlu1 %1679 }
0x163c   :  { %v1656_v22 = vpop.f32.mrb[36].mxu1 }
0x163d   :  { %v1663_v19 = vadd.f32 %v1656_v22, %v1616_v4  ;;  %v1658_v13 = vpop.f32.mrb[37].mxu1 }
0x163e   :  { %v1664_v42 = vadd.f32 %v1658_v13, %v1617_v57  ;;  %v1660_v48 = vpop.f32.mrb[38].mxu1 }
0x163f   :  { %v2216_v7 = vmul.f32 -1.442695, %v1663_v19  ;;  %v1661_v21 = vpop.f32.mrb[39].mxu1 }
0x1640   :  { %v2217_v4 = vmul.f32 -1.442695, %v1664_v42 }
0x1641   :  { %2453 = vpow2.f32 %v2216_v7 }
0x1642   :  { %2455 = vtanh.f32 %v1664_v42 }
0x164b   :  { %v2454_v6 = vpop.eup %2453 }
0x164c   :  { %v1668_v27 = vadd.f32 1.0, %v2454_v6  ;;  %v2456_v50 = vpop.eup %2455 }
0x164e   :  { %2457 = vrcp.f32 %v1668_v27 }
0x164f   :  { %2459 = vpow2.f32 %v2217_v4 }
0x1658   :  { %v2458_v37 = vpop.eup %2457 }
0x1659   :  { %v1683_v46 = vmul.f32 %v2458_v37, %v2456_v50  ;;  %v2460_v3 = vpop.eup %2459  ;;  %v1682_v59 = vmul.f32 %v2458_v37, %v1680_v11 }
0x165a   :  { %v1675_v52 = vadd.f32 1.0, %v2460_v3 }
0x165b   :  { %1685 = vrot.lane.b32.xlu0 %v1683_v46, %s2514_s21 }
0x165c   :  { %2461 = vrcp.f32 %v1675_v52 }
0x1666   :  { %v2462_v12 = vpop.eup %2461 }
0x16cd   :  { %v1686_v57 = vpop.permute.xlu0 %1685 }
0x16ce   :  { %v1688_v61 = vadd.f32 %v1686_v57, %v1682_v59 }
0x16d0   :  { %2463 = vtanh.f32 %v1688_v61  ;;  %1697 = vrot.lane.b32.xlu0 %v1688_v61, %s2514_s21 }
0x16da   :  { %v2464_v8 = vpop.eup %2463 }
0x16db   :  { %v1690_v32 = vmul.f32 %v2464_v8, %v2462_v12 }
0x16dd   :  { %1692 = vrot.lane.b32.xlu1 %v1690_v32, %s2514_s21 }
0x1742   :  { %v1698_v36 = vpop.permute.xlu0 %1697 }
0x1743   :  { %v1700_v38 = vsel %vm475_vm10, %v1698_v36, %v1611_v20 }
0x1744   :  { %1764 = vrot.lane.b32.xlu1 %v1700_v38, %s2514_s21 }
0x174f   :  { %v1693_v35 = vpop.permute.xlu1 %1692 }
0x1750   :  { %v1695_v22 = vsel %vm475_vm10, %v1693_v35, %v1606_v26 }
0x1751   :  { %v1703_v19 = vpack.c.bf16 %v1695_v22, %v1695_v22 }
0x1753   :  { %2218 = vmatmul.mubr.msk.bf16.vlgmr.msra.gmra.mrb[40].mxu0 %vm111_vm7, %v1703_v19 }
0x1754   :  { %1878 = vmatpush1.bf16.msra.mxu0 %v3047_v10  ;;  %1909 = vmatprep.mubr.bf16.mxu0 %v2513_v1 }
0x1755   :  { %1879 = vmatprep.subr.bf16.mxu0 %v3054_v24 }
0x1758   :  { %1880 = vmatpush1.bf16.msra.mxu0 %v3063_v28 }
0x1759   :  { %1881 = vmatprep.subr.bf16.mxu0 %v3069_v29 }
0x175c   :  { %1882 = vmatpush1.bf16.msra.mxu0 %v3077_v0 }
0x175d   :  { %1883 = vmatprep.subr.bf16.mxu0 %v3083_v41 }
0x1760   :  { %1884 = vmatpush1.bf16.msra.mxu0 %v3091_v43 }
0x1826   :  { %v1741_v62 = vpop.f32.mrb[40].mxu0 }
0x1827   :  { %v1748_v20 = vadd.f32 %v1741_v62, %v1701_v56  ;;  %v1743_v26 = vpop.f32.mrb[41].mxu0  ;;  %v1765_v56 = vpop.permute.xlu1 %1764 }
0x1828   :  { %v1749_v13 = vadd.f32 %v1743_v26, %v1702_v5  ;;  %v1745_v42 = vpop.f32.mrb[42].mxu0 }
0x1829   :  { %v2219_v48 = vmul.f32 -1.442695, %v1748_v20  ;;  %v1746_v7 = vpop.f32.mrb[43].mxu0 }
0x182a   :  { %v2220_v45 = vmul.f32 -1.442695, %v1749_v13 }
0x182b   :  { %2465 = vpow2.f32 %v2219_v48 }
0x182c   :  { %2467 = vtanh.f32 %v1749_v13 }
0x1835   :  { %v2466_v21 = vpop.eup %2465 }
0x1836   :  { %v1753_v6 = vadd.f32 1.0, %v2466_v21  ;;  %v2468_v27 = vpop.eup %2467 }
0x1838   :  { %2469 = vrcp.f32 %v1753_v6  ;;  %v3473_v6 = vsel %vm2645_vm1, %v3225_v60, %v3223_v9 }
0x1839   :  { %2471 = vpow2.f32 %v2220_v45 }
0x1842   :  { %v2470_v50 = vpop.eup %2469 }
0x1843   :  { %v1768_v37 = vmul.f32 %v2470_v50, %v2468_v27  ;;  %v2472_v47 = vpop.eup %2471  ;;  %v1767_v18 = vmul.f32 %v2470_v50, %v1765_v56 }
0x1844   :  { %v1760_v46 = vadd.f32 1.0, %v2472_v47 }
0x1845   :  { %1770 = vrot.lane.b32.xlu0 %v1768_v37, %s2514_s21 }
0x1846   :  { %2473 = vrcp.f32 %v1760_v46 }
0x1850   :  { %v2474_v4 = vpop.eup %2473 }
0x18b7   :  { %v1771_v63 = vpop.permute.xlu0 %1770 }
0x18b8   :  { %v1773_v5 = vadd.f32 %v1771_v63, %v1767_v18 }
0x18ba   :  { %2475 = vtanh.f32 %v1773_v5  ;;  %1782 = vrot.lane.b32.xlu0 %v1773_v5, %s2514_s21 }
0x18c4   :  { %v2476_v3 = vpop.eup %2475 }
0x18c5   :  { %v1775_v11 = vmul.f32 %v2476_v3, %v2474_v4 }
0x18c7   :  { %1777 = vrot.lane.b32.xlu1 %v1775_v11, %s2514_s21 }
0x192c   :  { %v1783_v52 = vpop.permute.xlu0 %1782 }
0x192d   :  { %v1785_v59 = vsel %vm569_vm11, %v1783_v52, %v1700_v38 }
0x192e   :  { %1849 = vrot.lane.b32.xlu1 %v1785_v59, %s2514_s21 }
0x1939   :  { %v1778_v57 = vpop.permute.xlu1 %1777 }
0x193a   :  { %v1780_v61 = vsel %vm569_vm11, %v1778_v57, %v1695_v22 }
0x193b   :  { %v1788_v12 = vpack.c.bf16 %v1780_v61, %v1780_v61 }
0x193d   :  { %2221 = vmatmul.mubr.msk.bf16.vlgmr.msra.gmra.mrb[40].mxu1 %vm111_vm7, %v1788_v12 }
0x193e   :  { %1963 = vmatpush1.bf16.msra.mxu1 %v3047_v10  ;;  %1994 = vmatprep.mubr.bf16.mxu1 %v2513_v1 }
0x193f   :  { %1964 = vmatprep.subr.bf16.mxu1 %v3054_v24 }
0x1942   :  { %1965 = vmatpush1.bf16.msra.mxu1 %v3063_v28 }
0x1943   :  { %1966 = vmatprep.subr.bf16.mxu1 %v3069_v29 }
0x1946   :  { %1967 = vmatpush1.bf16.msra.mxu1 %v3077_v0 }
0x1947   :  { %1968 = vmatprep.subr.bf16.mxu1 %v3083_v41 }
0x194a   :  { %1969 = vmatpush1.bf16.msra.mxu1 %v3091_v43 }
0x1a10   :  { %v1826_v51 = vpop.f32.mrb[40].mxu1 }
0x1a11   :  { %v1833_v10 = vadd.f32 %v1826_v51, %v1786_v58  ;;  %v1828_v1 = vpop.f32.mrb[41].mxu1  ;;  %v1850_v58 = vpop.permute.xlu1 %1849 }
0x1a12   :  { %v1834_v24 = vadd.f32 %v1828_v1, %v1787_v40  ;;  %v1830_v28 = vpop.f32.mrb[42].mxu1 }
0x1a13   :  { %v2222_v29 = vmul.f32 -1.442695, %v1833_v10  ;;  %v1831_v0 = vpop.f32.mrb[43].mxu1  ;;  %v3474_v10 = vsel %vm2641_vm0, %v3143_v54, %v3141_v17  ;;  %v3475_v28 = vsel %vm2645_vm1, %v3147_v2, %v3145_v53  ;;  %v2522_v17 = vmov 0.0|0.0   ;;  %v2037_v54 = vld [vmem:[%s3464_s5 + $0x8] sm:$0xff]  ;;  %v2038_v53 = vld [vmem:[%s3464_s5 + $0x10] sm:$0xff] }
0x1a14   :  { %v2223_v23 = vmul.f32 -1.442695, %v1834_v24  ;;  %2260 = vmatprep.subr.bf16.mxu0 %v2522_v17  ;;  %v2261_v2 = vpack.c.bf16 %v2037_v54, %v2036_v15  ;;  %vm2124_vm0 = vcmask 23552  }
0x1a15   :  { %2477 = vpow2.f32 %v2222_v29 }
0x1a16   :  { %2479 = vtanh.f32 %v1834_v24 }
0x1a1f   :  { %v2478_v41 = vpop.eup %2477 }
0x1a20   :  { %v1838_v43 = vadd.f32 1.0, %v2478_v41  ;;  %v2480_v8 = vpop.eup %2479 }
0x1a22   :  { %2481 = vrcp.f32 %v1838_v43 }
0x1a23   :  { %2483 = vpow2.f32 %v2223_v23  ;;  %v2039_v23 = vld [vmem:[%s3464_s5 + $0x18] sm:$0xff] }
0x1a2c   :  { %v2482_v32 = vpop.eup %2481 }
0x1a2d   :  { %v1853_v36 = vmul.f32 %v2482_v32, %v2480_v8  ;;  %v2484_v25 = vpop.eup %2483  ;;  %v1852_v31 = vmul.f32 %v2482_v32, %v1850_v58  ;;  %v2040_v58 = vld [vmem:[%s3464_s5 + $0x20] sm:$0xff] }
0x1a2e   :  { %v1845_v38 = vadd.f32 1.0, %v2484_v25  ;;  %v2264_v25 = vpack.c.bf16 %v2039_v23, %v2038_v53 }
0x1a2f   :  { %1855 = vrot.lane.b32.xlu0 %v1853_v36, %s2514_s21 }
0x1a30   :  { %2485 = vrcp.f32 %v1845_v38  ;;  %v2041_v38 = vld [vmem:[%s3464_s5 + $0x28] sm:$0xff] }
0x1a3a   :  { %v2486_v35 = vpop.eup %2485 }
0x1aa1   :  { %v1856_v34 = vpop.permute.xlu0 %1855 }
0x1aa2   :  { %v1858_v40 = vadd.f32 %v1856_v34, %v1852_v31  ;;  %v2267_v31 = vpack.c.bf16 %v2041_v38, %v2040_v58  ;;  %v2042_v34 = vld [vmem:[%s3464_s5 + $0x30] sm:$0xff] }
0x1aa4   :  { %2487 = vtanh.f32 %v1858_v40  ;;  %1867 = vrot.lane.b32.xlu0 %v1858_v40, %s2514_s21  ;;  %v2043_v40 = vld [vmem:[%s3464_s5 + $0x38] sm:$0xff] }
0x1aae   :  { %v2488_v22 = vpop.eup %2487 }
0x1aaf   :  { %v1860_v19 = vmul.f32 %v2488_v22, %v2486_v35  ;;  %v2270_v35 = vpack.c.bf16 %v2043_v40, %v2042_v34 }
0x1ab1   :  { %1862 = vrot.lane.b32.xlu1 %v1860_v19, %s2514_s21 }
0x1b16   :  { %v1868_v62 = vpop.permute.xlu0 %1867 }
0x1b17   :  { %v1870_v20 = vsel %vm661_vm12, %v1868_v62, %v1785_v59 }
0x1b18   :  { %1934 = vrot.lane.b32.xlu1 %v1870_v20, %s2514_s21 }
0x1b23   :  { %v1863_v26 = vpop.permute.xlu1 %1862 }
0x1b24   :  { %v1865_v13 = vsel %vm661_vm12, %v1863_v26, %v1780_v61 }
0x1b25   :  { %v1873_v42 = vpack.c.bf16 %v1865_v13, %v1865_v13 }
0x1b27   :  { %2224 = vmatmul.mubr.msk.bf16.vlgmr.msra.gmra.mrb[44].mxu0 %vm111_vm7, %v1873_v42 }
0x1b28   :  { %2262 = vmatpush3.bf16.msra.mxu0 %v2261_v2 }
0x1b29   :  { %2263 = vmatprep.subr.bf16.mxu0 %v2522_v17 }
0x1b2c   :  { %2265 = vmatpush3.bf16.msra.mxu0 %v2264_v25 }
0x1b2d   :  { %2266 = vmatprep.subr.bf16.mxu0 %v2522_v17 }
0x1b30   :  { %2268 = vmatpush3.bf16.msra.mxu0 %v2267_v31 }
0x1b31   :  { %2269 = vmatprep.subr.bf16.mxu0 %v2522_v17 }
0x1b34   :  { %2271 = vmatpush3.bf16.msra.mxu0 %v2270_v35 }
0x1bfa   :  { %v1911_v48 = vpop.f32.mrb[44].mxu0 }
0x1bfb   :  { %v1918_v7 = vadd.f32 %v1911_v48, %v1871_v49  ;;  %v1913_v21 = vpop.f32.mrb[45].mxu0  ;;  %v1935_v49 = vpop.permute.xlu1 %1934  ;;  %v2524_v48 = vmov 0.0  }
0x1bfc   :  { %v1919_v27 = vadd.f32 %v1913_v21, %v3473_v6  ;;  %v1915_v50 = vpop.f32.mrb[46].mxu0  ;;  %2257 = vmatprep.mubr.msk.f32.mxu0 %vm2523_vm15, %v2524_v48 }
0x1bfd   :  { %v2225_v33 = vmul.f32 -1.442695, %v1918_v7  ;;  %v1916_v37 = vpop.f32.mrb[47].mxu0 }
0x1bfe   :  { %v2226_v16 = vmul.f32 -1.442695, %v1919_v27 }
0x1bff   :  { %2489 = vpow2.f32 %v2225_v33  ;;  %v2230_v33 = vld [vmem:[%s3465_s6] ss:$0 sm:$0xff] }
0x1c00   :  { %2491 = vtanh.f32 %v1919_v27 }
0x1c09   :  { %v2490_v45 = vpop.eup %2489 }
0x1c0a   :  { %v1923_v47 = vadd.f32 1.0, %v2490_v45  ;;  %v2492_v56 = vpop.eup %2491 }
0x1c0c   :  { %2493 = vrcp.f32 %v1923_v47 }
0x1c0d   :  { %2495 = vpow2.f32 %v2226_v16 }
0x1c16   :  { %v2494_v46 = vpop.eup %2493 }
0x1c17   :  { %v1938_v18 = vmul.f32 %v2494_v46, %v2492_v56  ;;  %v2496_v55 = vpop.eup %2495  ;;  %v1937_v9 = vmul.f32 %v2494_v46, %v1935_v49 }
0x1c18   :  { %v1930_v63 = vadd.f32 1.0, %v2496_v55 }
0x1c19   :  { %1940 = vrot.lane.b32.xlu0 %v1938_v18, %s2514_s21 }
0x1c1a   :  { %2497 = vrcp.f32 %v1930_v63 }
0x1c24   :  { %v2498_v4 = vpop.eup %2497 }
0x1c8b   :  { %v1941_v60 = vpop.permute.xlu0 %1940 }
0x1c8c   :  { %v1943_v5 = vadd.f32 %v1941_v60, %v1937_v9 }
0x1c8e   :  { %2499 = vtanh.f32 %v1943_v5  ;;  %1952 = vrot.lane.b32.xlu0 %v1943_v5, %s2514_s21 }
0x1c98   :  { %v2500_v3 = vpop.eup %2499 }
0x1c99   :  { %v1945_v11 = vmul.f32 %v2500_v3, %v2498_v4 }
0x1c9b   :  { %1947 = vrot.lane.b32.xlu1 %v1945_v11, %s2514_s21 }
0x1d00   :  { %v1953_v52 = vpop.permute.xlu0 %1952 }
0x1d01   :  { %v1955_v59 = vsel %vm753_vm13, %v1953_v52, %v1870_v20 }
0x1d02   :  { %2019 = vrot.lane.b32.xlu1 %v1955_v59, %s2514_s21 }
0x1d0d   :  { %v1948_v57 = vpop.permute.xlu1 %1947 }
0x1d0e   :  { %v1950_v61 = vsel %vm753_vm13, %v1948_v57, %v1865_v13 }
0x1d0f   :  { %v1958_v12 = vpack.c.bf16 %v1950_v61, %v1950_v61 }
0x1d11   :  { %2227 = vmatmul.mubr.msk.bf16.vlgmr.msra.gmra.mrb[44].mxu1 %vm111_vm7, %v1958_v12 }
0x1d74   :  { %v2020_v62 = vpop.permute.xlu1 %2019 }
0x1de4   :  { %v1996_v51 = vpop.f32.mrb[44].mxu1 }
0x1de5   :  { %v2003_v1 = vadd.f32 %v1996_v51, %v3474_v10  ;;  %v1998_v24 = vpop.f32.mrb[45].mxu1 }
0x1de6   :  { %v2004_v29 = vadd.f32 %v1998_v24, %v3475_v28  ;;  %v2000_v0 = vpop.f32.mrb[46].mxu1 }
0x1de7   :  { %v2228_v39 = vmul.f32 -1.442695, %v2003_v1  ;;  %v2001_v41 = vpop.f32.mrb[47].mxu1 }
0x1de8   :  { %v2229_v22 = vmul.f32 -1.442695, %v2004_v29 }
0x1de9   :  { %2501 = vpow2.f32 %v2228_v39 }
0x1dea   :  { %2503 = vtanh.f32 %v2004_v29 }
0x1df3   :  { %v2502_v43 = vpop.eup %2501 }
0x1df4   :  { %v2008_v8 = vadd.f32 1.0, %v2502_v43  ;;  %v2504_v14 = vpop.eup %2503 }
0x1df6   :  { %2505 = vrcp.f32 %v2008_v8 }
0x1df7   :  { %2507 = vpow2.f32 %v2229_v22 }
0x1e00   :  { %v2506_v32 = vpop.eup %2505 }
0x1e01   :  { %v2023_v36 = vmul.f32 %v2506_v32, %v2504_v14  ;;  %v2508_v19 = vpop.eup %2507  ;;  %v2022_v26 = vmul.f32 %v2506_v32, %v2020_v62 }
0x1e02   :  { %v2015_v20 = vadd.f32 1.0, %v2508_v19 }
0x1e03   :  { %2025 = vrot.lane.b32.xlu0 %v2023_v36, %s2514_s21 }
0x1e04   :  { %2509 = vrcp.f32 %v2015_v20 }
0x1e0e   :  { %v2510_v7 = vpop.eup %2509 }
0x1e75   :  { %v2026_v13 = vpop.permute.xlu0 %2025 }
0x1e76   :  { %v2028_v42 = vadd.f32 %v2026_v13, %v2022_v26 }
0x1e78   :  { %2511 = vtanh.f32 %v2028_v42 }
0x1e82   :  { %v2512_v21 = vpop.eup %2511 }
0x1e83   :  { %v2030_v6 = vmul.f32 %v2512_v21, %v2510_v7 }
0x1e85   :  { %2032 = vrot.lane.b32.xlu1 %v2030_v6, %s2514_s21 }
0x1ef7   :  { %v2033_v27 = vpop.permute.xlu1 %2032 }
0x1ef8   :  { %v2035_v50 = vsel %vm845_vm14, %v2033_v27, %v1950_v61 }
0x1ef9   :  { %2258 = vmatmul.mubr.msk.f32.vlgmr.msra.gmra.mrb[48].mxu0 %vm111_vm7, %v2035_v50 }
0x1fcc   :  { %v2120_v37 = vpop.f32.mrb[48].mxu0 }
0x1fcd   :  { %v2121_v45 = vadd.f32 %v2230_v33, %v2120_v37  ;;  %v2259_v47 = vpop.f32.mrb[49].mxu0 }
0x1fcf   :  { %2125 = vst.msk [vmem:[%s3466_s7] sm:$0xff] %vm2124_vm0, %v2121_v45 }

</bundles_post_ra>
